<compile_context>
chip_gen: v5e
topology: v5e:2x2
jax: 0.10.0
libtpu: 0.0.40
codegen_flags: <defaults>
</compile_context>

<pallas_src>
import functools
import math

import jax
import jax.numpy as jnp
from jax import lax
from jax.experimental import pallas as pl
from jax.experimental.pallas import tpu as pltpu

# ---------------- small synthetic BERT config ----------------
VOCAB = 64
TYPE_VOCAB = 2
MAX_POS = 16
HIDDEN = 128          # (real BERT: 768; small synthetic size)
N_HEADS = 2
HEAD_DIM = HIDDEN // N_HEADS
INTERMEDIATE = 256
N_LAYERS = 2
N_TOWERS = 2
LN_EPS = 1e-12

TOWER_ORDER = ("emb_ln_g", "emb_ln_b", "qkv_w", "qkv_b", "ao_w", "ao_b",
               "ln1_g", "ln1_b", "i_w", "i_b", "o_w", "o_b",
               "ln2_g", "ln2_b", "pool_w", "pool_b")
_BF16_WEIGHTS = frozenset({"qkv_w", "ao_w", "i_w", "o_w", "pool_w"})


# ---------------- in-kernel helpers (f32 elementwise math) ----------------
def _layernorm(x, g, b):
    mu = jnp.mean(x, axis=-1, keepdims=True)
    xc = x - mu
    var = jnp.mean(xc * xc, axis=-1, keepdims=True)
    return xc * lax.rsqrt(var + LN_EPS) * g + b


def _gelu(x):
    # TODO(synk): tanh-approx GELU; HF BERT's default 'gelu' is exact erf
    # (per-element difference < 1e-3).
    c = math.sqrt(2.0 / math.pi)
    return 0.5 * x * (1.0 + jnp.tanh(c * (x + 0.044715 * x * x * x)))


# ---------------- fused encoder-tower kernel ----------------
def _tower_kernel(emb_ref, bias_ref,
                  emb_ln_g, emb_ln_b, qkv_w, qkv_b, ao_w, ao_b,
                  ln1_g, ln1_b, i_w, i_b, o_w, o_b, ln2_g, ln2_b,
                  pool_w, pool_b,
                  pooled_ref,
                  *, batch, seq, n_layers, n_heads, head_dim):
    """One whole BERT tower per grid step; everything stays in VMEM."""
    hidden = n_heads * head_dim

    # embedding LayerNorm
    h = _layernorm(emb_ref[...], emb_ln_g[...], emb_ln_b[...])        # (M, H) f32
    # additive attention-mask bias, broadcast ONCE (hoisted out of layer loop)
    attn_bias = bias_ref[...][:, None, :]                              # (B, 1, S)

    for l in range(n_layers):
        # fused QKV projection: one MXU pass with N = 3*H, bf16 operands, f32 acc
        # (the 1/sqrt(head_dim) attention scale is folded into the Q weights)
        qkv = jnp.dot(h.astype(jnp.bfloat16), qkv_w[l],
                      preferred_element_type=jnp.float32) + qkv_b[l]   # (M, 3H) f32

        # batched (over B) attention per head; ctx built as a lane-dense value
        ctx_heads = []
        for hd in range(n_heads):
            c0 = hd * head_dim
            qh = qkv[:, c0:c0 + head_dim].reshape(batch, seq, head_dim)
            kh = qkv[:, hidden + c0:hidden + c0 + head_dim].reshape(
                batch, seq, head_dim)
            vh = qkv[:, 2 * hidden + c0:2 * hidden + c0 + head_dim].reshape(
                batch, seq, head_dim)
            s = jnp.einsum('bqd,bkd->bqk',
                           qh.astype(jnp.bfloat16), kh.astype(jnp.bfloat16),
                           preferred_element_type=jnp.float32) + attn_bias
            s = s - jnp.max(s, axis=-1, keepdims=True)
            p = jnp.exp(s)
            p = p * pl.reciprocal(jnp.sum(p, axis=-1, keepdims=True),
                                  approx=True)
            ctx_h = jnp.einsum('bqk,bkd->bqd',
                               p.astype(jnp.bfloat16), vh.astype(jnp.bfloat16),
                               preferred_element_type=jnp.float32)     # (B, S, D)
            ctx_heads.append(ctx_h.reshape(batch * seq, head_dim))
        ctx = jnp.concatenate(ctx_heads, axis=-1)                      # (M, H)

        attn_out = jnp.dot(ctx.astype(jnp.bfloat16), ao_w[l],
                           preferred_element_type=jnp.float32) + ao_b[l]
        h = _layernorm(attn_out + h, ln1_g[l], ln1_b[l])

        inter = _gelu(jnp.dot(h.astype(jnp.bfloat16), i_w[l],
                              preferred_element_type=jnp.float32) + i_b[l])
        ffn = jnp.dot(inter.astype(jnp.bfloat16), o_w[l],
                      preferred_element_type=jnp.float32) + o_b[l]
        h = _layernorm(ffn + h, ln2_g[l], ln2_b[l])

    # pooler on the [CLS] rows: tile-aligned in-register slice (seq == 8 == f32
    # sublane tile), no scratch copies; output is lane-dense (B, 128).
    cls = h.reshape(batch, seq, hidden)[:, 0, :]                       # (B, H)
    pooled = jnp.tanh(
        jnp.dot(cls.astype(jnp.bfloat16), pool_w[...],
                preferred_element_type=jnp.float32) + pool_b[...])
    pooled_ref[...] = pooled.astype(pooled_ref.dtype)


def run_towers(emb, bias, tower, batch, seq):
    """emb: (2, B*S, H) f32, bias: (2, B, S) f32, tower: stacked per-tower params."""
    def spec(arr):
        nd = arr.ndim
        return pl.BlockSpec((None,) + tuple(arr.shape[1:]),
                            lambda t, _nd=nd: (t,) + (0,) * (_nd - 1))

    kern = functools.partial(_tower_kernel, batch=batch, seq=seq,
                             n_layers=N_LAYERS, n_heads=N_HEADS,
                             head_dim=HEAD_DIM)
    return pl.pallas_call(
        kern,
        out_shape=jax.ShapeDtypeStruct((N_TOWERS, batch, HIDDEN), jnp.float32),
        grid=(N_TOWERS,),
        in_specs=[spec(emb), spec(bias)] + [spec(tower[k]) for k in TOWER_ORDER],
        out_specs=pl.BlockSpec((None, batch, HIDDEN), lambda t: (t, 0, 0)),
        compiler_params=pltpu.CompilerParams(
            dimension_semantics=("parallel",)),   # v7x: one tower per TensorCore
    )(emb, bias, *[tower[k] for k in TOWER_ORDER])


# ---------------- parameter init (deterministic, synthetic) ----------------
def init_bert_params(key):
    keys = iter(jax.random.split(key, 32))

    def nrm(shape):
        return (0.02 * jax.random.normal(next(keys), shape)).astype(jnp.float32)

    # Q/K/V concatenated along the output axis -> single matmul per layer.
    # Fold the 1/sqrt(head_dim) attention scale into the Q columns.
    scale = 1.0 / math.sqrt(HEAD_DIM)
    qkv_w = nrm((N_LAYERS, HIDDEN, 3 * HIDDEN))
    qkv_w = qkv_w.at[:, :, :HIDDEN].multiply(scale)
    qkv_b = jnp.zeros((N_LAYERS, 1, 3 * HIDDEN), jnp.float32)
    qkv_b = qkv_b.at[:, :, :HIDDEN].multiply(scale)   # no-op for zeros, kept general

    return {
        "word_emb": nrm((VOCAB, HIDDEN)),
        "pos_emb": nrm((MAX_POS, HIDDEN)),
        "type_emb": nrm((TYPE_VOCAB, HIDDEN)),
        "emb_ln_g": jnp.ones((1, HIDDEN), jnp.float32),
        "emb_ln_b": jnp.zeros((1, HIDDEN), jnp.float32),
        "qkv_w": qkv_w,
        "qkv_b": qkv_b,
        "ao_w": nrm((N_LAYERS, HIDDEN, HIDDEN)),
        "ao_b": jnp.zeros((N_LAYERS, 1, HIDDEN), jnp.float32),
        "ln1_g": jnp.ones((N_LAYERS, 1, HIDDEN), jnp.float32),
        "ln1_b": jnp.zeros((N_LAYERS, 1, HIDDEN), jnp.float32),
        "i_w": nrm((N_LAYERS, HIDDEN, INTERMEDIATE)),
        "i_b": jnp.zeros((N_LAYERS, 1, INTERMEDIATE), jnp.float32),
        "o_w": nrm((N_LAYERS, INTERMEDIATE, HIDDEN)),
        "o_b": jnp.zeros((N_LAYERS, 1, HIDDEN), jnp.float32),
        "ln2_g": jnp.ones((N_LAYERS, 1, HIDDEN), jnp.float32),
        "ln2_b": jnp.zeros((N_LAYERS, 1, HIDDEN), jnp.float32),
        "pool_w": nrm((HIDDEN, HIDDEN)),
        "pool_b": jnp.zeros((1, HIDDEN), jnp.float32),
    }


def init_params(key):
    k1, k2, k3 = jax.random.split(key, 3)
    p1, p2 = init_bert_params(k1), init_bert_params(k2)
    tower = {}
    for name in TOWER_ORDER:
        stacked = jnp.stack([p1[name], p2[name]], axis=0)
        if name in _BF16_WEIGHTS:
            # matmul operands stored bf16 (MXU dtype); accumulation is f32 in-kernel
            stacked = stacked.astype(jnp.bfloat16)
        tower[name] = stacked
    emb = {name: jnp.stack([p1[name], p2[name]], axis=0)
           for name in ("word_emb", "pos_emb", "type_emb")}
    return {
        "emb": emb,                # (2, ...) stacked embedding tables
        "tower": tower,
        "out_w": (0.02 * jax.random.normal(k3, (1, HIDDEN))).astype(jnp.float32),
        "out_b": jnp.zeros((1,), jnp.float32),
    }


# ---------------- model forward ----------------
def bert_2heads_forward(params, ids1, ids2, tt1, tt2, m1, m2):
    B, S = ids1.shape

    # embedding gathers are glue, in plain JAX; built directly as (2, B*S, H)
    ids = jnp.stack([ids1, ids2], axis=0)                              # (2, B, S)
    tts = jnp.stack([tt1, tt2], axis=0)
    masks = jnp.stack([m1, m2], axis=0)
    gather = jax.vmap(lambda table, idx: jnp.take(table, idx, axis=0))
    emb = (gather(params["emb"]["word_emb"], ids)
           + gather(params["emb"]["type_emb"], tts)
           + params["emb"]["pos_emb"][:, None, :S, :])                 # (2, B, S, H)
    emb = emb.reshape(N_TOWERS, B * S, HIDDEN).astype(jnp.float32)

    # HF-style additive attention mask bias, kept tiny as (2, B, S)
    bias = (1.0 - masks.astype(jnp.float32)) * -10000.0

    pooled = run_towers(emb, bias, params["tower"], B, S)              # (2, B, H)

    # TODO(synk): reference forward is truncated after computing b1/b2; we use
    # the common pattern out = Linear(dropout(b1 + b2)); Dropout(0.2) is the
    # identity at inference time. The tiny Linear(H,1) head is a trivial
    # reduction done in plain XLA (removes a whole pallas_call launch).
    feat = pooled[0] + pooled[1]                                       # (B, H)
    return jnp.dot(feat, params["out_w"].T) + params["out_b"]          # (B, 1)


# ---------------- main ----------------
if __name__ == "__main__":
    key = jax.random.PRNGKey(0)
    kp, kd = jax.random.split(key)
    params = init_params(kp)

    B, S = 2, 8
    k1, k2 = jax.random.split(kd)
    ids1 = jax.random.randint(k1, (B, S), 0, VOCAB, dtype=jnp.int32)
    ids2 = jax.random.randint(k2, (B, S), 0, VOCAB, dtype=jnp.int32)
    token_type_ids1 = jnp.zeros((B, S), jnp.int32)
    token_type_ids2 = jnp.zeros((B, S), jnp.int32)
    mask1 = jnp.ones((B, S), jnp.int32)
    mask2 = jnp.ones((B, S), jnp.int32)

    fwd = jax.jit(bert_2heads_forward)
    out = fwd(params, ids1, ids2, token_type_ids1, token_type_ids2, mask1, mask2)
    jax.block_until_ready(out)
    assert out.shape == (B, 1) and out.dtype == jnp.float32
    print("KERNEL_OK")
</pallas_src>

<mosaic_0001>
module attributes {stable_mosaic.version = 11 : i64} {
  func.func @_tower_kernel(%arg0: i32, %arg1: memref<1x16x128xf32, #tpu.memory_space<vmem>>, %arg2: memref<1x2x8xf32, #tpu.memory_space<vmem>>, %arg3: memref<1x1x128xf32, #tpu.memory_space<vmem>>, %arg4: memref<1x1x128xf32, #tpu.memory_space<vmem>>, %arg5: memref<1x2x128x384xbf16, #tpu.memory_space<vmem>>, %arg6: memref<1x2x1x384xf32, #tpu.memory_space<vmem>>, %arg7: memref<1x2x128x128xbf16, #tpu.memory_space<vmem>>, %arg8: memref<1x2x1x128xf32, #tpu.memory_space<vmem>>, %arg9: memref<1x2x1x128xf32, #tpu.memory_space<vmem>>, %arg10: memref<1x2x1x128xf32, #tpu.memory_space<vmem>>, %arg11: memref<1x2x128x256xbf16, #tpu.memory_space<vmem>>, %arg12: memref<1x2x1x256xf32, #tpu.memory_space<vmem>>, %arg13: memref<1x2x256x128xbf16, #tpu.memory_space<vmem>>, %arg14: memref<1x2x1x128xf32, #tpu.memory_space<vmem>>, %arg15: memref<1x2x1x128xf32, #tpu.memory_space<vmem>>, %arg16: memref<1x2x1x128xf32, #tpu.memory_space<vmem>>, %arg17: memref<1x128x128xbf16, #tpu.memory_space<vmem>>, %arg18: memref<1x1x128xf32, #tpu.memory_space<vmem>>, %arg19: memref<1x2x128xf32, #tpu.memory_space<vmem>>) attributes {dimension_semantics = [#tpu.dimension_semantics<parallel>], iteration_bounds = array<i64: 2>, scalar_prefetch = 0 : i64, scratch_operands = 0 : i64, tpu.core_type = #tpu.core_type<tc>, window_params = [{transform_indices = @transform_0, window_bounds = array<i64: 1, 16, 128>}, {transform_indices = @transform_1, window_bounds = array<i64: 1, 2, 8>}, {transform_indices = @transform_2, window_bounds = array<i64: 1, 1, 128>}, {transform_indices = @transform_3, window_bounds = array<i64: 1, 1, 128>}, {transform_indices = @transform_4, window_bounds = array<i64: 1, 2, 128, 384>}, {transform_indices = @transform_5, window_bounds = array<i64: 1, 2, 1, 384>}, {transform_indices = @transform_6, window_bounds = array<i64: 1, 2, 128, 128>}, {transform_indices = @transform_7, window_bounds = array<i64: 1, 2, 1, 128>}, {transform_indices = @transform_8, window_bounds = array<i64: 1, 2, 1, 128>}, {transform_indices = @transform_9, window_bounds = array<i64: 1, 2, 1, 128>}, {transform_indices = @transform_10, window_bounds = array<i64: 1, 2, 128, 256>}, {transform_indices = @transform_11, window_bounds = array<i64: 1, 2, 1, 256>}, {transform_indices = @transform_12, window_bounds = array<i64: 1, 2, 256, 128>}, {transform_indices = @transform_13, window_bounds = array<i64: 1, 2, 1, 128>}, {transform_indices = @transform_14, window_bounds = array<i64: 1, 2, 1, 128>}, {transform_indices = @transform_15, window_bounds = array<i64: 1, 2, 1, 128>}, {transform_indices = @transform_16, window_bounds = array<i64: 1, 128, 128>}, {transform_indices = @transform_17, window_bounds = array<i64: 1, 1, 128>}, {transform_indices = @transform_18, window_bounds = array<i64: 1, 2, 128>}]} {
    %c0 = arith.constant 0 : index
    %c0_0 = arith.constant 0 : index
    %c0_1 = arith.constant 0 : index
    %0 = vector.load %arg1[%c0, %c0_0, %c0_1] : memref<1x16x128xf32, #tpu.memory_space<vmem>>, vector<1x16x128xf32>
    %1 = vector.shape_cast %0 : vector<1x16x128xf32> to vector<16x128xf32>
    %c0_2 = arith.constant 0 : index
    %c0_3 = arith.constant 0 : index
    %c0_4 = arith.constant 0 : index
    %2 = vector.load %arg3[%c0_2, %c0_3, %c0_4] : memref<1x1x128xf32, #tpu.memory_space<vmem>>, vector<1x1x128xf32>
    %3 = vector.shape_cast %2 : vector<1x1x128xf32> to vector<1x128xf32>
    %c0_5 = arith.constant 0 : index
    %c0_6 = arith.constant 0 : index
    %c0_7 = arith.constant 0 : index
    %4 = vector.load %arg4[%c0_5, %c0_6, %c0_7] : memref<1x1x128xf32, #tpu.memory_space<vmem>>, vector<1x1x128xf32>
    %5 = vector.shape_cast %4 : vector<1x1x128xf32> to vector<1x128xf32>
    %cst = arith.constant dense<0.000000e+00> : vector<16xf32>
    %6 = vector.multi_reduction <add>, %1, %cst [1] : vector<16x128xf32> to vector<16xf32>
    %7 = vector.shape_cast %6 : vector<16xf32> to vector<16x1xf32>
    %cst_8 = arith.constant 1.280000e+02 : f32
    %8 = vector.broadcast %cst_8 : f32 to vector<16x1xf32>
    %9 = arith.divf %7, %8 : vector<16x1xf32>
    %10 = vector.broadcast %9 : vector<16x1xf32> to vector<16x128xf32>
    %11 = arith.subf %1, %10 : vector<16x128xf32>
    %12 = arith.mulf %11, %11 : vector<16x128xf32>
    %cst_9 = arith.constant dense<0.000000e+00> : vector<16xf32>
    %13 = vector.multi_reduction <add>, %12, %cst_9 [1] : vector<16x128xf32> to vector<16xf32>
    %14 = vector.shape_cast %13 : vector<16xf32> to vector<16x1xf32>
    %cst_10 = arith.constant 1.280000e+02 : f32
    %15 = vector.broadcast %cst_10 : f32 to vector<16x1xf32>
    %16 = arith.divf %14, %15 : vector<16x1xf32>
    %cst_11 = arith.constant 9.99999996E-13 : f32
    %17 = vector.broadcast %cst_11 : f32 to vector<16x1xf32>
    %18 = arith.addf %16, %17 : vector<16x1xf32>
    %19 = math.rsqrt %18 : vector<16x1xf32>
    %20 = vector.broadcast %19 : vector<16x1xf32> to vector<16x128xf32>
    %21 = arith.mulf %11, %20 : vector<16x128xf32>
    %22 = vector.broadcast %3 : vector<1x128xf32> to vector<16x128xf32>
    %23 = arith.mulf %21, %22 : vector<16x128xf32>
    %24 = vector.broadcast %5 : vector<1x128xf32> to vector<16x128xf32>
    %25 = arith.addf %23, %24 : vector<16x128xf32>
    %c0_12 = arith.constant 0 : index
    %c0_13 = arith.constant 0 : index
    %c0_14 = arith.constant 0 : index
    %26 = vector.load %arg2[%c0_12, %c0_13, %c0_14] : memref<1x2x8xf32, #tpu.memory_space<vmem>>, vector<1x2x8xf32>
    %27 = vector.shape_cast %26 : vector<1x2x8xf32> to vector<2x8xf32>
    %28 = vector.shape_cast %27 : vector<2x8xf32> to vector<2x1x8xf32>
    %29 = arith.truncf %25 : vector<16x128xf32> to vector<16x128xbf16>
    %c0_15 = arith.constant 0 : index
    %c0_16 = arith.constant 0 : index
    %c0_17 = arith.constant 0 : index
    %c0_18 = arith.constant 0 : index
    %30 = vector.load %arg5[%c0_15, %c0_16, %c0_17, %c0_18] : memref<1x2x128x384xbf16, #tpu.memory_space<vmem>>, vector<1x1x128x384xbf16>
    %31 = vector.shape_cast %30 : vector<1x1x128x384xbf16> to vector<128x384xbf16>
    %cst_19 = arith.constant dense<0.000000e+00> : vector<16x384xf32>
    %32 = tpu.matmul %29, %31, %cst_19 {dimension_numbers = #tpu.dot_dimension_numbers<[1], [0], [0], [1], [0, 0, 1, 1], [], []>} : vector<16x128xbf16>, vector<128x384xbf16>, vector<16x384xf32> -> vector<16x384xf32>
    %c0_20 = arith.constant 0 : index
    %c0_21 = arith.constant 0 : index
    %c0_22 = arith.constant 0 : index
    %c0_23 = arith.constant 0 : index
    %33 = vector.load %arg6[%c0_20, %c0_21, %c0_22, %c0_23] : memref<1x2x1x384xf32, #tpu.memory_space<vmem>>, vector<1x1x1x384xf32>
    %34 = vector.shape_cast %33 : vector<1x1x1x384xf32> to vector<1x384xf32>
    %35 = vector.broadcast %34 : vector<1x384xf32> to vector<16x384xf32>
    %36 = arith.addf %32, %35 : vector<16x384xf32>
    %37 = vector.extract_strided_slice %36 {offsets = [0, 0], sizes = [16, 64], strides = [1, 1]} : vector<16x384xf32> to vector<16x64xf32>
    %38 = vector.shape_cast %37 : vector<16x64xf32> to vector<2x8x64xf32>
    %39 = vector.extract_strided_slice %36 {offsets = [0, 128], sizes = [16, 64], strides = [1, 1]} : vector<16x384xf32> to vector<16x64xf32>
    %40 = vector.shape_cast %39 : vector<16x64xf32> to vector<2x8x64xf32>
    %41 = vector.extract_strided_slice %36 {offsets = [0, 256], sizes = [16, 64], strides = [1, 1]} : vector<16x384xf32> to vector<16x64xf32>
    %42 = vector.shape_cast %41 : vector<16x64xf32> to vector<2x8x64xf32>
    %43 = arith.truncf %38 : vector<2x8x64xf32> to vector<2x8x64xbf16>
    %44 = arith.truncf %40 : vector<2x8x64xf32> to vector<2x8x64xbf16>
    "tpu.trace_start"() <{level = 10 : i32, message = "bqd,bkd->bqk"}> : () -> ()
    %cst_24 = arith.constant dense<0.000000e+00> : vector<2x8x8xf32>
    %45 = tpu.matmul %43, %44, %cst_24 {dimension_numbers = #tpu.dot_dimension_numbers<[2], [2], [1], [1], [0, 0, 0, 1, 1, 1], [0], [0]>} : vector<2x8x64xbf16>, vector<2x8x64xbf16>, vector<2x8x8xf32> -> vector<2x8x8xf32>
    "tpu.trace_stop"() : () -> ()
    %46 = vector.broadcast %28 : vector<2x1x8xf32> to vector<2x8x8xf32>
    %47 = arith.addf %45, %46 : vector<2x8x8xf32>
    %cst_25 = arith.constant dense<0xFF800000> : vector<2x8xf32>
    %48 = vector.multi_reduction <maximumf>, %47, %cst_25 [2] : vector<2x8x8xf32> to vector<2x8xf32>
    %49 = vector.shape_cast %48 : vector<2x8xf32> to vector<2x8x1xf32>
    %50 = vector.broadcast %49 : vector<2x8x1xf32> to vector<2x8x8xf32>
    %51 = arith.subf %47, %50 : vector<2x8x8xf32>
    %52 = math.exp %51 : vector<2x8x8xf32>
    %cst_26 = arith.constant dense<0.000000e+00> : vector<2x8xf32>
    %53 = vector.multi_reduction <add>, %52, %cst_26 [2] : vector<2x8x8xf32> to vector<2x8xf32>
    %54 = vector.shape_cast %53 : vector<2x8xf32> to vector<2x8x1xf32>
    %55 = tpu.reciprocal %54 {approx = true} : vector<2x8x1xf32> -> vector<2x8x1xf32>
    %56 = vector.broadcast %55 : vector<2x8x1xf32> to vector<2x8x8xf32>
    %57 = arith.mulf %52, %56 : vector<2x8x8xf32>
    %58 = arith.truncf %57 : vector<2x8x8xf32> to vector<2x8x8xbf16>
    %59 = arith.truncf %42 : vector<2x8x64xf32> to vector<2x8x64xbf16>
    "tpu.trace_start"() <{level = 10 : i32, message = "bqk,bkd->bqd"}> : () -> ()
    %cst_27 = arith.constant dense<0.000000e+00> : vector<2x8x64xf32>
    %60 = tpu.matmul %58, %59, %cst_27 {dimension_numbers = #tpu.dot_dimension_numbers<[2], [1], [1], [2], [0, 0, 0, 1, 1, 2], [0], [0]>} : vector<2x8x8xbf16>, vector<2x8x64xbf16>, vector<2x8x64xf32> -> vector<2x8x64xf32>
    "tpu.trace_stop"() : () -> ()
    %61 = vector.shape_cast %60 : vector<2x8x64xf32> to vector<16x64xf32>
    %62 = vector.extract_strided_slice %36 {offsets = [0, 64], sizes = [16, 64], strides = [1, 1]} : vector<16x384xf32> to vector<16x64xf32>
    %63 = vector.shape_cast %62 : vector<16x64xf32> to vector<2x8x64xf32>
    %64 = vector.extract_strided_slice %36 {offsets = [0, 192], sizes = [16, 64], strides = [1, 1]} : vector<16x384xf32> to vector<16x64xf32>
    %65 = vector.shape_cast %64 : vector<16x64xf32> to vector<2x8x64xf32>
    %66 = vector.extract_strided_slice %36 {offsets = [0, 320], sizes = [16, 64], strides = [1, 1]} : vector<16x384xf32> to vector<16x64xf32>
    %67 = vector.shape_cast %66 : vector<16x64xf32> to vector<2x8x64xf32>
    %68 = arith.truncf %63 : vector<2x8x64xf32> to vector<2x8x64xbf16>
    %69 = arith.truncf %65 : vector<2x8x64xf32> to vector<2x8x64xbf16>
    "tpu.trace_start"() <{level = 10 : i32, message = "bqd,bkd->bqk"}> : () -> ()
    %cst_28 = arith.constant dense<0.000000e+00> : vector<2x8x8xf32>
    %70 = tpu.matmul %68, %69, %cst_28 {dimension_numbers = #tpu.dot_dimension_numbers<[2], [2], [1], [1], [0, 0, 0, 1, 1, 1], [0], [0]>} : vector<2x8x64xbf16>, vector<2x8x64xbf16>, vector<2x8x8xf32> -> vector<2x8x8xf32>
    "tpu.trace_stop"() : () -> ()
    %71 = vector.broadcast %28 : vector<2x1x8xf32> to vector<2x8x8xf32>
    %72 = arith.addf %70, %71 : vector<2x8x8xf32>
    %cst_29 = arith.constant dense<0xFF800000> : vector<2x8xf32>
    %73 = vector.multi_reduction <maximumf>, %72, %cst_29 [2] : vector<2x8x8xf32> to vector<2x8xf32>
    %74 = vector.shape_cast %73 : vector<2x8xf32> to vector<2x8x1xf32>
    %75 = vector.broadcast %74 : vector<2x8x1xf32> to vector<2x8x8xf32>
    %76 = arith.subf %72, %75 : vector<2x8x8xf32>
    %77 = math.exp %76 : vector<2x8x8xf32>
    %cst_30 = arith.constant dense<0.000000e+00> : vector<2x8xf32>
    %78 = vector.multi_reduction <add>, %77, %cst_30 [2] : vector<2x8x8xf32> to vector<2x8xf32>
    %79 = vector.shape_cast %78 : vector<2x8xf32> to vector<2x8x1xf32>
    %80 = tpu.reciprocal %79 {approx = true} : vector<2x8x1xf32> -> vector<2x8x1xf32>
    %81 = vector.broadcast %80 : vector<2x8x1xf32> to vector<2x8x8xf32>
    %82 = arith.mulf %77, %81 : vector<2x8x8xf32>
    %83 = arith.truncf %82 : vector<2x8x8xf32> to vector<2x8x8xbf16>
    %84 = arith.truncf %67 : vector<2x8x64xf32> to vector<2x8x64xbf16>
    "tpu.trace_start"() <{level = 10 : i32, message = "bqk,bkd->bqd"}> : () -> ()
    %cst_31 = arith.constant dense<0.000000e+00> : vector<2x8x64xf32>
    %85 = tpu.matmul %83, %84, %cst_31 {dimension_numbers = #tpu.dot_dimension_numbers<[2], [1], [1], [2], [0, 0, 0, 1, 1, 2], [0], [0]>} : vector<2x8x8xbf16>, vector<2x8x64xbf16>, vector<2x8x64xf32> -> vector<2x8x64xf32>
    "tpu.trace_stop"() : () -> ()
    %86 = vector.shape_cast %85 : vector<2x8x64xf32> to vector<16x64xf32>
    %87 = tpu.concatenate %61, %86 in 1 : vector<16x64xf32>, vector<16x64xf32> -> vector<16x128xf32>
    %88 = arith.truncf %87 : vector<16x128xf32> to vector<16x128xbf16>
    %c0_32 = arith.constant 0 : index
    %c0_33 = arith.constant 0 : index
    %c0_34 = arith.constant 0 : index
    %c0_35 = arith.constant 0 : index
    %89 = vector.load %arg7[%c0_32, %c0_33, %c0_34, %c0_35] : memref<1x2x128x128xbf16, #tpu.memory_space<vmem>>, vector<1x1x128x128xbf16>
    %90 = vector.shape_cast %89 : vector<1x1x128x128xbf16> to vector<128x128xbf16>
    %cst_36 = arith.constant dense<0.000000e+00> : vector<16x128xf32>
    %91 = tpu.matmul %88, %90, %cst_36 {dimension_numbers = #tpu.dot_dimension_numbers<[1], [0], [0], [1], [0, 0, 1, 1], [], []>} : vector<16x128xbf16>, vector<128x128xbf16>, vector<16x128xf32> -> vector<16x128xf32>
    %c0_37 = arith.constant 0 : index
    %c0_38 = arith.constant 0 : index
    %c0_39 = arith.constant 0 : index
    %c0_40 = arith.constant 0 : index
    %92 = vector.load %arg8[%c0_37, %c0_38, %c0_39, %c0_40] : memref<1x2x1x128xf32, #tpu.memory_space<vmem>>, vector<1x1x1x128xf32>
    %93 = vector.shape_cast %92 : vector<1x1x1x128xf32> to vector<1x128xf32>
    %94 = vector.broadcast %93 : vector<1x128xf32> to vector<16x128xf32>
    %95 = arith.addf %91, %94 : vector<16x128xf32>
    %96 = arith.addf %95, %25 : vector<16x128xf32>
    %c0_41 = arith.constant 0 : index
    %c0_42 = arith.constant 0 : index
    %c0_43 = arith.constant 0 : index
    %c0_44 = arith.constant 0 : index
    %97 = vector.load %arg9[%c0_41, %c0_42, %c0_43, %c0_44] : memref<1x2x1x128xf32, #tpu.memory_space<vmem>>, vector<1x1x1x128xf32>
    %98 = vector.shape_cast %97 : vector<1x1x1x128xf32> to vector<1x128xf32>
    %c0_45 = arith.constant 0 : index
    %c0_46 = arith.constant 0 : index
    %c0_47 = arith.constant 0 : index
    %c0_48 = arith.constant 0 : index
    %99 = vector.load %arg10[%c0_45, %c0_46, %c0_47, %c0_48] : memref<1x2x1x128xf32, #tpu.memory_space<vmem>>, vector<1x1x1x128xf32>
    %100 = vector.shape_cast %99 : vector<1x1x1x128xf32> to vector<1x128xf32>
    %cst_49 = arith.constant dense<0.000000e+00> : vector<16xf32>
    %101 = vector.multi_reduction <add>, %96, %cst_49 [1] : vector<16x128xf32> to vector<16xf32>
    %102 = vector.shape_cast %101 : vector<16xf32> to vector<16x1xf32>
    %cst_50 = arith.constant 1.280000e+02 : f32
    %103 = vector.broadcast %cst_50 : f32 to vector<16x1xf32>
    %104 = arith.divf %102, %103 : vector<16x1xf32>
    %105 = vector.broadcast %104 : vector<16x1xf32> to vector<16x128xf32>
    %106 = arith.subf %96, %105 : vector<16x128xf32>
    %107 = arith.mulf %106, %106 : vector<16x128xf32>
    %cst_51 = arith.constant dense<0.000000e+00> : vector<16xf32>
    %108 = vector.multi_reduction <add>, %107, %cst_51 [1] : vector<16x128xf32> to vector<16xf32>
    %109 = vector.shape_cast %108 : vector<16xf32> to vector<16x1xf32>
    %cst_52 = arith.constant 1.280000e+02 : f32
    %110 = vector.broadcast %cst_52 : f32 to vector<16x1xf32>
    %111 = arith.divf %109, %110 : vector<16x1xf32>
    %cst_53 = arith.constant 9.99999996E-13 : f32
    %112 = vector.broadcast %cst_53 : f32 to vector<16x1xf32>
    %113 = arith.addf %111, %112 : vector<16x1xf32>
    %114 = math.rsqrt %113 : vector<16x1xf32>
    %115 = vector.broadcast %114 : vector<16x1xf32> to vector<16x128xf32>
    %116 = arith.mulf %106, %115 : vector<16x128xf32>
    %117 = vector.broadcast %98 : vector<1x128xf32> to vector<16x128xf32>
    %118 = arith.mulf %116, %117 : vector<16x128xf32>
    %119 = vector.broadcast %100 : vector<1x128xf32> to vector<16x128xf32>
    %120 = arith.addf %118, %119 : vector<16x128xf32>
    %121 = arith.truncf %120 : vector<16x128xf32> to vector<16x128xbf16>
    %c0_54 = arith.constant 0 : index
    %c0_55 = arith.constant 0 : index
    %c0_56 = arith.constant 0 : index
    %c0_57 = arith.constant 0 : index
    %122 = vector.load %arg11[%c0_54, %c0_55, %c0_56, %c0_57] : memref<1x2x128x256xbf16, #tpu.memory_space<vmem>>, vector<1x1x128x256xbf16>
    %123 = vector.shape_cast %122 : vector<1x1x128x256xbf16> to vector<128x256xbf16>
    %cst_58 = arith.constant dense<0.000000e+00> : vector<16x256xf32>
    %124 = tpu.matmul %121, %123, %cst_58 {dimension_numbers = #tpu.dot_dimension_numbers<[1], [0], [0], [1], [0, 0, 1, 1], [], []>} : vector<16x128xbf16>, vector<128x256xbf16>, vector<16x256xf32> -> vector<16x256xf32>
    %c0_59 = arith.constant 0 : index
    %c0_60 = arith.constant 0 : index
    %c0_61 = arith.constant 0 : index
    %c0_62 = arith.constant 0 : index
    %125 = vector.load %arg12[%c0_59, %c0_60, %c0_61, %c0_62] : memref<1x2x1x256xf32, #tpu.memory_space<vmem>>, vector<1x1x1x256xf32>
    %126 = vector.shape_cast %125 : vector<1x1x1x256xf32> to vector<1x256xf32>
    %127 = vector.broadcast %126 : vector<1x256xf32> to vector<16x256xf32>
    %128 = arith.addf %124, %127 : vector<16x256xf32>
    %cst_63 = arith.constant 5.000000e-01 : f32
    %129 = vector.broadcast %cst_63 : f32 to vector<16x256xf32>
    %130 = arith.mulf %129, %128 : vector<16x256xf32>
    %cst_64 = arith.constant 4.471500e-02 : f32
    %131 = vector.broadcast %cst_64 : f32 to vector<16x256xf32>
    %132 = arith.mulf %131, %128 : vector<16x256xf32>
    %133 = arith.mulf %132, %128 : vector<16x256xf32>
    %134 = arith.mulf %133, %128 : vector<16x256xf32>
    %135 = arith.addf %128, %134 : vector<16x256xf32>
    %cst_65 = arith.constant 0.797884583 : f32
    %136 = vector.broadcast %cst_65 : f32 to vector<16x256xf32>
    %137 = arith.mulf %136, %135 : vector<16x256xf32>
    %138 = math.tanh %137 : vector<16x256xf32>
    %cst_66 = arith.constant 1.000000e+00 : f32
    %139 = vector.broadcast %cst_66 : f32 to vector<16x256xf32>
    %140 = arith.addf %139, %138 : vector<16x256xf32>
    %141 = arith.mulf %130, %140 : vector<16x256xf32>
    %142 = arith.truncf %141 : vector<16x256xf32> to vector<16x256xbf16>
    %c0_67 = arith.constant 0 : index
    %c0_68 = arith.constant 0 : index
    %c0_69 = arith.constant 0 : index
    %c0_70 = arith.constant 0 : index
    %143 = vector.load %arg13[%c0_67, %c0_68, %c0_69, %c0_70] : memref<1x2x256x128xbf16, #tpu.memory_space<vmem>>, vector<1x1x256x128xbf16>
    %144 = vector.shape_cast %143 : vector<1x1x256x128xbf16> to vector<256x128xbf16>
    %cst_71 = arith.constant dense<0.000000e+00> : vector<16x128xf32>
    %145 = tpu.matmul %142, %144, %cst_71 {dimension_numbers = #tpu.dot_dimension_numbers<[1], [0], [0], [1], [0, 0, 1, 1], [], []>} : vector<16x256xbf16>, vector<256x128xbf16>, vector<16x128xf32> -> vector<16x128xf32>
    %c0_72 = arith.constant 0 : index
    %c0_73 = arith.constant 0 : index
    %c0_74 = arith.constant 0 : index
    %c0_75 = arith.constant 0 : index
    %146 = vector.load %arg14[%c0_72, %c0_73, %c0_74, %c0_75] : memref<1x2x1x128xf32, #tpu.memory_space<vmem>>, vector<1x1x1x128xf32>
    %147 = vector.shape_cast %146 : vector<1x1x1x128xf32> to vector<1x128xf32>
    %148 = vector.broadcast %147 : vector<1x128xf32> to vector<16x128xf32>
    %149 = arith.addf %145, %148 : vector<16x128xf32>
    %150 = arith.addf %149, %120 : vector<16x128xf32>
    %c0_76 = arith.constant 0 : index
    %c0_77 = arith.constant 0 : index
    %c0_78 = arith.constant 0 : index
    %c0_79 = arith.constant 0 : index
    %151 = vector.load %arg15[%c0_76, %c0_77, %c0_78, %c0_79] : memref<1x2x1x128xf32, #tpu.memory_space<vmem>>, vector<1x1x1x128xf32>
    %152 = vector.shape_cast %151 : vector<1x1x1x128xf32> to vector<1x128xf32>
    %c0_80 = arith.constant 0 : index
    %c0_81 = arith.constant 0 : index
    %c0_82 = arith.constant 0 : index
    %c0_83 = arith.constant 0 : index
    %153 = vector.load %arg16[%c0_80, %c0_81, %c0_82, %c0_83] : memref<1x2x1x128xf32, #tpu.memory_space<vmem>>, vector<1x1x1x128xf32>
    %154 = vector.shape_cast %153 : vector<1x1x1x128xf32> to vector<1x128xf32>
    %cst_84 = arith.constant dense<0.000000e+00> : vector<16xf32>
    %155 = vector.multi_reduction <add>, %150, %cst_84 [1] : vector<16x128xf32> to vector<16xf32>
    %156 = vector.shape_cast %155 : vector<16xf32> to vector<16x1xf32>
    %cst_85 = arith.constant 1.280000e+02 : f32
    %157 = vector.broadcast %cst_85 : f32 to vector<16x1xf32>
    %158 = arith.divf %156, %157 : vector<16x1xf32>
    %159 = vector.broadcast %158 : vector<16x1xf32> to vector<16x128xf32>
    %160 = arith.subf %150, %159 : vector<16x128xf32>
    %161 = arith.mulf %160, %160 : vector<16x128xf32>
    %cst_86 = arith.constant dense<0.000000e+00> : vector<16xf32>
    %162 = vector.multi_reduction <add>, %161, %cst_86 [1] : vector<16x128xf32> to vector<16xf32>
    %163 = vector.shape_cast %162 : vector<16xf32> to vector<16x1xf32>
    %cst_87 = arith.constant 1.280000e+02 : f32
    %164 = vector.broadcast %cst_87 : f32 to vector<16x1xf32>
    %165 = arith.divf %163, %164 : vector<16x1xf32>
    %cst_88 = arith.constant 9.99999996E-13 : f32
    %166 = vector.broadcast %cst_88 : f32 to vector<16x1xf32>
    %167 = arith.addf %165, %166 : vector<16x1xf32>
    %168 = math.rsqrt %167 : vector<16x1xf32>
    %169 = vector.broadcast %168 : vector<16x1xf32> to vector<16x128xf32>
    %170 = arith.mulf %160, %169 : vector<16x128xf32>
    %171 = vector.broadcast %152 : vector<1x128xf32> to vector<16x128xf32>
    %172 = arith.mulf %170, %171 : vector<16x128xf32>
    %173 = vector.broadcast %154 : vector<1x128xf32> to vector<16x128xf32>
    %174 = arith.addf %172, %173 : vector<16x128xf32>
    %175 = arith.truncf %174 : vector<16x128xf32> to vector<16x128xbf16>
    %c0_89 = arith.constant 0 : index
    %c1 = arith.constant 1 : index
    %c0_90 = arith.constant 0 : index
    %c0_91 = arith.constant 0 : index
    %176 = vector.load %arg5[%c0_89, %c1, %c0_90, %c0_91] : memref<1x2x128x384xbf16, #tpu.memory_space<vmem>>, vector<1x1x128x384xbf16>
    %177 = vector.shape_cast %176 : vector<1x1x128x384xbf16> to vector<128x384xbf16>
    %cst_92 = arith.constant dense<0.000000e+00> : vector<16x384xf32>
    %178 = tpu.matmul %175, %177, %cst_92 {dimension_numbers = #tpu.dot_dimension_numbers<[1], [0], [0], [1], [0, 0, 1, 1], [], []>} : vector<16x128xbf16>, vector<128x384xbf16>, vector<16x384xf32> -> vector<16x384xf32>
    %c0_93 = arith.constant 0 : index
    %c1_94 = arith.constant 1 : index
    %c0_95 = arith.constant 0 : index
    %c0_96 = arith.constant 0 : index
    %179 = vector.load %arg6[%c0_93, %c1_94, %c0_95, %c0_96] : memref<1x2x1x384xf32, #tpu.memory_space<vmem>>, vector<1x1x1x384xf32>
    %180 = vector.shape_cast %179 : vector<1x1x1x384xf32> to vector<1x384xf32>
    %181 = vector.broadcast %180 : vector<1x384xf32> to vector<16x384xf32>
    %182 = arith.addf %178, %181 : vector<16x384xf32>
    %183 = vector.extract_strided_slice %182 {offsets = [0, 0], sizes = [16, 64], strides = [1, 1]} : vector<16x384xf32> to vector<16x64xf32>
    %184 = vector.shape_cast %183 : vector<16x64xf32> to vector<2x8x64xf32>
    %185 = vector.extract_strided_slice %182 {offsets = [0, 128], sizes = [16, 64], strides = [1, 1]} : vector<16x384xf32> to vector<16x64xf32>
    %186 = vector.shape_cast %185 : vector<16x64xf32> to vector<2x8x64xf32>
    %187 = vector.extract_strided_slice %182 {offsets = [0, 256], sizes = [16, 64], strides = [1, 1]} : vector<16x384xf32> to vector<16x64xf32>
    %188 = vector.shape_cast %187 : vector<16x64xf32> to vector<2x8x64xf32>
    %189 = arith.truncf %184 : vector<2x8x64xf32> to vector<2x8x64xbf16>
    %190 = arith.truncf %186 : vector<2x8x64xf32> to vector<2x8x64xbf16>
    "tpu.trace_start"() <{level = 10 : i32, message = "bqd,bkd->bqk"}> : () -> ()
    %cst_97 = arith.constant dense<0.000000e+00> : vector<2x8x8xf32>
    %191 = tpu.matmul %189, %190, %cst_97 {dimension_numbers = #tpu.dot_dimension_numbers<[2], [2], [1], [1], [0, 0, 0, 1, 1, 1], [0], [0]>} : vector<2x8x64xbf16>, vector<2x8x64xbf16>, vector<2x8x8xf32> -> vector<2x8x8xf32>
    "tpu.trace_stop"() : () -> ()
    %192 = vector.broadcast %28 : vector<2x1x8xf32> to vector<2x8x8xf32>
    %193 = arith.addf %191, %192 : vector<2x8x8xf32>
    %cst_98 = arith.constant dense<0xFF800000> : vector<2x8xf32>
    %194 = vector.multi_reduction <maximumf>, %193, %cst_98 [2] : vector<2x8x8xf32> to vector<2x8xf32>
    %195 = vector.shape_cast %194 : vector<2x8xf32> to vector<2x8x1xf32>
    %196 = vector.broadcast %195 : vector<2x8x1xf32> to vector<2x8x8xf32>
    %197 = arith.subf %193, %196 : vector<2x8x8xf32>
    %198 = math.exp %197 : vector<2x8x8xf32>
    %cst_99 = arith.constant dense<0.000000e+00> : vector<2x8xf32>
    %199 = vector.multi_reduction <add>, %198, %cst_99 [2] : vector<2x8x8xf32> to vector<2x8xf32>
    %200 = vector.shape_cast %199 : vector<2x8xf32> to vector<2x8x1xf32>
    %201 = tpu.reciprocal %200 {approx = true} : vector<2x8x1xf32> -> vector<2x8x1xf32>
    %202 = vector.broadcast %201 : vector<2x8x1xf32> to vector<2x8x8xf32>
    %203 = arith.mulf %198, %202 : vector<2x8x8xf32>
    %204 = arith.truncf %203 : vector<2x8x8xf32> to vector<2x8x8xbf16>
    %205 = arith.truncf %188 : vector<2x8x64xf32> to vector<2x8x64xbf16>
    "tpu.trace_start"() <{level = 10 : i32, message = "bqk,bkd->bqd"}> : () -> ()
    %cst_100 = arith.constant dense<0.000000e+00> : vector<2x8x64xf32>
    %206 = tpu.matmul %204, %205, %cst_100 {dimension_numbers = #tpu.dot_dimension_numbers<[2], [1], [1], [2], [0, 0, 0, 1, 1, 2], [0], [0]>} : vector<2x8x8xbf16>, vector<2x8x64xbf16>, vector<2x8x64xf32> -> vector<2x8x64xf32>
    "tpu.trace_stop"() : () -> ()
    %207 = vector.shape_cast %206 : vector<2x8x64xf32> to vector<16x64xf32>
    %208 = vector.extract_strided_slice %182 {offsets = [0, 64], sizes = [16, 64], strides = [1, 1]} : vector<16x384xf32> to vector<16x64xf32>
    %209 = vector.shape_cast %208 : vector<16x64xf32> to vector<2x8x64xf32>
    %210 = vector.extract_strided_slice %182 {offsets = [0, 192], sizes = [16, 64], strides = [1, 1]} : vector<16x384xf32> to vector<16x64xf32>
    %211 = vector.shape_cast %210 : vector<16x64xf32> to vector<2x8x64xf32>
    %212 = vector.extract_strided_slice %182 {offsets = [0, 320], sizes = [16, 64], strides = [1, 1]} : vector<16x384xf32> to vector<16x64xf32>
    %213 = vector.shape_cast %212 : vector<16x64xf32> to vector<2x8x64xf32>
    %214 = arith.truncf %209 : vector<2x8x64xf32> to vector<2x8x64xbf16>
    %215 = arith.truncf %211 : vector<2x8x64xf32> to vector<2x8x64xbf16>
    "tpu.trace_start"() <{level = 10 : i32, message = "bqd,bkd->bqk"}> : () -> ()
    %cst_101 = arith.constant dense<0.000000e+00> : vector<2x8x8xf32>
    %216 = tpu.matmul %214, %215, %cst_101 {dimension_numbers = #tpu.dot_dimension_numbers<[2], [2], [1], [1], [0, 0, 0, 1, 1, 1], [0], [0]>} : vector<2x8x64xbf16>, vector<2x8x64xbf16>, vector<2x8x8xf32> -> vector<2x8x8xf32>
    "tpu.trace_stop"() : () -> ()
    %217 = vector.broadcast %28 : vector<2x1x8xf32> to vector<2x8x8xf32>
    %218 = arith.addf %216, %217 : vector<2x8x8xf32>
    %cst_102 = arith.constant dense<0xFF800000> : vector<2x8xf32>
    %219 = vector.multi_reduction <maximumf>, %218, %cst_102 [2] : vector<2x8x8xf32> to vector<2x8xf32>
    %220 = vector.shape_cast %219 : vector<2x8xf32> to vector<2x8x1xf32>
    %221 = vector.broadcast %220 : vector<2x8x1xf32> to vector<2x8x8xf32>
    %222 = arith.subf %218, %221 : vector<2x8x8xf32>
    %223 = math.exp %222 : vector<2x8x8xf32>
    %cst_103 = arith.constant dense<0.000000e+00> : vector<2x8xf32>
    %224 = vector.multi_reduction <add>, %223, %cst_103 [2] : vector<2x8x8xf32> to vector<2x8xf32>
    %225 = vector.shape_cast %224 : vector<2x8xf32> to vector<2x8x1xf32>
    %226 = tpu.reciprocal %225 {approx = true} : vector<2x8x1xf32> -> vector<2x8x1xf32>
    %227 = vector.broadcast %226 : vector<2x8x1xf32> to vector<2x8x8xf32>
    %228 = arith.mulf %223, %227 : vector<2x8x8xf32>
    %229 = arith.truncf %228 : vector<2x8x8xf32> to vector<2x8x8xbf16>
    %230 = arith.truncf %213 : vector<2x8x64xf32> to vector<2x8x64xbf16>
    "tpu.trace_start"() <{level = 10 : i32, message = "bqk,bkd->bqd"}> : () -> ()
    %cst_104 = arith.constant dense<0.000000e+00> : vector<2x8x64xf32>
    %231 = tpu.matmul %229, %230, %cst_104 {dimension_numbers = #tpu.dot_dimension_numbers<[2], [1], [1], [2], [0, 0, 0, 1, 1, 2], [0], [0]>} : vector<2x8x8xbf16>, vector<2x8x64xbf16>, vector<2x8x64xf32> -> vector<2x8x64xf32>
    "tpu.trace_stop"() : () -> ()
    %232 = vector.shape_cast %231 : vector<2x8x64xf32> to vector<16x64xf32>
    %233 = tpu.concatenate %207, %232 in 1 : vector<16x64xf32>, vector<16x64xf32> -> vector<16x128xf32>
    %234 = arith.truncf %233 : vector<16x128xf32> to vector<16x128xbf16>
    %c0_105 = arith.constant 0 : index
    %c1_106 = arith.constant 1 : index
    %c0_107 = arith.constant 0 : index
    %c0_108 = arith.constant 0 : index
    %235 = vector.load %arg7[%c0_105, %c1_106, %c0_107, %c0_108] : memref<1x2x128x128xbf16, #tpu.memory_space<vmem>>, vector<1x1x128x128xbf16>
    %236 = vector.shape_cast %235 : vector<1x1x128x128xbf16> to vector<128x128xbf16>
    %cst_109 = arith.constant dense<0.000000e+00> : vector<16x128xf32>
    %237 = tpu.matmul %234, %236, %cst_109 {dimension_numbers = #tpu.dot_dimension_numbers<[1], [0], [0], [1], [0, 0, 1, 1], [], []>} : vector<16x128xbf16>, vector<128x128xbf16>, vector<16x128xf32> -> vector<16x128xf32>
    %c0_110 = arith.constant 0 : index
    %c1_111 = arith.constant 1 : index
    %c0_112 = arith.constant 0 : index
    %c0_113 = arith.constant 0 : index
    %238 = vector.load %arg8[%c0_110, %c1_111, %c0_112, %c0_113] : memref<1x2x1x128xf32, #tpu.memory_space<vmem>>, vector<1x1x1x128xf32>
    %239 = vector.shape_cast %238 : vector<1x1x1x128xf32> to vector<1x128xf32>
    %240 = vector.broadcast %239 : vector<1x128xf32> to vector<16x128xf32>
    %241 = arith.addf %237, %240 : vector<16x128xf32>
    %242 = arith.addf %241, %174 : vector<16x128xf32>
    %c0_114 = arith.constant 0 : index
    %c1_115 = arith.constant 1 : index
    %c0_116 = arith.constant 0 : index
    %c0_117 = arith.constant 0 : index
    %243 = vector.load %arg9[%c0_114, %c1_115, %c0_116, %c0_117] : memref<1x2x1x128xf32, #tpu.memory_space<vmem>>, vector<1x1x1x128xf32>
    %244 = vector.shape_cast %243 : vector<1x1x1x128xf32> to vector<1x128xf32>
    %c0_118 = arith.constant 0 : index
    %c1_119 = arith.constant 1 : index
    %c0_120 = arith.constant 0 : index
    %c0_121 = arith.constant 0 : index
    %245 = vector.load %arg10[%c0_118, %c1_119, %c0_120, %c0_121] : memref<1x2x1x128xf32, #tpu.memory_space<vmem>>, vector<1x1x1x128xf32>
    %246 = vector.shape_cast %245 : vector<1x1x1x128xf32> to vector<1x128xf32>
    %cst_122 = arith.constant dense<0.000000e+00> : vector<16xf32>
    %247 = vector.multi_reduction <add>, %242, %cst_122 [1] : vector<16x128xf32> to vector<16xf32>
    %248 = vector.shape_cast %247 : vector<16xf32> to vector<16x1xf32>
    %cst_123 = arith.constant 1.280000e+02 : f32
    %249 = vector.broadcast %cst_123 : f32 to vector<16x1xf32>
    %250 = arith.divf %248, %249 : vector<16x1xf32>
    %251 = vector.broadcast %250 : vector<16x1xf32> to vector<16x128xf32>
    %252 = arith.subf %242, %251 : vector<16x128xf32>
    %253 = arith.mulf %252, %252 : vector<16x128xf32>
    %cst_124 = arith.constant dense<0.000000e+00> : vector<16xf32>
    %254 = vector.multi_reduction <add>, %253, %cst_124 [1] : vector<16x128xf32> to vector<16xf32>
    %255 = vector.shape_cast %254 : vector<16xf32> to vector<16x1xf32>
    %cst_125 = arith.constant 1.280000e+02 : f32
    %256 = vector.broadcast %cst_125 : f32 to vector<16x1xf32>
    %257 = arith.divf %255, %256 : vector<16x1xf32>
    %cst_126 = arith.constant 9.99999996E-13 : f32
    %258 = vector.broadcast %cst_126 : f32 to vector<16x1xf32>
    %259 = arith.addf %257, %258 : vector<16x1xf32>
    %260 = math.rsqrt %259 : vector<16x1xf32>
    %261 = vector.broadcast %260 : vector<16x1xf32> to vector<16x128xf32>
    %262 = arith.mulf %252, %261 : vector<16x128xf32>
    %263 = vector.broadcast %244 : vector<1x128xf32> to vector<16x128xf32>
    %264 = arith.mulf %262, %263 : vector<16x128xf32>
    %265 = vector.broadcast %246 : vector<1x128xf32> to vector<16x128xf32>
    %266 = arith.addf %264, %265 : vector<16x128xf32>
    %267 = arith.truncf %266 : vector<16x128xf32> to vector<16x128xbf16>
    %c0_127 = arith.constant 0 : index
    %c1_128 = arith.constant 1 : index
    %c0_129 = arith.constant 0 : index
    %c0_130 = arith.constant 0 : index
    %268 = vector.load %arg11[%c0_127, %c1_128, %c0_129, %c0_130] : memref<1x2x128x256xbf16, #tpu.memory_space<vmem>>, vector<1x1x128x256xbf16>
    %269 = vector.shape_cast %268 : vector<1x1x128x256xbf16> to vector<128x256xbf16>
    %cst_131 = arith.constant dense<0.000000e+00> : vector<16x256xf32>
    %270 = tpu.matmul %267, %269, %cst_131 {dimension_numbers = #tpu.dot_dimension_numbers<[1], [0], [0], [1], [0, 0, 1, 1], [], []>} : vector<16x128xbf16>, vector<128x256xbf16>, vector<16x256xf32> -> vector<16x256xf32>
    %c0_132 = arith.constant 0 : index
    %c1_133 = arith.constant 1 : index
    %c0_134 = arith.constant 0 : index
    %c0_135 = arith.constant 0 : index
    %271 = vector.load %arg12[%c0_132, %c1_133, %c0_134, %c0_135] : memref<1x2x1x256xf32, #tpu.memory_space<vmem>>, vector<1x1x1x256xf32>
    %272 = vector.shape_cast %271 : vector<1x1x1x256xf32> to vector<1x256xf32>
    %273 = vector.broadcast %272 : vector<1x256xf32> to vector<16x256xf32>
    %274 = arith.addf %270, %273 : vector<16x256xf32>
    %cst_136 = arith.constant 5.000000e-01 : f32
    %275 = vector.broadcast %cst_136 : f32 to vector<16x256xf32>
    %276 = arith.mulf %275, %274 : vector<16x256xf32>
    %cst_137 = arith.constant 4.471500e-02 : f32
    %277 = vector.broadcast %cst_137 : f32 to vector<16x256xf32>
    %278 = arith.mulf %277, %274 : vector<16x256xf32>
    %279 = arith.mulf %278, %274 : vector<16x256xf32>
    %280 = arith.mulf %279, %274 : vector<16x256xf32>
    %281 = arith.addf %274, %280 : vector<16x256xf32>
    %cst_138 = arith.constant 0.797884583 : f32
    %282 = vector.broadcast %cst_138 : f32 to vector<16x256xf32>
    %283 = arith.mulf %282, %281 : vector<16x256xf32>
    %284 = math.tanh %283 : vector<16x256xf32>
    %cst_139 = arith.constant 1.000000e+00 : f32
    %285 = vector.broadcast %cst_139 : f32 to vector<16x256xf32>
    %286 = arith.addf %285, %284 : vector<16x256xf32>
    %287 = arith.mulf %276, %286 : vector<16x256xf32>
    %288 = arith.truncf %287 : vector<16x256xf32> to vector<16x256xbf16>
    %c0_140 = arith.constant 0 : index
    %c1_141 = arith.constant 1 : index
    %c0_142 = arith.constant 0 : index
    %c0_143 = arith.constant 0 : index
    %289 = vector.load %arg13[%c0_140, %c1_141, %c0_142, %c0_143] : memref<1x2x256x128xbf16, #tpu.memory_space<vmem>>, vector<1x1x256x128xbf16>
    %290 = vector.shape_cast %289 : vector<1x1x256x128xbf16> to vector<256x128xbf16>
    %cst_144 = arith.constant dense<0.000000e+00> : vector<16x128xf32>
    %291 = tpu.matmul %288, %290, %cst_144 {dimension_numbers = #tpu.dot_dimension_numbers<[1], [0], [0], [1], [0, 0, 1, 1], [], []>} : vector<16x256xbf16>, vector<256x128xbf16>, vector<16x128xf32> -> vector<16x128xf32>
    %c0_145 = arith.constant 0 : index
    %c1_146 = arith.constant 1 : index
    %c0_147 = arith.constant 0 : index
    %c0_148 = arith.constant 0 : index
    %292 = vector.load %arg14[%c0_145, %c1_146, %c0_147, %c0_148] : memref<1x2x1x128xf32, #tpu.memory_space<vmem>>, vector<1x1x1x128xf32>
    %293 = vector.shape_cast %292 : vector<1x1x1x128xf32> to vector<1x128xf32>
    %294 = vector.broadcast %293 : vector<1x128xf32> to vector<16x128xf32>
    %295 = arith.addf %291, %294 : vector<16x128xf32>
    %296 = arith.addf %295, %266 : vector<16x128xf32>
    %c0_149 = arith.constant 0 : index
    %c1_150 = arith.constant 1 : index
    %c0_151 = arith.constant 0 : index
    %c0_152 = arith.constant 0 : index
    %297 = vector.load %arg15[%c0_149, %c1_150, %c0_151, %c0_152] : memref<1x2x1x128xf32, #tpu.memory_space<vmem>>, vector<1x1x1x128xf32>
    %298 = vector.shape_cast %297 : vector<1x1x1x128xf32> to vector<1x128xf32>
    %c0_153 = arith.constant 0 : index
    %c1_154 = arith.constant 1 : index
    %c0_155 = arith.constant 0 : index
    %c0_156 = arith.constant 0 : index
    %299 = vector.load %arg16[%c0_153, %c1_154, %c0_155, %c0_156] : memref<1x2x1x128xf32, #tpu.memory_space<vmem>>, vector<1x1x1x128xf32>
    %300 = vector.shape_cast %299 : vector<1x1x1x128xf32> to vector<1x128xf32>
    %cst_157 = arith.constant dense<0.000000e+00> : vector<16xf32>
    %301 = vector.multi_reduction <add>, %296, %cst_157 [1] : vector<16x128xf32> to vector<16xf32>
    %302 = vector.shape_cast %301 : vector<16xf32> to vector<16x1xf32>
    %cst_158 = arith.constant 1.280000e+02 : f32
    %303 = vector.broadcast %cst_158 : f32 to vector<16x1xf32>
    %304 = arith.divf %302, %303 : vector<16x1xf32>
    %305 = vector.broadcast %304 : vector<16x1xf32> to vector<16x128xf32>
    %306 = arith.subf %296, %305 : vector<16x128xf32>
    %307 = arith.mulf %306, %306 : vector<16x128xf32>
    %cst_159 = arith.constant dense<0.000000e+00> : vector<16xf32>
    %308 = vector.multi_reduction <add>, %307, %cst_159 [1] : vector<16x128xf32> to vector<16xf32>
    %309 = vector.shape_cast %308 : vector<16xf32> to vector<16x1xf32>
    %cst_160 = arith.constant 1.280000e+02 : f32
    %310 = vector.broadcast %cst_160 : f32 to vector<16x1xf32>
    %311 = arith.divf %309, %310 : vector<16x1xf32>
    %cst_161 = arith.constant 9.99999996E-13 : f32
    %312 = vector.broadcast %cst_161 : f32 to vector<16x1xf32>
    %313 = arith.addf %311, %312 : vector<16x1xf32>
    %314 = math.rsqrt %313 : vector<16x1xf32>
    %315 = vector.broadcast %314 : vector<16x1xf32> to vector<16x128xf32>
    %316 = arith.mulf %306, %315 : vector<16x128xf32>
    %317 = vector.broadcast %298 : vector<1x128xf32> to vector<16x128xf32>
    %318 = arith.mulf %316, %317 : vector<16x128xf32>
    %319 = vector.broadcast %300 : vector<1x128xf32> to vector<16x128xf32>
    %320 = arith.addf %318, %319 : vector<16x128xf32>
    %321 = vector.shape_cast %320 : vector<16x128xf32> to vector<2x8x128xf32>
    %322 = vector.extract_strided_slice %321 {offsets = [0, 0, 0], sizes = [2, 1, 128], strides = [1, 1, 1]} : vector<2x8x128xf32> to vector<2x1x128xf32>
    %323 = vector.shape_cast %322 : vector<2x1x128xf32> to vector<2x128xf32>
    %324 = arith.truncf %323 : vector<2x128xf32> to vector<2x128xbf16>
    %c0_162 = arith.constant 0 : index
    %c0_163 = arith.constant 0 : index
    %c0_164 = arith.constant 0 : index
    %325 = vector.load %arg17[%c0_162, %c0_163, %c0_164] : memref<1x128x128xbf16, #tpu.memory_space<vmem>>, vector<1x128x128xbf16>
    %326 = vector.shape_cast %325 : vector<1x128x128xbf16> to vector<128x128xbf16>
    %cst_165 = arith.constant dense<0.000000e+00> : vector<2x128xf32>
    %327 = tpu.matmul %324, %326, %cst_165 {dimension_numbers = #tpu.dot_dimension_numbers<[1], [0], [0], [1], [0, 0, 1, 1], [], []>} : vector<2x128xbf16>, vector<128x128xbf16>, vector<2x128xf32> -> vector<2x128xf32>
    %c0_166 = arith.constant 0 : index
    %c0_167 = arith.constant 0 : index
    %c0_168 = arith.constant 0 : index
    %328 = vector.load %arg18[%c0_166, %c0_167, %c0_168] : memref<1x1x128xf32, #tpu.memory_space<vmem>>, vector<1x1x128xf32>
    %329 = vector.shape_cast %328 : vector<1x1x128xf32> to vector<1x128xf32>
    %330 = vector.broadcast %329 : vector<1x128xf32> to vector<2x128xf32>
    %331 = arith.addf %327, %330 : vector<2x128xf32>
    %332 = math.tanh %331 : vector<2x128xf32>
    %c0_169 = arith.constant 0 : index
    %c0_170 = arith.constant 0 : index
    %c0_171 = arith.constant 0 : index
    %333 = vector.load %arg19[%c0_169, %c0_170, %c0_171] : memref<1x2x128xf32, #tpu.memory_space<vmem>>, vector<1x2x128xf32>
    %334 = vector.shape_cast %333 : vector<1x2x128xf32> to vector<2x128xf32>
    %335 = vector.shape_cast %332 : vector<2x128xf32> to vector<1x2x128xf32>
    tpu.vector_store %arg19[%c0_169, %c0_170, %c0_171], %335 {strides = array<i32>} : memref<1x2x128xf32, #tpu.memory_space<vmem>>, vector<1x2x128xf32>,
    return
  }
  func.func @transform_0(%arg0: i32) -> (i32, i32, i32) {
    %c0_i32 = arith.constant 0 : i32
    %c0_i32_0 = arith.constant 0 : i32
    %c0_i32_1 = arith.constant 0 : i32
    return %arg0, %c0_i32, %c0_i32_0 : i32, i32, i32
  }
  func.func @transform_1(%arg0: i32) -> (i32, i32, i32) {
    %c0_i32 = arith.constant 0 : i32
    %c0_i32_0 = arith.constant 0 : i32
    %c0_i32_1 = arith.constant 0 : i32
    return %arg0, %c0_i32, %c0_i32_0 : i32, i32, i32
  }
  func.func @transform_2(%arg0: i32) -> (i32, i32, i32) {
    %c0_i32 = arith.constant 0 : i32
    %c0_i32_0 = arith.constant 0 : i32
    %c0_i32_1 = arith.constant 0 : i32
    return %arg0, %c0_i32, %c0_i32_0 : i32, i32, i32
  }
  func.func @transform_3(%arg0: i32) -> (i32, i32, i32) {
    %c0_i32 = arith.constant 0 : i32
    %c0_i32_0 = arith.constant 0 : i32
    %c0_i32_1 = arith.constant 0 : i32
    return %arg0, %c0_i32, %c0_i32_0 : i32, i32, i32
  }
  func.func @transform_4(%arg0: i32) -> (i32, i32, i32, i32) {
    %c0_i32 = arith.constant 0 : i32
    %c0_i32_0 = arith.constant 0 : i32
    %c0_i32_1 = arith.constant 0 : i32
    %c0_i32_2 = arith.constant 0 : i32
    return %arg0, %c0_i32, %c0_i32_0, %c0_i32_1 : i32, i32, i32, i32
  }
  func.func @transform_5(%arg0: i32) -> (i32, i32, i32, i32) {
    %c0_i32 = arith.constant 0 : i32
    %c0_i32_0 = arith.constant 0 : i32
    %c0_i32_1 = arith.constant 0 : i32
    %c0_i32_2 = arith.constant 0 : i32
    return %arg0, %c0_i32, %c0_i32_0, %c0_i32_1 : i32, i32, i32, i32
  }
  func.func @transform_6(%arg0: i32) -> (i32, i32, i32, i32) {
    %c0_i32 = arith.constant 0 : i32
    %c0_i32_0 = arith.constant 0 : i32
    %c0_i32_1 = arith.constant 0 : i32
    %c0_i32_2 = arith.constant 0 : i32
    return %arg0, %c0_i32, %c0_i32_0, %c0_i32_1 : i32, i32, i32, i32
  }
  func.func @transform_7(%arg0: i32) -> (i32, i32, i32, i32) {
    %c0_i32 = arith.constant 0 : i32
    %c0_i32_0 = arith.constant 0 : i32
    %c0_i32_1 = arith.constant 0 : i32
    %c0_i32_2 = arith.constant 0 : i32
    return %arg0, %c0_i32, %c0_i32_0, %c0_i32_1 : i32, i32, i32, i32
  }
  func.func @transform_8(%arg0: i32) -> (i32, i32, i32, i32) {
    %c0_i32 = arith.constant 0 : i32
    %c0_i32_0 = arith.constant 0 : i32
    %c0_i32_1 = arith.constant 0 : i32
    %c0_i32_2 = arith.constant 0 : i32
    return %arg0, %c0_i32, %c0_i32_0, %c0_i32_1 : i32, i32, i32, i32
  }
  func.func @transform_9(%arg0: i32) -> (i32, i32, i32, i32) {
    %c0_i32 = arith.constant 0 : i32
    %c0_i32_0 = arith.constant 0 : i32
    %c0_i32_1 = arith.constant 0 : i32
    %c0_i32_2 = arith.constant 0 : i32
    return %arg0, %c0_i32, %c0_i32_0, %c0_i32_1 : i32, i32, i32, i32
  }
  func.func @transform_10(%arg0: i32) -> (i32, i32, i32, i32) {
    %c0_i32 = arith.constant 0 : i32
    %c0_i32_0 = arith.constant 0 : i32
    %c0_i32_1 = arith.constant 0 : i32
    %c0_i32_2 = arith.constant 0 : i32
    return %arg0, %c0_i32, %c0_i32_0, %c0_i32_1 : i32, i32, i32, i32
  }
  func.func @transform_11(%arg0: i32) -> (i32, i32, i32, i32) {
    %c0_i32 = arith.constant 0 : i32
    %c0_i32_0 = arith.constant 0 : i32
    %c0_i32_1 = arith.constant 0 : i32
    %c0_i32_2 = arith.constant 0 : i32
    return %arg0, %c0_i32, %c0_i32_0, %c0_i32_1 : i32, i32, i32, i32
  }
  func.func @transform_12(%arg0: i32) -> (i32, i32, i32, i32) {
    %c0_i32 = arith.constant 0 : i32
    %c0_i32_0 = arith.constant 0 : i32
    %c0_i32_1 = arith.constant 0 : i32
    %c0_i32_2 = arith.constant 0 : i32
    return %arg0, %c0_i32, %c0_i32_0, %c0_i32_1 : i32, i32, i32, i32
  }
  func.func @transform_13(%arg0: i32) -> (i32, i32, i32, i32) {
    %c0_i32 = arith.constant 0 : i32
    %c0_i32_0 = arith.constant 0 : i32
    %c0_i32_1 = arith.constant 0 : i32
    %c0_i32_2 = arith.constant 0 : i32
    return %arg0, %c0_i32, %c0_i32_0, %c0_i32_1 : i32, i32, i32, i32
  }
  func.func @transform_14(%arg0: i32) -> (i32, i32, i32, i32) {
    %c0_i32 = arith.constant 0 : i32
    %c0_i32_0 = arith.constant 0 : i32
    %c0_i32_1 = arith.constant 0 : i32
    %c0_i32_2 = arith.constant 0 : i32
    return %arg0, %c0_i32, %c0_i32_0, %c0_i32_1 : i32, i32, i32, i32
  }
  func.func @transform_15(%arg0: i32) -> (i32, i32, i32, i32) {
    %c0_i32 = arith.constant 0 : i32
    %c0_i32_0 = arith.constant 0 : i32
    %c0_i32_1 = arith.constant 0 : i32
    %c0_i32_2 = arith.constant 0 : i32
    return %arg0, %c0_i32, %c0_i32_0, %c0_i32_1 : i32, i32, i32, i32
  }
  func.func @transform_16(%arg0: i32) -> (i32, i32, i32) {
    %c0_i32 = arith.constant 0 : i32
    %c0_i32_0 = arith.constant 0 : i32
    %c0_i32_1 = arith.constant 0 : i32
    return %arg0, %c0_i32, %c0_i32_0 : i32, i32, i32
  }
  func.func @transform_17(%arg0: i32) -> (i32, i32, i32) {
    %c0_i32 = arith.constant 0 : i32
    %c0_i32_0 = arith.constant 0 : i32
    %c0_i32_1 = arith.constant 0 : i32
    return %arg0, %c0_i32, %c0_i32_0 : i32, i32, i32
  }
  func.func @transform_18(%arg0: i32) -> (i32, i32, i32) {
    %c0_i32 = arith.constant 0 : i32
    %c0_i32_0 = arith.constant 0 : i32
    %c0_i32_1 = arith.constant 0 : i32
    return %arg0, %c0_i32, %c0_i32_0 : i32, i32, i32
  }
}

</mosaic_0001>

<bundles_post_ra>
// kernel: bert_2heads_forward.1
= control target key start
LH: loop header
LB: loop body
LE: loop exit
PB: predicated region body
PF: predicated region fallthrough
CT: control target
= control target key end

     0   :  { %s5246_s0 = inlined_call_operand.vmem [shape: f32[2,16,128], index: 0, kind: input, shape index: {}]   ;;  %s5247_s1 = inlined_call_operand.vmem [shape: f32[2,2,8], index: 1, kind: input, shape index: {}]   ;;  %s5248_s2 = inlined_call_operand.vmem [shape: f32[2,1,128], index: 2, kind: input, shape index: {}]   ;;  %s5249_s3 = inlined_call_operand.vmem [shape: f32[2,1,128], index: 3, kind: input, shape index: {}]   ;;  %s5250_s4 = inlined_call_operand.hbm [shape: bf16[2,2,128,384], index: 4, kind: input, shape index: {}]   ;;  %s5251_s5 = inlined_call_operand.vmem [shape: f32[2,2,1,384], index: 5, kind: input, shape index: {}]   ;;  %s5252_s6 = inlined_call_operand.vmem [shape: bf16[2,2,128,128], index: 6, kind: input, shape index: {}]   ;;  %s5253_s7 = inlined_call_operand.vmem [shape: f32[2,2,1,128], index: 7, kind: input, shape index: {}]   ;;  %s5254_s8 = inlined_call_operand.vmem [shape: f32[2,2,1,128], index: 8, kind: input, shape index: {}]   ;;  %s5255_s9 = inlined_call_operand.vmem [shape: f32[2,2,1,128], index: 9, kind: input, shape index: {}]   ;;  %s5256_s10 = inlined_call_operand.hbm [shape: bf16[2,2,128,256], index: 10, kind: input, shape index: {}]   ;;  %s5257_s11 = inlined_call_operand.vmem [shape: f32[2,2,1,256], index: 11, kind: input, shape index: {}]   ;;  %s5258_s12 = inlined_call_operand.hbm [shape: bf16[2,2,256,128], index: 12, kind: input, shape index: {}]   ;;  %s5259_s13 = inlined_call_operand.vmem [shape: f32[2,2,1,128], index: 13, kind: input, shape index: {}]   ;;  %s5260_s14 = inlined_call_operand.vmem [shape: f32[2,2,1,128], index: 14, kind: input, shape index: {}]   ;;  %s5261_s15 = inlined_call_operand.vmem [shape: f32[2,2,1,128], index: 15, kind: input, shape index: {}]   ;;  %s5262_s16 = inlined_call_operand.vmem [shape: bf16[2,128,128], index: 16, kind: input, shape index: {}]   ;;  %s5263_s17 = inlined_call_operand.vmem [shape: f32[2,1,128], index: 17, kind: input, shape index: {}]   ;;  %s5264_s18 = inlined_call_operand.vmem [shape: f32[2,2,128], index: 18, kind: output, shape index: {}]  }
   0x1   :  { %5271 = sst [smem:[#allocation12_spill]] %s5246_s0 }
   0x2   :  { %5272 = sst [smem:[#allocation13_spill]] %s5247_s1 }
   0x3   :  { %5273 = sst [smem:[#allocation14_spill]] %s5248_s2 }
   0x4   :  { %5274 = sst [smem:[#allocation15_spill]] %s5256_s10 }
   0x5   :  { %5275 = sst [smem:[#allocation16_spill]] %s5257_s11 }
   0x6   :  { %5276 = sst [smem:[#allocation17_spill]] %s5259_s13 }
   0x7   :  { %5277 = sst [smem:[#allocation18_spill]] %s5260_s14 }
   0x8   :  { %5278 = sst [smem:[#allocation19_spill]] %s5261_s15 }
   0x9   :  { %5279 = sst [smem:[#allocation20_spill]] %s5262_s16 }
   0xa   :  { %5280 = sst [smem:[#allocation21_spill]] %s5263_s17 }
   0xb   :  { %5281 = sst [smem:[#allocation22_spill]] %s5264_s18 }
   0xc   :  { %23 = vsyncpa [#allocation3], 0 }
   0xd   :  { %25 = vsyncpa [#allocation3 + $0x1], 0 }
   0xe   :  { %26 = vsyncpa [#allocation5], 0 }
   0xf   :  { %28 = vsyncpa [#allocation5 + $0x1], 0  ;;  %s4569_s27 = smov 0   ;;  %s4571_s28 = smov 0  }
  0x10   :  { %s4573_s29 = smov 0   ;;  %s4575_s30 = smov 0  }
  0x11 LB: > { %5282 = sst [smem:[#allocation9_spill]] %s4460_s29  ;;  %s4588_s0 = sadd.s32 4294967295, %s4464_s30   ;;  %s4464_s30 = sphi %s4575_s30, %s5300_s30   ;;  %s4460_s29 = sphi %s4573_s29, %s5302_s29   ;;  %s4456_s28 = sphi %s4571_s28, %s5304_s28   ;;  %s4452_s27 = sphi %s4569_s27, %s5303_s27  }
  0x12   : > { %s4591_s19 = sadd.s32 1, %s4464_s30   ;;  %s145_s20 = sadd.s32 1, %s4460_s29 }
  0x13   : > { %5283 = sst [smem:[#allocation10_spill]] %s4591_s19  ;;  %s142_s1 = ssub.s32 %s4464_s30, %s4591_s19 }
  0x14   : > { %p143_p0 = scmp.eq.s32.totalorder %s142_s1, 0  ;;  %p152_p1 = scmp.ne.s32.totalorder %s4460_s29, %s4456_s28 }
  0x15   : > { %p153_p2 = scmp.eq.s32.totalorder %s4464_s30, 0  ;;  %p158_p3 = scmp.ne.s32.totalorder %s4456_s28, %s4452_s27 }
  0x16   : > { %s4601_s21 = scalar_select %p143_p0, %s4460_s29, %s145_s20  }
  0x17   : > { %p154_p4 = por %p153_p2, %p152_p1  ;;  %p159_p5 = scmp.eq.s32.totalorder %s4588_s0, 0 }
  0x18   : > { %5284 = sst [smem:[#allocation11_spill]] %s4601_s21  ;;  %p4198_p6 = scmp.lt.s32.totalorder %s4464_s30, 2 }
  0x19   : > { %p4605_p7 = por %p159_p5, %p158_p3  ;;  %s4610_s2 = sand.u32 1, %s4460_s29  }
  0x1a   : > { %p4612_p8 = pnand %p4198_p6, %p154_p4  ;;  %s631_s24 = sand.u32 1, %s4464_s30  }
  0x1b   : > { %s5270_s25 = sshll.u32 %s4610_s2, 8  ;;  %s4037_s26 = sshll.u32 %s4464_s30, 8 }
  0x1c   : > { %s635_s27 = scalar_lea.vmem [#allocation4], %s5270_s25  ;;  %s5287_s10 = sld [smem:[#allocation15_spill]] }
  0x1d   : > { %s643_s1 = sshll.u32 %s635_s27, 4  ;;  %s4624_s18 = scalar_lea.sflag [#allocation5], %s631_s24  ;;  %s644_s1 = int_to_ptr.vmem [resolvable:$true] %s643_s1 }
  0x1e   : > { %p4340_p10 = pneg %p4612_p8 }
  0x22   : > { %s640_s19 = scalar_lea.hbm %s5287_s10, %s4037_s26  ;;  %s4343_s21 = scalar_lea.hbm %s5287_s10, 512 }
  0x23   : > { %s641_s29 = sshll.u32 %s640_s19, 4  ;;  %s642_s29 = int_to_ptr.hbm [resolvable:$true] %s641_s29 }
  0x24   : > { %s4336_s16 = sshra.s32 %s642_s29, 4  ;;  %s4337_s16 = int_to_ptr.hbm [resolvable:$true] %s4336_s16 }
  0x25   : > { %s4338_s17 = scalar_lea.hbm %s4337_s16, 256  ;;  %p4344_p13 = scmp.lt.s32.totalorder %s4337_s16, %s5287_s10 }
  0x26   : > { %p4339_p9 = scmp.ne.s32.totalorder %s4337_s16, %s4338_s17  ;;  %p4345_p0 = scmp.lt.s32.totalorder %s4343_s21, %s4338_s17 }
  0x28   : > { %p4341_p11 = pnand %p4340_p10, %p4339_p9  ;;  %p4346_p1 = por %p4345_p0, %p4344_p13 }
  0x2a   : > { %p4342_p12 = pneg %p4341_p11 }
  0x2c   : > { %p4347_p2 = pnand %p4346_p1, %p4342_p12 }
  0x2e   : > { %4350 = shalt.err (!%p4347_p2)
}
  0x2f   : > { %s4466_s19 = smov 128   ;;  %s4467_s24 = smov 8  }
  0x30   : > { %4194 = dma.hbm_to_vmem [thread:$0]  (!%p4612_p8), %s642_s29, 4096, %s644_s1, %s4624_s18, %s4466_s19, %s4466_s19, %s4467_s24  }
  0x31   : > { %s669_s15 = scalar_lea.hbm %s5258_s12, %s4037_s26  ;;  %s5288_s17 = sshll.u32 %s4610_s2, 8 }
  0x32   : > { %s670_s16 = sshll.u32 %s669_s15, 4  ;;  %s664_s21 = scalar_lea.vmem [#allocation6], %s5288_s17  ;;  %s4645_s16 = int_to_ptr.hbm [resolvable:$true] %s670_s16 }
  0x33   : > { %s672_s20 = sshll.u32 %s664_s21, 4  ;;  %p3353_p3 = scmp.ge.s32.totalorder %s4464_s30, 1  ;;  %s4647_s20 = int_to_ptr.vmem [resolvable:$true] %s672_s20 }
  0x34   : > { %p715_p4 = scmp.lt.s32.totalorder %s4464_s30, 3  ;;  %s4178_s10 = smul.u32 384, %s4610_s2 }
  0x35   : > { %s4179_s29 = smul.u32 384, %s4464_s30  ;;  %s574_s15 = scalar_lea.sflag [#allocation3], %s4610_s2 }
  0x36   : > { %p4652_p5 = pnand %p3353_p3, %p715_p4  ;;  %s577_s24 = scalar_lea.vmem [#allocation2], %s4178_s10 }
  0x37   : > { %s582_s19 = scalar_lea.hbm %s5250_s4, %s4179_s29  ;;  %s585_s25 = sshll.u32 %s577_s24, 4  ;;  %s586_s25 = int_to_ptr.vmem [resolvable:$true] %s585_s25 }
  0x38   : > { %s583_s27 = sshll.u32 %s582_s19, 4  ;;  %s4373_s13 = scalar_lea.hbm %s5250_s4, 768  ;;  %s584_s27 = int_to_ptr.hbm [resolvable:$true] %s583_s27 }
  0x39   : > { %s4366_s17 = sshra.s32 %s584_s27, 4  ;;  %s4367_s17 = int_to_ptr.hbm [resolvable:$true] %s4366_s17 }
  0x3a   : > { %s4368_s21 = scalar_lea.hbm %s4367_s17, 384  ;;  %p4374_p12 = scmp.lt.s32.totalorder %s4367_s17, %s5250_s4 }
  0x3b   : > { %p4369_p6 = scmp.ne.s32.totalorder %s4367_s17, %s4368_s21  ;;  %p4375_p13 = scmp.lt.s32.totalorder %s4373_s13, %s4368_s21 }
  0x3d   : > { %p4371_p9 = pnand %p4369_p6, %p4340_p10  ;;  %p4376_p0 = por %p4375_p13, %p4374_p12 }
  0x3f   : > { %p4372_p11 = pneg %p4371_p9 }
  0x41   : > { %p4377_p1 = pnand %p4376_p0, %p4372_p11 }
  0x43   : > { %4380 = shalt.err (!%p4377_p1)
}
  0x44   : > { %s4468_s10 = smov 192   ;;  %s4469_s2 = smov 12  }
  0x45   : > { %4191 = dma.hbm_to_vmem [thread:$0]  (!%p4612_p8), %s584_s27, 6144, %s586_s25, %s574_s15, %s4468_s10, %s4468_s10, %s4469_s2  }
  0x46   : > { %s4396_s26 = sshra.s32 %s4645_s16, 4  ;;  %s4403_s24 = scalar_lea.hbm %s5258_s12, 512  ;;  %s4397_s26 = int_to_ptr.hbm [resolvable:$true] %s4396_s26 }
  0x47   : > { %s4398_s19 = scalar_lea.hbm %s4397_s26, 256  ;;  %p4404_p6 = scmp.lt.s32.totalorder %s4397_s26, %s5258_s12 }
  0x48   : > { %p4399_p2 = scmp.ne.s32.totalorder %s4397_s26, %s4398_s19  ;;  %p4405_p9 = scmp.lt.s32.totalorder %s4403_s24, %s4398_s19 }
  0x4a   : > { %p4401_p3 = pnand %p4399_p2, %p4340_p10  ;;  %p4406_p11 = por %p4405_p9, %p4404_p6 }
  0x4c   : > { %p4402_p4 = pneg %p4401_p3 }
  0x4e   : > { %p4407_p12 = pnand %p4406_p11, %p4402_p4 }
  0x50   : > { %4410 = shalt.err (!%p4407_p12)
}
  0x51   : > { %s4470_s25 = smov 64   ;;  %s4471_s27 = smov 4  }
  0x52   : > { %4197 = dma.hbm_to_vmem [thread:$0]  (!%p4612_p8), %s4645_s16, 4096, %s4647_s20, %s4624_s18, %s4470_s25, %s4470_s25, %s4471_s27  }
  0x53   : > { %719 = sbr.rel (%p4652_p5) target bundleno = 4565 (0x11d5), region = 92  ;;  %s4690_s15 = sand.u32 (!%p4652_p5), 1, %s4456_s28  }
  0x54   : > { %s4180_s30 = smul.u32 (!%p4652_p5), 384, %s4690_s15  ;;  %s722_s1 = scalar_lea.sflag (!%p4652_p5), [#allocation3], %s4690_s15 }
  0x56   : > { %s4694_s29 = scalar_lea.vmem (!%p4652_p5), [#allocation2], %s4180_s30 }
  0x58   : > { %4443 = dma.done.wait (%p4605_p7), %s722_s1, 6144  }
  0x59   : > { %4445 = vsyncadd (%p4605_p7), %s722_s1, 4294961152  ;;  %s731_s14 = sand.u32 1, %s4588_s0   ;;  %s3354_s18 = sshll.u32 %s4690_s15, 8 }
  0x5a   : > { %s732_s23 = scalar_lea.sflag [#allocation5], %s731_s14  ;;  %s4704_s16 = scalar_lea.vmem [#allocation4], %s3354_s18 }
  0x5b   : > { %4447 = dma.done.wait (%p4605_p7), %s732_s23, 8192  }
  0x5c   : > { %4449 = vsyncadd (%p4605_p7), %s732_s23, 4294959104  ;;  %p868_p8 = scmp.lt.s32.totalorder %s4588_s0, 1  ;;  %s5290_s26 = sld [smem:[#allocation12_spill]]  ;;  %v4472_v2 = vmov 128.0   ;;  %v3457_v17 = vld [vmem:[%s4694_s29 + $0xa8] sm:$0xf] }
  0x5d   : > { %4264 = vrcp.f32 %v4472_v2  ;;  %s5291_s13 = sld [smem:[#allocation14_spill]]  ;;  %v4064_v18 = vld [vmem:[%s4694_s29 + $0xb0] sm:$0xf0]  ;;  %v4063_v19 = vld [vmem:[%s4694_s29 + $0xac] sm:$0xf]  ;;  %vm1216_vm7 = vcmask 523264  }
  0x5e   : > { %s5306_s0 = smov (!%p868_p8, %s4588_s0), 1  ;;  %v3458_v20 = vor.u32 %v4064_v18, %v3457_v17  ;;  %v3459_v21 = vld [vmem:[%s4694_s29 + $0xb4] sm:$0xf0]  ;;  %v3465_v22 = vld [vmem:[%s4694_s29 + $0xb0] sm:$0xf]  ;;  %vm1285_vm8 = vcmask 1043456  }
  0x5f   : > { %s4039_s20 = sshll.u32 %s5306_s0, 4  ;;  %s882_s25 = scalar_lea.vmem %s5249_s3, %s5306_s0  ;;  %v4065_v23 = vld [vmem:[%s4694_s29 + $0xb8] sm:$0xf0]  ;;  %v3462_v24 = vor.u32 %v4063_v19, %v3459_v21  ;;  %v3445_v26 = vld [vmem:[%s4694_s29 + $0x90] sm:$0xf]  ;;  %vm1255_vm9 = vcmask 64512  }
  0x60   : > { %v3466_v25 = vor.u32 %v4065_v23, %v3465_v22  ;;  %1166 = vmatpush.bf16.msra.mxu0 %v3458_v20  ;;  %v4061_v27 = vld [vmem:[%s4694_s29 + $0x98] sm:$0xf0]  ;;  %v4060_v28 = vld [vmem:[%s4694_s29 + $0x94] sm:$0xf]  ;;  %v3447_v30 = vld [vmem:[%s4694_s29 + $0x9c] sm:$0xf0] }
  0x61   : > { %1180 = vmatpush.bf16.msra.mxu1 %v3462_v24  ;;  %v3446_v29 = vor.u32 %v4061_v27, %v3445_v26  ;;  %v3453_v31 = vld [vmem:[%s4694_s29 + $0x98] sm:$0xf]  ;;  %v4062_v32 = vld [vmem:[%s4694_s29 + $0xa0] sm:$0xf0]  ;;  %v3450_v33 = vor.u32 %v4060_v28, %v3447_v30  ;;  %v4057_v37 = vld [vmem:[%s4694_s29 + $0x7c] sm:$0xf] }
  0x62   : > { %s872_s19 = scalar_lea.vmem %s5290_s26, %s4039_s20  ;;  %1194 = vmatpush.bf16.msra.mxu2 %v3466_v25  ;;  %v3454_v34 = vor.u32 %v4062_v32, %v3453_v31  ;;  %v3433_v35 = vld [vmem:[%s4694_s29 + $0x78] sm:$0xf]  ;;  %v4058_v36 = vld [vmem:[%s4694_s29 + $0x80] sm:$0xf0]  ;;  %v3435_v39 = vld [vmem:[%s4694_s29 + $0x84] sm:$0xf0] }
  0x63   : > { %v933_v0 = vld [vmem:[%s872_s19] sm:$0xff]  ;;  %v934_v1 = vld [vmem:[%s872_s19 + $0x8] sm:$0xff]  ;;  %v4265_v3 = vpop.eup %4264  ;;  %s879_s24 = scalar_lea.vmem %s5291_s13, %s5306_s0  ;;  %v3434_v38 = vor.u32 %v4058_v36, %v3433_v35  ;;  %v3438_v42 = vor.u32 %v4057_v37, %v3435_v39  ;;  %v3423_v48 = vld [vmem:[%s4694_s29 + $0x6c] sm:$0xf0]  ;;  %s4181_s23 = smul.u32 6, %s5306_s0 }
  0x64   : > { %937 = vadd.xlane.f32.xlu0 %v933_v0  ;;  %v942_v4 = vmul.f32 128.0, %v4265_v3  ;;  %vm946_vm0 = vweird.f32 %v4265_v3  ;;  %1167 = vmatpush.bf16.msra.mxu0 %v3446_v29  ;;  %v3441_v40 = vld [vmem:[%s4694_s29 + $0x80] sm:$0xf]  ;;  %v4059_v41 = vld [vmem:[%s4694_s29 + $0x88] sm:$0xf0]  ;;  %s4473_s26 = smov 64  }
  0x65   : > { %1181 = vmatpush.bf16.msra.mxu1 %v3450_v33  ;;  %v3442_v43 = vor.u32 %v4059_v41, %v3441_v40  ;;  %v3421_v44 = vld [vmem:[%s4694_s29 + $0x60] sm:$0xf]  ;;  %v4055_v45 = vld [vmem:[%s4694_s29 + $0x68] sm:$0xf0]  ;;  %v4054_v46 = vld [vmem:[%s4694_s29 + $0x64] sm:$0xf]  ;;  %s4810_s2 = scalar_lea.vmem %s5251_s5, %s4181_s23 }
  0x66   : > { %v943_v5 = vsub.f32 1.0, %v942_v4  ;;  %1195 = vmatpush.bf16.msra.mxu2 %v3454_v34  ;;  %v3422_v47 = vor.u32 %v4055_v45, %v3421_v44  ;;  %v3429_v49 = vld [vmem:[%s4694_s29 + $0x68] sm:$0xf]  ;;  %v4056_v50 = vld [vmem:[%s4694_s29 + $0x70] sm:$0xf0]  ;;  %v3426_v51 = vor.u32 %v4054_v46, %v3423_v48  ;;  %s4831_s19 = sshll.u32 %s5306_s0, 1 }
  0x67   : > { %v3430_v52 = vor.u32 %v4056_v50, %v3429_v49  ;;  %v3409_v53 = vld [vmem:[%s4694_s29 + $0x48] sm:$0xf]  ;;  %v4052_v54 = vld [vmem:[%s4694_s29 + $0x50] sm:$0xf0]  ;;  %v4051_v55 = vld [vmem:[%s4694_s29 + $0x4c] sm:$0xf]  ;;  %s4884_s23 = scalar_lea.vmem %s5253_s7, %s4831_s19  ;;  %s4909_s22 = scalar_lea.vmem %s5254_s8, %s4831_s19 }
  0x68   : > { %v944_v6 = vmul.f32 %v4265_v3, %v943_v5  ;;  %1168 = vmatpush.bf16.msra.mxu0 %v3434_v38  ;;  %v3410_v56 = vor.u32 %v4052_v54, %v3409_v53  ;;  %v3411_v57 = vld [vmem:[%s4694_s29 + $0x54] sm:$0xf0]  ;;  %v3417_v58 = vld [vmem:[%s4694_s29 + $0x50] sm:$0xf]  ;;  %v4053_v59 = vld [vmem:[%s4694_s29 + $0x58] sm:$0xf0] }
  0x69   : > { %1182 = vmatpush.bf16.msra.mxu1 %v3438_v42  ;;  %v3414_v60 = vor.u32 %v4051_v55, %v3411_v57  ;;  %v3418_v61 = vor.u32 %v4053_v59, %v3417_v58  ;;  %v3397_v62 = vld [vmem:[%s4694_s29 + $0x30] sm:$0xf]  ;;  %v4049_v63 = vld [vmem:[%s4694_s29 + $0x38] sm:$0xf0]  ;;  %v3399_v2 = vld [vmem:[%s4694_s29 + $0x3c] sm:$0xf0] }
  0x6a   : > { %v945_v7 = vadd.f32 %v4265_v3, %v944_v6  ;;  %1196 = vmatpush.bf16.msra.mxu2 %v3442_v43  ;;  %v4050_v4 = vld [vmem:[%s4694_s29 + $0x40] sm:$0xf0]  ;;  %v3373_v19 = vld [vmem:[%s4694_s29] sm:$0xf]  ;;  %v4043_v20 = vld [vmem:[%s4694_s29 + $0x8] sm:$0xf0] }
  0x6b   : > { %v4042_v21 = vld [vmem:[%s4694_s29 + $0x4] sm:$0xf]  ;;  %v3374_v23 = vor.u32 %v4043_v20, %v3373_v19  ;;  %v3375_v24 = vld [vmem:[%s4694_s29 + $0xc] sm:$0xf0]  ;;  %v3381_v25 = vld [vmem:[%s4694_s29 + $0x8] sm:$0xf] }
  0x6c   : > { %939 = vadd.xlane.f32.xlu0 %v934_v1  ;;  %v4718_v8 = vsel %vm946_vm0, %v4265_v3, %v945_v7  ;;  %1169 = vmatpush.bf16.msra.mxu0 %v3422_v47  ;;  %v3405_v3 = vld [vmem:[%s4694_s29 + $0x38] sm:$0xf]  ;;  %v4044_v26 = vld [vmem:[%s4694_s29 + $0x10] sm:$0xf0]  ;;  %v3378_v28 = vor.u32 %v4042_v21, %v3375_v24  ;;  %v4249_v47 = vld [vmem:[%s879_s24] ss:$0 sm:$0xff] }
  0x6d   : > { %1183 = vmatpush.bf16.msra.mxu1 %v3426_v51  ;;  %v3406_v6 = vor.u32 %v4050_v4, %v3405_v3  ;;  %v3385_v7 = vld [vmem:[%s4694_s29 + $0x18] sm:$0xf]  ;;  %v3382_v29 = vor.u32 %v4044_v26, %v3381_v25  ;;  %s5292_s24 = sld [smem:[#allocation13_spill]]  ;;  %s4040_s21 = sshll.u32 %s5306_s0, 7 }
  0x6e   : > { %1197 = vmatpush.bf16.msra.mxu2 %v3430_v52  ;;  %v4250_v52 = vld [vmem:[%s882_s25] ss:$0 sm:$0xff]  ;;  %s4872_s30 = scalar_lea.vmem %s5252_s6, %s4040_s21  ;;  %s5293_s27 = sld [smem:[#allocation17_spill]] }
  0x6f   : > { %s4969_s14 = scalar_lea.vmem [#allocation6], %s3354_s18  ;;  %s3364_s15 = sshll.u32 %s5306_s0, 2 }
  0x70   : > { %1170 = vmatpush.bf16.msra.mxu0 %v3410_v56  ;;  %s5294_s10 = sld [smem:[#allocation16_spill]] }
  0x71   : > { %1184 = vmatpush.bf16.msra.mxu1 %v3414_v60  ;;  %s5295_s25 = sld [smem:[#allocation18_spill]] }
  0x72   : > { %1198 = vmatpush.bf16.msra.mxu2 %v3418_v61  ;;  %s5296_s20 = sld [smem:[#allocation19_spill]] }
  0x73   : > { %s876_s17 = scalar_lea.vmem %s5292_s24, %s4831_s19 }
  0x74   : > { %s4965_s1 = scalar_lea.vmem %s5293_s27, %s4831_s19 }
  0x76   : > { %1199 = vmatpush.bf16.msra.mxu2 %v3406_v6  ;;  %s4987_s11 = scalar_lea.vmem %s5294_s10, %s3364_s15 }
  0x77   : > { %s5011_s27 = scalar_lea.vmem %s5295_s25, %s4831_s19  ;;  %s5299_s25 = sld [smem:[#allocation22_spill]] }
  0x78   : > { %s5017_s10 = scalar_lea.vmem %s5296_s20, %s4831_s19 }
  0xd7   : > { %v938_v9 = vpop.xlane.xlu0 %937 }
  0xd8   : > { %v948_v10 = vmul.f32 %v4718_v8, %v938_v9  ;;  %v4046_v9 = vld [vmem:[%s4694_s29 + $0x20] sm:$0xf0] }
  0xda   : > { %v4721_v11 = vsub.f32 %v933_v0, %v948_v10  ;;  %v4048_v0 = vld [vmem:[%s4694_s29 + $0x34] sm:$0xf]  ;;  %v4045_v10 = vld [vmem:[%s4694_s29 + $0x1c] sm:$0xf] }
  0xdb   : > { %v3402_v5 = vor.u32 %v4048_v0, %v3399_v2 }
  0xdc   : > { %v952_v12 = vmul.f32 %v4721_v11, %v4721_v11 }
  0xdd   : > { %1185 = vmatpush.bf16.msra.mxu1 %v3402_v5 }
  0xde   : > { %954 = vadd.xlane.f32.xlu1 %v952_v12  ;;  %v3386_v12 = vor.u32 %v4046_v9, %v3385_v7 }
  0xdf   : > { %v940_v13 = vpop.xlane.xlu0 %939 }
  0xe0   : > { %v949_v14 = vmul.f32 %v4718_v8, %v940_v13  ;;  %v3387_v13 = vld [vmem:[%s4694_s29 + $0x24] sm:$0xf0] }
  0xe1   : > { %v3390_v17 = vor.u32 %v4045_v10, %v3387_v13 }
  0xe2   : > { %v4726_v15 = vsub.f32 %v934_v1, %v949_v14  ;;  %v3398_v1 = vor.u32 %v4049_v63, %v3397_v62  ;;  %v3393_v14 = vld [vmem:[%s4694_s29 + $0x20] sm:$0xf] }
  0xe3   : > { %1186 = vmatpush.bf16.msra.mxu1 %v3390_v17 }
  0xe4   : > { %v953_v16 = vmul.f32 %v4726_v15, %v4726_v15  ;;  %1171 = vmatpush.bf16.msra.mxu0 %v3398_v1 }
  0xe6   : > { %956 = vadd.xlane.f32.xlu1 %v953_v16  ;;  %v4047_v16 = vld [vmem:[%s4694_s29 + $0x28] sm:$0xf0] }
  0xe7   : > { %v3394_v18 = vor.u32 %v4047_v16, %v3393_v14  ;;  %1187 = vmatpush.bf16.msra.mxu1 %v3378_v28 }
  0xe8   : > { %1172 = vmatpush.bf16.msra.mxu0 %v3386_v12 }
  0xe9   : > { %1200 = vmatpush.bf16.msra.mxu2 %v3394_v18 }
  0xec   : > { %1173 = vmatpush.bf16.msra.mxu0 %v3374_v23 }
  0xed   : > { %1201 = vmatpush.bf16.msra.mxu2 %v3382_v29 }
 0x151   : > { %v955_v22 = vpop.xlane.xlu1 %954 }
 0x152   : > { %v958_v27 = vmul.f32 %v955_v22, %v4718_v8 }
 0x154   : > { %v960_v30 = vadd.f32 1e-12, %v958_v27 }
 0x156   : > { %4266 = vrsqrt.f32 %v960_v30  ;;  %vm968_vm2 = vweird.f32 %v960_v30 }
 0x159   : > { %v957_v31 = vpop.xlane.xlu1 %956 }
 0x15a   : > { %v959_v32 = vmul.f32 %v957_v31, %v4718_v8 }
 0x15c   : > { %v4267_v33 = vpop.eup %4266  ;;  %v961_v34 = vadd.f32 1e-12, %v959_v32 }
 0x15d   : > { %v963_v35 = vmul.f32 %v4267_v33, %v960_v30  ;;  %vm969_vm1 = vweird.f32 %v4267_v33  ;;  %v994_v30 = vld [vmem:[%s876_s17] sm:$0x3]  ;;  %s4915_s17 = scalar_lea.vmem %s5255_s9, %s4831_s19 }
 0x15e   : > { %4268 = vrsqrt.f32 %v961_v34  ;;  %vm970_vm3 = vmor %vm968_vm2, %vm969_vm1  ;;  %vm978_vm5 = vweird.f32 %v961_v34  ;;  %v4838_v32 = vperm.slane %v994_v30, 0 }
 0x15f   : > { %v964_v36 = vmul.f32 %v4267_v33, %v963_v35 }
 0x161   : > { %v965_v37 = vmul.f32 0.5, %v964_v36 }
 0x163   : > { %v966_v38 = vsub.f32 1.5, %v965_v37 }
 0x164   : > { %v4269_v39 = vpop.eup %4268 }
 0x165   : > { %v967_v40 = vmul.f32 %v4267_v33, %v966_v38  ;;  %v973_v41 = vmul.f32 %v4269_v39, %v961_v34  ;;  %vm979_vm4 = vweird.f32 %v4269_v39 }
 0x166   : > { %vm980_vm6 = vmor %vm978_vm5, %vm979_vm4 }
 0x167   : > { %v974_v42 = vmul.f32 %v4269_v39, %v973_v41  ;;  %v971_v43 = vsel %vm970_vm3, %v4267_v33, %v967_v40  ;;  %v996_v41 = vrot.slane %v994_v30, 1 }
 0x168   : > { %v982_v46 = vmul.f32 %v971_v43, %v4721_v11 }
 0x169   : > { %v975_v44 = vmul.f32 0.5, %v974_v42  ;;  %v4842_v43 = vperm.slane %v996_v41, 0 }
 0x16a   : > { %v987_v51 = vmul.f32 %v4249_v47, %v982_v46 }
 0x16b   : > { %v976_v45 = vsub.f32 1.5, %v975_v44 }
 0x16c   : > { %v4800_v11 = vadd.f32 %v4250_v52, %v987_v51 }
 0x16d   : > { %v977_v48 = vmul.f32 %v4269_v39, %v976_v45 }
 0x16f   : > { %v981_v49 = vsel %vm980_vm6, %v4269_v39, %v977_v48 }
 0x170   : > { %v983_v50 = vmul.f32 %v981_v49, %v4726_v15  ;;  %v1030_v15 = vld [vmem:[%s4810_s2] sm:$0x7] }
 0x171   : > { %v1033_v56 = vperm.slane %v1030_v15, 1  ;;  %v1032_v60 = vperm.slane %v1030_v15, 0  ;;  %v1034_v62 = vperm.slane %v1030_v15, 2 }
 0x172   : > { %v988_v53 = vmul.f32 %v4249_v47, %v983_v50 }
 0x174   : > { %v4802_v54 = vadd.f32 %v4250_v52, %v988_v53 }
 0x176   : > { %v997_v55 = vpack.c.bf16 %v4802_v54, %v4800_v11 }
 0x178   : > { %1174 = vmatmul.bf16.vlgmr.msra.gmra.mxu0 %v997_v55  ;;  %1188 = vmatmul.bf16.vlgmr.msra.gmra.mxu1 %v997_v55 }
 0x179   : > { %1202 = vmatmul.bf16.vlgmr.msra.gmra.mxu2 %v997_v55 }
 0x1f5   : > { %v1175_v57 = vpop.f32.mrf.mxu0  ;;  %v1189_v58 = vpop.f32.mrf.mxu1 }
 0x1f6   : > { %v1190_v59 = vadd.f32 %v1189_v58, %v1033_v56  ;;  %v1176_v1 = vadd.f32 %v1175_v57, %v1032_v60 }
 0x1f8   : > { %v1210_v61 = vpack.c.bf16 %v1190_v59, %v1190_v59  ;;  %v1208_v12 = vpack.c.bf16 %v1176_v1, %v1176_v1 }
 0x1fa   : > { %v1327_v63 = vunpack.c.l.b16 %v1210_v61  ;;  %v1221_v0 = vsel %vm1216_vm7, %v1210_v61, 0  ;;  %v1322_v50 = vunpack.c.l.b16 %v1208_v12 }
 0x1fb   : > { %1230 = vmatpush.bf16.xpose.msra.mxu3 %v1221_v0 }
 0x1fc   : > { %v1328_v2 = vpack.c.b16 %v1327_v63, %v1327_v63  ;;  %v1203_v3 = vpop.f32.mrf.mxu2  ;;  %v1323_v51 = vpack.c.b16 %v1322_v50, %v1322_v50 }
 0x1fd   : > { %v1204_v4 = vadd.f32 %v1203_v3, %v1034_v62  ;;  %v1177_v5 = vpop.f32.mrf.mxu0  ;;  %v1191_v6 = vpop.f32.mrf.mxu1 }
 0x1fe   : > { %v1178_v7 = vadd.f32 %v1177_v5, %v1032_v60  ;;  %v1192_v9 = vadd.f32 %v1191_v6, %v1033_v56  ;;  %1329 = vrot.lane.b32.xlu0 %v1328_v2, %s4473_s26 }
 0x1ff   : > { %v4815_v10 = vpack.c.bf16 %v1204_v4, %v1204_v4 }
 0x200   : > { %v1209_v13 = vpack.c.bf16 %v1178_v7, %v1178_v7  ;;  %v1211_v14 = vpack.c.bf16 %v1192_v9, %v1192_v9 }
 0x201   : > { %v1287_v19 = vsel %vm1285_vm8, %v4815_v10, 0  ;;  %v1404_v5 = vunpack.c.l.b16 %v4815_v10 }
 0x202   : > { %v1351_v16 = vunpack.c.l.b16 %v1209_v13  ;;  %v1356_v17 = vunpack.c.l.b16 %v1211_v14  ;;  %3467 = vmatmul.msk.bf16.vlgmr.msra.gmra.mxu3 %vm1216_vm7, %v1208_v12  ;;  %v1240_v18 = vsel %vm1216_vm7, %v1211_v14, 0 }
 0x203   : > { %1249 = vmatpush.bf16.xpose.msrb.mxu3 %v1240_v18  ;;  %v1405_v6 = vpack.c.b16 %v1404_v5, %v1404_v5 }
 0x204   : > { %v1352_v20 = vpack.c.b16 %v1351_v16, %v1351_v16  ;;  %v1357_v21 = vpack.c.b16 %v1356_v17, %v1356_v17  ;;  %v1205_v22 = vpop.f32.mrf.mxu2 }
 0x205   : > { %v1206_v23 = vadd.f32 %v1205_v22, %v1034_v62 }
 0x206   : > { %1358 = vrot.lane.b32.xlu1 %v1357_v21, %s4473_s26  ;;  %1353 = vrot.lane.b32.xlu0 %v1352_v20, %s4473_s26 }
 0x207   : > { %v4823_v24 = vpack.c.bf16 %v1206_v23, %v1206_v23 }
 0x209   : > { %v1306_v25 = vsel %vm1285_vm8, %v4823_v24, 0 }
 0x20a   : > { %1315 = vmatpush.bf16.msrb.mxu0 %v1306_v25 }
 0x20b   : > { %1296 = vmatpush.bf16.msra.mxu3 %v1287_v19 }
 0x212   : > { %3468 = vmatmul.msk.bf16.vlgmr.msrb.gmra.mxu3 %vm1216_vm7, %v1209_v13 }
 0x270   : > { %v1330_v26 = vpop.permute.xlu0 %1329 }
 0x271   : > { %v1335_v27 = vsel %vm1216_vm7, %v1330_v26, 0 }
 0x272   : > { %1344 = vmatpush.bf16.xpose.msrb.mxu3 %v1335_v27 }
 0x278   : > { %v1359_v28 = vpop.permute.xlu1 %1358  ;;  %v1354_v31 = vpop.permute.xlu0 %1353 }
 0x279   : > { %v1364_v29 = vsel %vm1216_vm7, %v1359_v28, 0  ;;  %v1428_v28 = vunpack.c.l.b16 %v4823_v24 }
 0x27a   : > { %1373 = vmatpush.bf16.xpose.msrb.mxu2 %v1364_v29 }
 0x27b   : > { %v1429_v29 = vpack.c.b16 %v1428_v28, %v1428_v28  ;;  %v4085_v28 = vld [vmem:[%s4704_s16 + $0x54] sm:$0xf0] }
 0x281   : > { %3472 = vmatmul.msk.bf16.vlgmr.msrb.gmra.mxu2 %vm1216_vm7, %v1354_v31 }
 0x285   : > { %v1232_v33 = vpop.f32.mrf.mxu3 }
 0x286   : > { %v1233_v34 = vadd.f32 %v1232_v33, %v4838_v32 }
 0x288   : > { %v1256_v35 = vsel %vm1255_vm9, %v1233_v34, -inf }
 0x289   : > { %1257 = vmax.xlane.f32.xlu2 %v1256_v35 }
 0x28d   : > { %v1234_v36 = vpop.f32.mrf.mxu3 }
 0x295   : > { %v1251_v37 = vpop.f32.mrf.mxu3 }
 0x296   : > { %v1252_v52 = vadd.f32 %v1251_v37, %v4842_v43 }
 0x298   : > { %v1259_v53 = vsel %vm1255_vm9, %v1252_v52, -inf }
 0x29d   : > { %v1253_v38 = vpop.f32.mrf.mxu3 }
 0x2fc   : > { %v1258_v39 = vpop.xlane.xlu2 %1257 }
 0x2fd   : > { %v1262_v40 = vsub.f32 %v1233_v34, %v1258_v39 }
 0x2ff   : > { %v1264_v42 = vmul.f32 1.442695, %v1262_v40 }
 0x301   : > { %4270 = vpow2.f32 %v1264_v42  ;;  %v4073_v42 = vld [vmem:[%s4872_s30 + $0x38] sm:$0xff] }
 0x302   : > { %1530 = vmatpush.bf16.msrb.mxu1 %v4073_v42 }
 0x304   : > { %v1375_v44 = vpop.f32.mrf.mxu2 }
 0x305   : > { %v1376_v45 = vadd.f32 %v1375_v44, %v4842_v43  ;;  %v4072_v44 = vld [vmem:[%s4872_s30 + $0x30] sm:$0xff] }
 0x306   : > { %1531 = vmatpush.bf16.msrb.mxu1 %v4072_v44  ;;  %v3535_v44 = vld [vmem:[%s4704_s16 + $0x38] sm:$0xf0] }
 0x307   : > { %v4271_v46 = vpop.eup %4270  ;;  %v1382_v47 = vsel %vm1255_vm9, %v1376_v45, -inf }
 0x308   : > { %1383 = vmax.xlane.f32.xlu0 %v1382_v47  ;;  %v1268_v48 = vsel %vm1255_vm9, %v4271_v46, 0.0 }
 0x309   : > { %1269 = vadd.xlane.f32.xlu2 %v1268_v48  ;;  %v4069_v48 = vld [vmem:[%s4872_s30 + $0x18] sm:$0xff] }
 0x30c   : > { %v1377_v49 = vpop.f32.mrf.mxu2 }
 0x30d   : > { %v4068_v49 = vld [vmem:[%s4872_s30 + $0x10] sm:$0xff] }
 0x321   : > { %1324 = vrot.lane.b32.xlu2 %v1323_v51, %s4473_s26  ;;  %v4067_v51 = vld [vmem:[%s4872_s30 + $0x8] sm:$0xff] }
 0x34a   : > { %1260 = vmax.xlane.f32.xlu2 %v1259_v53 }
 0x37b   : > { %v1384_v55 = vpop.xlane.xlu0 %1383 }
 0x37c   : > { %v1386_v15 = vsub.f32 %v1376_v45, %v1384_v55  ;;  %v1270_v56 = vpop.xlane.xlu2 %1269  ;;  %v4071_v45 = vld [vmem:[%s4872_s30 + $0x28] sm:$0xff] }
 0x37d   : > { %4272 = vrcp.f32 %v1270_v56  ;;  %1532 = vmatpush.bf16.msrb.mxu1 %v4071_v45 }
 0x37e   : > { %v1389_v57 = vmul.f32 1.442695, %v1386_v15  ;;  %v4066_v15 = vld [vmem:[%s4872_s30] sm:$0xff] }
 0x380   : > { %4274 = vpow2.f32 %v1389_v57 }
 0x383   : > { %v4273_v58 = vpop.eup %4272 }
 0x384   : > { %v1276_v59 = vmul.f32 %v4273_v58, %v4271_v46  ;;  %v1325_v63 = vpop.permute.xlu2 %1324  ;;  %v4070_v46 = vld [vmem:[%s4872_s30 + $0x20] sm:$0xff] }
 0x385   : > { %1533 = vmatpush.bf16.msrb.mxu1 %v4070_v46  ;;  %v3525_v46 = vld [vmem:[%s4704_s16 + $0x20] sm:$0xf] }
 0x386   : > { %v4275_v60 = vpop.eup %4274  ;;  %v1278_v61 = vpack.c.bf16 %v1276_v59, %v1276_v59 }
 0x387   : > { %v1394_v62 = vsel %vm1255_vm9, %v4275_v60, 0.0 }
 0x388   : > { %1395 = vadd.xlane.f32.xlu0 %v1394_v62  ;;  %3469 = vmatmul.msk.bf16.vlgmr.msra.gmra.mxu3 %vm1255_vm9, %v1278_v61  ;;  %v4251_v62 = vld [vmem:[%s4884_s23] ss:$0 sm:$0xff] }
 0x389   : > { %1534 = vmatpush.bf16.msrb.mxu1 %v4069_v48  ;;  %v4078_v48 = vld [vmem:[%s4704_s16 + $0x24] sm:$0xf] }
 0x38d   : > { %1535 = vmatpush.bf16.msrb.mxu1 %v4068_v49 }
 0x391   : > { %1536 = vmatpush.bf16.msrb.mxu1 %v4067_v51 }
 0x395   : > { %1537 = vmatpush.bf16.msrb.mxu1 %v4066_v15 }
 0x398   : > { %3471 = vmatmul.msk.bf16.vlgmr.msrb.gmra.mxu3 %vm1216_vm7, %v1325_v63 }
 0x3bd   : > { %v1261_v0 = vpop.xlane.xlu2 %1260 }
 0x3be   : > { %v1263_v1 = vsub.f32 %v1252_v52, %v1261_v0 }
 0x3c0   : > { %v1266_v2 = vmul.f32 1.442695, %v1263_v1 }
 0x3c2   : > { %4276 = vpow2.f32 %v1266_v2 }
 0x3c8   : > { %v4277_v3 = vpop.eup %4276 }
 0x3c9   : > { %v1271_v4 = vsel %vm1255_vm9, %v4277_v3, 0.0 }
 0x3ca   : > { %1272 = vadd.xlane.f32.xlu2 %v1271_v4 }
 0x3e2   : > { %1406 = vrot.lane.b32.xlu2 %v1405_v6, %s4473_s26 }
 0x3fb   : > { %v1396_v37 = vpop.xlane.xlu0 %1395 }
 0x40b   : > { %v4856_v7 = vpop.f32.mrf.mxu3 }
 0x413   : > { %v1300_v9 = vpop.f32.mrf.mxu3 }
 0x41b   : > { %v1346_v12 = vpop.f32.mrf.mxu3 }
 0x41c   : > { %v1347_v13 = vadd.f32 %v1346_v12, %v4838_v32 }
 0x41e   : > { %v1379_v14 = vsel %vm1255_vm9, %v1347_v13, -inf }
 0x41f   : > { %1380 = vmax.xlane.f32.xlu1 %v1379_v14  ;;  %v3565_v14 = vld [vmem:[%s4704_s16 + $0x70] sm:$0xf] }
 0x423   : > { %v1348_v16 = vpop.f32.mrf.mxu3 }
 0x424   : > { %v4089_v16 = vld [vmem:[%s4704_s16 + $0x74] sm:$0xf0] }
 0x43d   : > { %v1273_v17 = vpop.xlane.xlu2 %1272 }
 0x43e   : > { %4278 = vrcp.f32 %v1273_v17  ;;  %v4088_v17 = vld [vmem:[%s4704_s16 + $0x74] sm:$0xf] }
 0x444   : > { %v4279_v18 = vpop.eup %4278 }
 0x445   : > { %v1277_v19 = vmul.f32 %v4279_v18, %v4277_v3  ;;  %v1407_v20 = vpop.permute.xlu2 %1406  ;;  %v3566_v18 = vor.u32 %v4089_v16, %v3565_v14 }
 0x446   : > { %v1412_v10 = vsel %vm1285_vm8, %v1407_v20, 0 }
 0x447   : > { %1421 = vmatpush.bf16.msra.mxu3 %v1412_v10  ;;  %v1279_v21 = vpack.c.bf16 %v1277_v19, %v1277_v19  ;;  %v3567_v19 = vld [vmem:[%s4704_s16 + $0x78] sm:$0xf0]  ;;  %1701 = vmatpush.bf16.msra.mxu2 %v3566_v18  ;;  %v3557_v10 = vld [vmem:[%s4704_s16 + $0x60] sm:$0xf] }
 0x448   : > { %v3570_v20 = vor.u32 %v4088_v17, %v3567_v19 }
 0x449   : > { %3470 = vmatmul.msk.bf16.vlgmr.msrb.gmra.mxu0 %vm1255_vm9, %v1279_v21  ;;  %v4087_v21 = vld [vmem:[%s4704_s16 + $0x64] sm:$0xf0] }
 0x44b   : > { %1715 = vmatpush.bf16.msrb.mxu3 %v3570_v20 }
 0x492   : > { %v1381_v22 = vpop.xlane.xlu1 %1380 }
 0x493   : > { %v1385_v23 = vsub.f32 %v1347_v13, %v1381_v22  ;;  %v4086_v22 = vld [vmem:[%s4704_s16 + $0x64] sm:$0xf] }
 0x495   : > { %v1387_v25 = vmul.f32 1.442695, %v1385_v23  ;;  %v3558_v23 = vor.u32 %v4087_v21, %v3557_v10 }
 0x497   : > { %4280 = vpow2.f32 %v1387_v25  ;;  %v3559_v25 = vld [vmem:[%s4704_s16 + $0x68] sm:$0xf0]  ;;  %1702 = vmatpush.bf16.msra.mxu2 %v3558_v23 }
 0x49d   : > { %v4281_v26 = vpop.eup %4280 }
 0x49e   : > { %v1391_v27 = vsel %vm1255_vm9, %v4281_v26, 0.0 }
 0x49f   : > { %1392 = vadd.xlane.f32.xlu1 %v1391_v27  ;;  %v3549_v27 = vld [vmem:[%s4704_s16 + $0x50] sm:$0xf] }
 0x4b8   : > { %1430 = vrot.lane.b32.xlu1 %v1429_v29, %s4473_s26  ;;  %v4084_v29 = vld [vmem:[%s4704_s16 + $0x54] sm:$0xf] }
 0x4c6   : > { %v1317_v30 = vpop.f32.mrf.mxu0 }
 0x4ce   : > { %v1319_v31 = vpop.f32.mrf.mxu0 }
 0x4cf   : > { %v3551_v31 = vld [vmem:[%s4704_s16 + $0x58] sm:$0xf0] }
 0x512   : > { %v1393_v33 = vpop.xlane.xlu1 %1392 }
 0x513   : > { %4282 = vrcp.f32 %v1393_v33  ;;  %v3554_v33 = vor.u32 %v4084_v29, %v3551_v31 }
 0x514   : > { %4284 = vrcp.f32 %v1396_v37 }
 0x519   : > { %v4283_v34 = vpop.eup %4282 }
 0x51a   : > { %v1399_v35 = vmul.f32 %v4283_v34, %v4281_v26  ;;  %v4285_v38 = vpop.eup %4284  ;;  %v3562_v26 = vor.u32 %v4086_v22, %v3559_v25  ;;  %v3541_v34 = vld [vmem:[%s4704_s16 + $0x40] sm:$0xf] }
 0x51b   : > { %v1400_v39 = vmul.f32 %v4285_v38, %v4275_v60  ;;  %v3543_v38 = vld [vmem:[%s4704_s16 + $0x48] sm:$0xf0]  ;;  %v4252_v22 = vld [vmem:[%s4909_s22] ss:$0 sm:$0xff] }
 0x51c   : > { %v1401_v36 = vpack.c.bf16 %v1399_v35, %v1399_v35  ;;  %1716 = vmatpush.bf16.msrb.mxu3 %v3562_v26  ;;  %v4083_v35 = vld [vmem:[%s4704_s16 + $0x44] sm:$0xf0] }
 0x51d   : > { %v1402_v41 = vpack.c.bf16 %v1400_v39, %v1400_v39  ;;  %v3542_v37 = vor.u32 %v4083_v35, %v3541_v34  ;;  %v4096_v34 = vld [vmem:[%s4969_s14 + $0x30] sm:$0xff] }
 0x51e   : > { %3473 = vmatmul.msk.bf16.vlgmr.msra.gmra.mxu3 %vm1255_vm9, %v1401_v36  ;;  %v4082_v36 = vld [vmem:[%s4704_s16 + $0x44] sm:$0xf]  ;;  %v4104_v35 = vld [vmem:[%s4969_s14 + $0x70] sm:$0xff] }
 0x51f   : > { %v3546_v39 = vor.u32 %v4082_v36, %v3543_v38  ;;  %v4095_v36 = vld [vmem:[%s4969_s14 + $0x28] sm:$0xff]  ;;  %v4094_v38 = vld [vmem:[%s4969_s14 + $0x20] sm:$0xff] }
 0x520   : > { %1717 = vmatpush.bf16.msrb.mxu3 %v3554_v33 }
 0x524   : > { %1718 = vmatpush.bf16.msrb.mxu3 %v3546_v39  ;;  %v4102_v39 = vld [vmem:[%s4969_s14 + $0x60] sm:$0xff] }
 0x52a   : > { %v1431_v40 = vpop.permute.xlu1 %1430 }
 0x52b   : > { %v1436_v24 = vsel %vm1285_vm8, %v1431_v40, 0  ;;  %v3533_v40 = vld [vmem:[%s4704_s16 + $0x30] sm:$0xf] }
 0x52c   : > { %1445 = vmatpush.bf16.msra.mxu0 %v1436_v24  ;;  %v4081_v24 = vld [vmem:[%s4704_s16 + $0x34] sm:$0xf0] }
 0x52d   : > { %v3534_v42 = vor.u32 %v4081_v24, %v3533_v40  ;;  %v4093_v40 = vld [vmem:[%s4969_s14 + $0x18] sm:$0xff] }
 0x52e   : > { %v4101_v24 = vld [vmem:[%s4969_s14 + $0x58] sm:$0xff] }
 0x52f   : > { %3474 = vmatmul.msk.bf16.vlgmr.msra.gmra.mxu0 %vm1255_vm9, %v1402_v41  ;;  %v4080_v41 = vld [vmem:[%s4704_s16 + $0x34] sm:$0xf] }
 0x530   : > { %v3538_v45 = vor.u32 %v4080_v41, %v3535_v44  ;;  %v4092_v41 = vld [vmem:[%s4969_s14 + $0x10] sm:$0xff]  ;;  %v4091_v44 = vld [vmem:[%s4969_s14 + $0x8] sm:$0xff] }
 0x532   : > { %1719 = vmatpush.bf16.msrb.mxu3 %v3538_v45  ;;  %v4099_v45 = vld [vmem:[%s4969_s14 + $0x48] sm:$0xff] }
 0x5a1   : > { %v1423_v47 = vpop.f32.mrf.mxu3 }
 0x5a9   : > { %v1425_v50 = vpop.f32.mrf.mxu3 }
 0x5aa   : > { %v3527_v50 = vld [vmem:[%s4704_s16 + $0x28] sm:$0xf0] }
 0x5ab   : > { %v3530_v51 = vor.u32 %v4078_v48, %v3527_v50  ;;  %v4098_v48 = vld [vmem:[%s4969_s14 + $0x40] sm:$0xff] }
 0x5ac   : > { %v1447_v52 = vpop.f32.mrf.mxu0 }
 0x5ad   : > { %v4239_v53 = vpack.i.bf16 %v1447_v52, %v1423_v47  ;;  %v4079_v47 = vld [vmem:[%s4704_s16 + $0x24] sm:$0xf0]  ;;  %1720 = vmatpush.bf16.msrb.mxu3 %v3530_v51  ;;  %v3517_v52 = vld [vmem:[%s4704_s16 + $0x10] sm:$0xf] }
 0x5ae   : > { %v3526_v49 = vor.u32 %v4079_v47, %v3525_v46  ;;  %v1615_v46 = vld [vmem:[%s4987_s11] sm:$0x3] }
 0x5af   : > { %4240 = vrot.lane.b32.xlu0 %v4239_v53, %s4473_s26  ;;  %v4077_v53 = vld [vmem:[%s4704_s16 + $0x14] sm:$0xf0]  ;;  %v4090_v47 = vld [vmem:[%s4969_s14] sm:$0xff]  ;;  %v1618_v50 = vperm.slane %v1615_v46, 1 }
 0x5b0   : > { %v3518_v15 = vor.u32 %v4077_v53, %v3517_v52 }
 0x5b4   : > { %v1449_v55 = vpop.f32.mrf.mxu0 }
 0x5b5   : > { %v4076_v55 = vld [vmem:[%s4704_s16 + $0x14] sm:$0xf] }
 0x621   : > { %v4241_v56 = vpop.permute.xlu0 %4240 }
 0x622   : > { %v4243_v57 = vunpack.i.h.bf16 %v4241_v56  ;;  %v4242_v58 = vunpack.i.l.bf16 %v4241_v56  ;;  %v3519_v56 = vld [vmem:[%s4704_s16 + $0x18] sm:$0xf0] }
 0x624   : > { %v1459_v59 = vsel %vm1216_vm7, %v4856_v7, %v4242_v58  ;;  %v1460_v60 = vsel %vm1216_vm7, %v1317_v30, %v4243_v57  ;;  %v3550_v30 = vor.u32 %v4085_v28, %v3549_v27  ;;  %v3509_v57 = vld [vmem:[%s4704_s16] sm:$0xf]  ;;  %v4075_v58 = vld [vmem:[%s4704_s16 + $0x4] sm:$0xf0] }
 0x625   : > { %v1461_v61 = vpack.c.bf16 %v1460_v60, %v1459_v59  ;;  %v3522_v60 = vor.u32 %v4076_v55, %v3519_v56  ;;  %v4253_v28 = vld [vmem:[%s4915_s17] ss:$0 sm:$0xff] }
 0x626   : > { %1703 = vmatpush.bf16.msra.mxu2 %v3550_v30 }
 0x627   : > { %1538 = vmatmul.bf16.vlgmr.msrb.gmra.mxu1 %v1461_v61  ;;  %v4074_v61 = vld [vmem:[%s4704_s16 + $0x4] sm:$0xf]  ;;  %1721 = vmatpush.bf16.msrb.mxu3 %v3522_v60 }
 0x62a   : > { %1704 = vmatpush.bf16.msra.mxu2 %v3542_v37  ;;  %v4103_v37 = vld [vmem:[%s4969_s14 + $0x68] sm:$0xff] }
 0x62e   : > { %1705 = vmatpush.bf16.msra.mxu2 %v3534_v42  ;;  %v4100_v42 = vld [vmem:[%s4969_s14 + $0x50] sm:$0xff] }
 0x632   : > { %1706 = vmatpush.bf16.msra.mxu2 %v3526_v49  ;;  %v1617_v49 = vperm.slane %v1615_v46, 0 }
 0x636   : > { %1707 = vmatpush.bf16.msra.mxu2 %v3518_v15 }
 0x6a4   : > { %v1539_v63 = vpop.f32.mrf.mxu1 }
 0x6a5   : > { %v1540_v0 = vadd.f32 %v4251_v62, %v1539_v63 }
 0x6a7   : > { %v1544_v1 = vadd.f32 %v1540_v0, %v4800_v11  ;;  %v3510_v0 = vor.u32 %v4075_v58, %v3509_v57 }
 0x6a9   : > { %1548 = vadd.xlane.f32.xlu2 %v1544_v1  ;;  %1708 = vmatpush.bf16.msra.mxu2 %v3510_v0 }
 0x6ac   : > { %v1541_v2 = vpop.f32.mrf.mxu1 }
 0x6ad   : > { %v1542_v3 = vadd.f32 %v4251_v62, %v1541_v2  ;;  %v3511_v62 = vld [vmem:[%s4704_s16 + $0x8] sm:$0xf0] }
 0x6af   : > { %v1545_v4 = vadd.f32 %v1542_v3, %v4802_v54 }
 0x6b1   : > { %1550 = vadd.xlane.f32.xlu0 %v1545_v4 }
 0x71c   : > { %v1549_v5 = vpop.xlane.xlu2 %1548 }
 0x71d   : > { %v1552_v6 = vmul.f32 %v1549_v5, %v4718_v8 }
 0x71f   : > { %v4896_v7 = vsub.f32 %v1544_v1, %v1552_v6  ;;  %v3514_v1 = vor.u32 %v4074_v61, %v3511_v62 }
 0x721   : > { %v1556_v11 = vmul.f32 %v4896_v7, %v4896_v7  ;;  %1722 = vmatpush.bf16.msrb.mxu3 %v3514_v1 }
 0x723   : > { %1558 = vadd.xlane.f32.xlu1 %v1556_v11 }
 0x724   : > { %v1551_v9 = vpop.xlane.xlu0 %1550 }
 0x725   : > { %v1553_v12 = vmul.f32 %v1551_v9, %v4718_v8 }
 0x727   : > { %v4901_v13 = vsub.f32 %v1545_v4, %v1553_v12 }
 0x729   : > { %v1557_v54 = vmul.f32 %v4901_v13, %v4901_v13 }
 0x72b   : > { %1560 = vadd.xlane.f32.xlu2 %v1557_v54 }
 0x796   : > { %v1559_v59 = vpop.xlane.xlu1 %1558 }
 0x797   : > { %v1562_v63 = vmul.f32 %v1559_v59, %v4718_v8 }
 0x799   : > { %v1564_v2 = vadd.f32 1e-12, %v1562_v63 }
 0x79b   : > { %4286 = vrsqrt.f32 %v1564_v2  ;;  %vm1572_vm11 = vweird.f32 %v1564_v2 }
 0x79e   : > { %v1561_v3 = vpop.xlane.xlu2 %1560 }
 0x79f   : > { %v1563_v4 = vmul.f32 %v1561_v3, %v4718_v8 }
 0x7a1   : > { %v4287_v5 = vpop.eup %4286  ;;  %v1565_v6 = vadd.f32 1e-12, %v1563_v4 }
 0x7a2   : > { %v1567_v11 = vmul.f32 %v4287_v5, %v1564_v2  ;;  %vm1573_vm10 = vweird.f32 %v4287_v5 }
 0x7a3   : > { %4288 = vrsqrt.f32 %v1565_v6  ;;  %vm1574_vm12 = vmor %vm1572_vm11, %vm1573_vm10  ;;  %vm1582_vm14 = vweird.f32 %v1565_v6 }
 0x7a4   : > { %v1568_v9 = vmul.f32 %v4287_v5, %v1567_v11 }
 0x7a6   : > { %v1569_v12 = vmul.f32 0.5, %v1568_v9 }
 0x7a8   : > { %v1570_v54 = vsub.f32 1.5, %v1569_v12 }
 0x7a9   : > { %v4289_v14 = vpop.eup %4288 }
 0x7aa   : > { %v1571_v16 = vmul.f32 %v4287_v5, %v1570_v54  ;;  %v1577_v17 = vmul.f32 %v4289_v14, %v1565_v6  ;;  %vm1583_vm13 = vweird.f32 %v4289_v14 }
 0x7ab   : > { %vm1584_vm15 = vmor %vm1582_vm14, %vm1583_vm13 }
 0x7ac   : > { %v1578_v18 = vmul.f32 %v4289_v14, %v1577_v17  ;;  %v1575_v19 = vsel %vm1574_vm12, %v4287_v5, %v1571_v16 }
 0x7ad   : > { %v1586_v21 = vmul.f32 %v1575_v19, %v4896_v7  ;;  %v4097_v7 = vld [vmem:[%s4969_s14 + $0x38] sm:$0xff] }
 0x7ae   : > { %v1579_v20 = vmul.f32 0.5, %v1578_v18  ;;  %1899 = vmatpush.bf16.msrb.mxu0 %v4097_v7 }
 0x7af   : > { %v1591_v27 = vmul.f32 %v4252_v22, %v1586_v21 }
 0x7b0   : > { %v1580_v10 = vsub.f32 1.5, %v1579_v20 }
 0x7b1   : > { %v4955_v30 = vadd.f32 %v4253_v28, %v1591_v27 }
 0x7b2   : > { %v1581_v23 = vmul.f32 %v4289_v14, %v1580_v10  ;;  %1900 = vmatpush.bf16.msrb.mxu0 %v4096_v34 }
 0x7b4   : > { %v1585_v25 = vsel %vm1584_vm15, %v4289_v14, %v1581_v23 }
 0x7b5   : > { %v1587_v26 = vmul.f32 %v1585_v25, %v4901_v13  ;;  %v4105_v13 = vld [vmem:[%s4969_s14 + $0x78] sm:$0xff] }
 0x7b6   : > { %1913 = vmatpush.bf16.msra.mxu1 %v4105_v13  ;;  %1901 = vmatpush.bf16.msrb.mxu0 %v4095_v36 }
 0x7b7   : > { %v1592_v29 = vmul.f32 %v4252_v22, %v1587_v26 }
 0x7b9   : > { %v4957_v31 = vadd.f32 %v4253_v28, %v1592_v29 }
 0x7ba   : > { %1914 = vmatpush.bf16.msra.mxu1 %v4104_v35  ;;  %1902 = vmatpush.bf16.msrb.mxu0 %v4094_v38  ;;  %v4254_v38 = vld [vmem:[%s4965_s1] ss:$0 sm:$0xff] }
 0x7bb   : > { %v1598_v33 = vpack.c.bf16 %v4957_v31, %v4955_v30 }
 0x7bd   : > { %1709 = vmatmul.bf16.vlgmr.msra.gmra.mxu2 %v1598_v33  ;;  %1723 = vmatmul.bf16.vlgmr.msrb.gmra.mxu3 %v1598_v33 }
 0x7be   : > { %1915 = vmatpush.bf16.msra.mxu1 %v4103_v37  ;;  %1903 = vmatpush.bf16.msrb.mxu0 %v4093_v40 }
 0x7c2   : > { %1916 = vmatpush.bf16.msra.mxu1 %v4102_v39  ;;  %1904 = vmatpush.bf16.msrb.mxu0 %v4092_v41 }
 0x7c6   : > { %1917 = vmatpush.bf16.msra.mxu1 %v4101_v24  ;;  %1905 = vmatpush.bf16.msrb.mxu0 %v4091_v44 }
 0x7ca   : > { %1918 = vmatpush.bf16.msra.mxu1 %v4100_v42  ;;  %1906 = vmatpush.bf16.msrb.mxu0 %v4090_v47 }
 0x7ce   : > { %1919 = vmatpush.bf16.msra.mxu1 %v4099_v45 }
 0x7d2   : > { %1920 = vmatpush.bf16.msra.mxu1 %v4098_v48 }
 0x840   : > { %v1710_v51 = vpop.f32.mrf.mxu2  ;;  %v1724_v52 = vpop.f32.mrf.mxu3 }
 0x841   : > { %v1711_v53 = vadd.f32 %v1710_v51, %v1617_v49  ;;  %v1725_v55 = vadd.f32 %v1724_v52, %v1618_v50 }
 0x843   : > { %v1733_v15 = vmul.f32 0.044715, %v1711_v53  ;;  %v1734_v56 = vmul.f32 0.044715, %v1725_v55  ;;  %v1729_v25 = vmul.f32 0.5, %v1711_v53  ;;  %v1730_v28 = vmul.f32 0.5, %v1725_v55 }
 0x845   : > { %v1737_v57 = vmul.f32 %v1733_v15, %v1711_v53  ;;  %v1738_v58 = vmul.f32 %v1734_v56, %v1725_v55  ;;  %v3754_v15 = vld [vmem:[%s4694_s29 + $0x168] sm:$0xf]  ;;  %v4128_v56 = vld [vmem:[%s4694_s29 + $0x170] sm:$0xf0] }
 0x847   : > { %v1741_v59 = vmul.f32 %v1737_v57, %v1711_v53  ;;  %v1742_v60 = vmul.f32 %v1738_v58, %v1725_v55  ;;  %v4127_v57 = vld [vmem:[%s4694_s29 + $0x16c] sm:$0xf]  ;;  %v3755_v58 = vor.u32 %v4128_v56, %v3754_v15  ;;  %v3690_v15 = vld [vmem:[%s4694_s29 + $0xe0] sm:$0xf] }
 0x848   : > { %v1712_v61 = vpop.f32.mrf.mxu2  ;;  %v1726_v62 = vpop.f32.mrf.mxu3  ;;  %v4111_v56 = vld [vmem:[%s4694_s29 + $0xe8] sm:$0xf0] }
 0x849   : > { %v1745_v63 = vadd.f32 %v1741_v59, %v1711_v53  ;;  %v1713_v0 = vadd.f32 %v1712_v61, %v1617_v49  ;;  %v1727_v1 = vadd.f32 %v1726_v62, %v1618_v50  ;;  %v1746_v2 = vadd.f32 %v1742_v60, %v1725_v55  ;;  %v3756_v59 = vld [vmem:[%s4694_s29 + $0x174] sm:$0xf0]  ;;  %v3762_v60 = vld [vmem:[%s4694_s29 + $0x170] sm:$0xf]  ;;  %v4129_v61 = vld [vmem:[%s4694_s29 + $0x178] sm:$0xf0]  ;;  %2152 = vmatpush.bf16.msrb.mxu2 %v3755_v58 }
 0x84a   : > { %v3759_v62 = vor.u32 %v4127_v57, %v3756_v59  ;;  %v3691_v59 = vor.u32 %v4111_v56, %v3690_v15 }
 0x84b   : > { %v1735_v3 = vmul.f32 0.044715, %v1713_v0  ;;  %v1736_v4 = vmul.f32 0.044715, %v1727_v1  ;;  %v1749_v5 = vmul.f32 0.7978846, %v1745_v63  ;;  %v3763_v63 = vor.u32 %v4129_v61, %v3762_v60 }
 0x84c   : > { %v1750_v11 = vmul.f32 0.7978846, %v1746_v2  ;;  %v1731_v26 = vmul.f32 0.5, %v1713_v0  ;;  %v1732_v29 = vmul.f32 0.5, %v1727_v1  ;;  %2166 = vmatpush.bf16.msra.mxu3 %v3759_v62  ;;  %v4124_v2 = vld [vmem:[%s4694_s29 + $0x154] sm:$0xf] }
 0x84d   : > { %v1739_v6 = vmul.f32 %v1735_v3, %v1713_v0  ;;  %v1740_v9 = vmul.f32 %v1736_v4, %v1727_v1  ;;  %4290 = vtanh.f32 %v1749_v5  ;;  %2180 = vmatpush.bf16.msra.mxu0 %v3763_v63  ;;  %v3744_v4 = vld [vmem:[%s4694_s29 + $0x15c] sm:$0xf0]  ;;  %v3750_v5 = vld [vmem:[%s4694_s29 + $0x158] sm:$0xf]  ;;  %v4107_v61 = vld [vmem:[%s4694_s29 + $0xc8] sm:$0xf0] }
 0x84e   : > { %4292 = vtanh.f32 %v1750_v11  ;;  %v3747_v11 = vor.u32 %v4124_v2, %v3744_v4  ;;  %v3670_v60 = vld [vmem:[%s4694_s29 + $0xc0] sm:$0xf]  ;;  %v4106_v62 = vld [vmem:[%s4694_s29 + $0xc4] sm:$0xf]  ;;  %v3678_v2 = vld [vmem:[%s4694_s29 + $0xc8] sm:$0xf] }
 0x84f   : > { %v1743_v12 = vmul.f32 %v1739_v6, %v1713_v0  ;;  %v1744_v54 = vmul.f32 %v1740_v9, %v1727_v1  ;;  %v4126_v6 = vld [vmem:[%s4694_s29 + $0x160] sm:$0xf0] }
 0x850   : > { %v3751_v9 = vor.u32 %v4126_v6, %v3750_v5  ;;  %2167 = vmatpush.bf16.msra.mxu3 %v3747_v11 }
 0x851   : > { %v1747_v14 = vadd.f32 %v1743_v12, %v1713_v0  ;;  %v1748_v16 = vadd.f32 %v1744_v54, %v1727_v1  ;;  %v3742_v0 = vld [vmem:[%s4694_s29 + $0x150] sm:$0xf]  ;;  %v4125_v1 = vld [vmem:[%s4694_s29 + $0x158] sm:$0xf0]  ;;  %v3730_v12 = vld [vmem:[%s4694_s29 + $0x138] sm:$0xf] }
 0x852   : > { %v3743_v3 = vor.u32 %v4125_v1, %v3742_v0  ;;  %2181 = vmatpush.bf16.msra.mxu0 %v3751_v9  ;;  %v4122_v54 = vld [vmem:[%s4694_s29 + $0x140] sm:$0xf0]  ;;  %v3671_v0 = vor.u32 %v4107_v61, %v3670_v60  ;;  %v3672_v1 = vld [vmem:[%s4694_s29 + $0xcc] sm:$0xf0] }
 0x853   : > { %v1751_v17 = vmul.f32 0.7978846, %v1747_v14  ;;  %v1752_v18 = vmul.f32 0.7978846, %v1748_v16  ;;  %v4291_v19 = vpop.eup %4290  ;;  %v4121_v14 = vld [vmem:[%s4694_s29 + $0x13c] sm:$0xf]  ;;  %v3731_v16 = vor.u32 %v4122_v54, %v3730_v12  ;;  %v3675_v4 = vor.u32 %v4106_v62, %v3672_v1 }
 0x854   : > { %v4293_v20 = vpop.eup %4292  ;;  %v1757_v10 = vadd.f32 1.0, %v4291_v19  ;;  %2153 = vmatpush.bf16.msrb.mxu2 %v3743_v3  ;;  %v4123_v19 = vld [vmem:[%s4694_s29 + $0x148] sm:$0xf0]  ;;  %v4108_v3 = vld [vmem:[%s4694_s29 + $0xd0] sm:$0xf0] }
 0x855   : > { %4294 = vtanh.f32 %v1751_v17  ;;  %v1758_v22 = vadd.f32 1.0, %v4293_v20  ;;  %v3732_v17 = vld [vmem:[%s4694_s29 + $0x144] sm:$0xf0]  ;;  %v3679_v5 = vor.u32 %v4108_v3, %v3678_v2 }
 0x856   : > { %4296 = vtanh.f32 %v1752_v18  ;;  %v1761_v7 = vmul.f32 %v1757_v10, %v1729_v25  ;;  %v3738_v18 = vld [vmem:[%s4694_s29 + $0x140] sm:$0xf]  ;;  %v3735_v20 = vor.u32 %v4121_v14, %v3732_v17 }
 0x857   : > { %v1762_v34 = vmul.f32 %v1758_v22, %v1730_v28  ;;  %v3739_v10 = vor.u32 %v4123_v19, %v3738_v18  ;;  %v4119_v22 = vld [vmem:[%s4694_s29 + $0x128] sm:$0xf0]  ;;  %v4120_v28 = vld [vmem:[%s4694_s29 + $0x130] sm:$0xf0] }
 0x858   : > { %2154 = vmatpush.bf16.msrb.mxu2 %v3731_v16  ;;  %2168 = vmatpush.bf16.msra.mxu3 %v3735_v20 }
 0x859   : > { %2182 = vmatpush.bf16.msra.mxu0 %v3739_v10 }
 0x85b   : > { %v4295_v21 = vpop.eup %4294 }
 0x85c   : > { %v4297_v23 = vpop.eup %4296  ;;  %v1759_v27 = vadd.f32 1.0, %v4295_v21  ;;  %v3718_v21 = vld [vmem:[%s4694_s29 + $0x120] sm:$0xf] }
 0x85d   : > { %v1760_v33 = vadd.f32 1.0, %v4297_v23  ;;  %v4118_v23 = vld [vmem:[%s4694_s29 + $0x124] sm:$0xf]  ;;  %v3719_v25 = vor.u32 %v4119_v22, %v3718_v21 }
 0x85e   : > { %v1763_v13 = vmul.f32 %v1759_v27, %v1731_v26  ;;  %v3720_v26 = vld [vmem:[%s4694_s29 + $0x12c] sm:$0xf0]  ;;  %v3726_v27 = vld [vmem:[%s4694_s29 + $0x128] sm:$0xf] }
 0x85f   : > { %v1764_v35 = vmul.f32 %v1760_v33, %v1732_v29  ;;  %v3723_v29 = vor.u32 %v4118_v23, %v3720_v26  ;;  %v3727_v33 = vor.u32 %v4120_v28, %v3726_v27  ;;  %2155 = vmatpush.bf16.msrb.mxu2 %v3719_v25  ;;  %v4255_v27 = vld [vmem:[%s5011_s27] ss:$0 sm:$0xff] }
 0x860   : > { %v1765_v36 = vpack.c.bf16 %v1763_v13, %v1761_v7  ;;  %v3706_v7 = vld [vmem:[%s4694_s29 + $0x108] sm:$0xf]  ;;  %v4116_v13 = vld [vmem:[%s4694_s29 + $0x110] sm:$0xf0] }
 0x861   : > { %v1766_v37 = vpack.c.bf16 %v1764_v35, %v1762_v34  ;;  %2169 = vmatpush.bf16.msra.mxu3 %v3723_v29  ;;  %2183 = vmatpush.bf16.msra.mxu0 %v3727_v33  ;;  %v4115_v34 = vld [vmem:[%s4694_s29 + $0x10c] sm:$0xf]  ;;  %v3707_v35 = vor.u32 %v4116_v13, %v3706_v7  ;;  %v4256_v13 = vld [vmem:[%s5017_s10] ss:$0 sm:$0xff] }
 0x862   : > { %1907 = vmatmul.bf16.vlgmr.msrb.gmra.mxu0 %v1765_v36  ;;  %v3708_v36 = vld [vmem:[%s4694_s29 + $0x114] sm:$0xf0] }
 0x863   : > { %1921 = vmatmul.bf16.vlgmr.msra.gmra.mxu1 %v1766_v37  ;;  %v3714_v37 = vld [vmem:[%s4694_s29 + $0x110] sm:$0xf]  ;;  %2156 = vmatpush.bf16.msrb.mxu2 %v3707_v35 }
 0x8df   : > { %v1908_v39 = vpop.f32.mrf.mxu0 }
 0x8e0   : > { %v1909_v40 = vadd.f32 %v4254_v38, %v1908_v39  ;;  %v1922_v24 = vpop.f32.mrf.mxu1  ;;  %v3711_v39 = vor.u32 %v4115_v34, %v3708_v36 }
 0x8e2   : > { %v1923_v41 = vadd.f32 %v1922_v24, %v1909_v40  ;;  %2170 = vmatpush.bf16.msra.mxu3 %v3711_v39  ;;  %v3694_v24 = vld [vmem:[%s4694_s29 + $0xf0] sm:$0xf] }
 0x8e4   : > { %v1927_v42 = vadd.f32 %v1923_v41, %v4955_v30  ;;  %v4113_v41 = vld [vmem:[%s4694_s29 + $0xf8] sm:$0xf0] }
 0x8e6   : > { %1931 = vadd.xlane.f32.xlu0 %v1927_v42 }
 0x8e7   : > { %v1910_v44 = vpop.f32.mrf.mxu0 }
 0x8e8   : > { %v1911_v45 = vadd.f32 %v4254_v38, %v1910_v44  ;;  %v1924_v46 = vpop.f32.mrf.mxu1  ;;  %v4117_v38 = vld [vmem:[%s4694_s29 + $0x118] sm:$0xf0]  ;;  %v3695_v44 = vor.u32 %v4113_v41, %v3694_v24 }
 0x8e9   : > { %v3715_v40 = vor.u32 %v4117_v38, %v3714_v37 }
 0x8ea   : > { %v1925_v47 = vadd.f32 %v1924_v46, %v1911_v45  ;;  %v3696_v45 = vld [vmem:[%s4694_s29 + $0xfc] sm:$0xf0]  ;;  %v3702_v46 = vld [vmem:[%s4694_s29 + $0xf8] sm:$0xf]  ;;  %2157 = vmatpush.bf16.msrb.mxu2 %v3695_v44 }
 0x8eb   : > { %2184 = vmatpush.bf16.msra.mxu0 %v3715_v40 }
 0x8ec   : > { %v1928_v48 = vadd.f32 %v1925_v47, %v4957_v31  ;;  %v4114_v47 = vld [vmem:[%s4694_s29 + $0x100] sm:$0xf0] }
 0x8ee   : > { %1933 = vadd.xlane.f32.xlu1 %v1928_v48 }
 0x959   : > { %v1932_v49 = vpop.xlane.xlu0 %1931 }
 0x95a   : > { %v1935_v50 = vmul.f32 %v1932_v49, %v4718_v8  ;;  %v3703_v49 = vor.u32 %v4114_v47, %v3702_v46 }
 0x95c   : > { %v4998_v51 = vsub.f32 %v1927_v42, %v1935_v50  ;;  %v4112_v42 = vld [vmem:[%s4694_s29 + $0xf4] sm:$0xf]  ;;  %2185 = vmatpush.bf16.msra.mxu0 %v3703_v49  ;;  %v3682_v50 = vld [vmem:[%s4694_s29 + $0xd8] sm:$0xf] }
 0x95e   : > { %v1939_v30 = vmul.f32 %v4998_v51, %v4998_v51 }
 0x960   : > { %1941 = vadd.xlane.f32.xlu2 %v1939_v30  ;;  %v4110_v30 = vld [vmem:[%s4694_s29 + $0xe0] sm:$0xf0]  ;;  %2186 = vmatpush.bf16.msra.mxu0 %v3691_v59 }
 0x961   : > { %v1934_v52 = vpop.xlane.xlu1 %1933 }
 0x962   : > { %v1936_v53 = vmul.f32 %v1934_v52, %v4718_v8  ;;  %v4109_v52 = vld [vmem:[%s4694_s29 + $0xdc] sm:$0xf] }
 0x964   : > { %v5003_v55 = vsub.f32 %v1928_v48, %v1936_v53  ;;  %v3699_v48 = vor.u32 %v4112_v42, %v3696_v45  ;;  %v3683_v53 = vor.u32 %v4110_v30, %v3682_v50  ;;  %2187 = vmatpush.bf16.msra.mxu0 %v3679_v5 }
 0x966   : > { %v1940_v31 = vmul.f32 %v5003_v55, %v5003_v55  ;;  %2171 = vmatpush.bf16.msra.mxu3 %v3699_v48  ;;  %2158 = vmatpush.bf16.msrb.mxu2 %v3683_v53 }
 0x968   : > { %1943 = vadd.xlane.f32.xlu0 %v1940_v31  ;;  %v3684_v31 = vld [vmem:[%s4694_s29 + $0xe4] sm:$0xf0] }
 0x969   : > { %v3687_v58 = vor.u32 %v4109_v52, %v3684_v31 }
 0x96a   : > { %2159 = vmatpush.bf16.msrb.mxu2 %v3671_v0 }
 0x96b   : > { %2172 = vmatpush.bf16.msra.mxu3 %v3687_v58 }
 0x96f   : > { %2173 = vmatpush.bf16.msra.mxu3 %v3675_v4 }
 0x9d3   : > { %v1942_v57 = vpop.xlane.xlu2 %1941 }
 0x9d4   : > { %v1945_v63 = vmul.f32 %v1942_v57, %v4718_v8 }
 0x9d6   : > { %v1947_v6 = vadd.f32 1e-12, %v1945_v63 }
 0x9d8   : > { %4298 = vrsqrt.f32 %v1947_v6  ;;  %vm1955_vm1 = vweird.f32 %v1947_v6 }
 0x9db   : > { %v1944_v11 = vpop.xlane.xlu0 %1943 }
 0x9dc   : > { %v1946_v9 = vmul.f32 %v1944_v11, %v4718_v8 }
 0x9de   : > { %v4299_v12 = vpop.eup %4298  ;;  %v1948_v54 = vadd.f32 1e-12, %v1946_v9 }
 0x9df   : > { %v1950_v14 = vmul.f32 %v4299_v12, %v1947_v6  ;;  %vm1956_vm0 = vweird.f32 %v4299_v12 }
 0x9e0   : > { %4300 = vrsqrt.f32 %v1948_v54  ;;  %vm1957_vm2 = vmor %vm1955_vm1, %vm1956_vm0  ;;  %vm1965_vm4 = vweird.f32 %v1948_v54 }
 0x9e1   : > { %v1951_v16 = vmul.f32 %v4299_v12, %v1950_v14 }
 0x9e3   : > { %v1952_v17 = vmul.f32 0.5, %v1951_v16 }
 0x9e5   : > { %v1953_v18 = vsub.f32 1.5, %v1952_v17 }
 0x9e6   : > { %v4301_v19 = vpop.eup %4300 }
 0x9e7   : > { %v1954_v20 = vmul.f32 %v4299_v12, %v1953_v18  ;;  %v1960_v10 = vmul.f32 %v4301_v19, %v1948_v54  ;;  %vm1966_vm3 = vweird.f32 %v4301_v19 }
 0x9e8   : > { %vm1967_vm5 = vmor %vm1965_vm4, %vm1966_vm3 }
 0x9e9   : > { %v1961_v21 = vmul.f32 %v4301_v19, %v1960_v10  ;;  %v1958_v22 = vsel %vm1957_vm2, %v4299_v12, %v1954_v20  ;;  %vm2997_vm2 = vcmask 1041409  }
 0x9ea   : > { %v1969_v26 = vmul.f32 %v1958_v22, %v4998_v51  ;;  %v3667_v51 = vld [vmem:[%s4810_s2 + $0x3] sm:$0x7]  ;;  %s5297_s2 = sld [smem:[#allocation21_spill]] }
 0x9eb   : > { %v1962_v23 = vmul.f32 0.5, %v1961_v21  ;;  %v2020_v38 = vperm.slane %v3667_v51, 2  ;;  %v2018_v24 = vperm.slane %v3667_v51, 0  ;;  %v2019_v41 = vperm.slane %v3667_v51, 1 }
 0x9ec   : > { %v1974_v7 = vmul.f32 %v4255_v27, %v1969_v26 }
 0x9ed   : > { %v1963_v25 = vsub.f32 1.5, %v1962_v23 }
 0x9ee   : > { %v5073_v35 = vadd.f32 %v4256_v13, %v1974_v7 }
 0x9ef   : > { %v1964_v28 = vmul.f32 %v4301_v19, %v1963_v25 }
 0x9f1   : > { %v1968_v29 = vsel %vm1967_vm5, %v4301_v19, %v1964_v28 }
 0x9f2   : > { %v1970_v33 = vmul.f32 %v1968_v29, %v5003_v55 }
 0x9f4   : > { %v1975_v34 = vmul.f32 %v4255_v27, %v1970_v33 }
 0x9f6   : > { %v5075_v36 = vadd.f32 %v4256_v13, %v1975_v34 }
 0x9f8   : > { %v1981_v37 = vpack.c.bf16 %v5075_v36, %v5073_v35 }
 0x9fa   : > { %2160 = vmatmul.bf16.vlgmr.msrb.gmra.mxu2 %v1981_v37  ;;  %2174 = vmatmul.bf16.vlgmr.msra.gmra.mxu3 %v1981_v37 }
 0x9fb   : > { %2188 = vmatmul.bf16.vlgmr.msra.gmra.mxu0 %v1981_v37 }
 0xa78   : > { %v2189_v39 = vpop.f32.mrf.mxu0 }
 0xa79   : > { %v2190_v40 = vadd.f32 %v2189_v39, %v2020_v38 }
 0xa7b   : > { %v5080_v55 = vpack.c.bf16 %v2190_v40, %v2190_v40 }
 0xa7d   : > { %v2266_v42 = vsel %vm1285_vm8, %v5080_v55, 0  ;;  %v2161_v44 = vpop.f32.mrf.mxu2  ;;  %v2175_v45 = vpop.f32.mrf.mxu3 }
 0xa7e   : > { %v2162_v46 = vadd.f32 %v2161_v44, %v2018_v24  ;;  %v2176_v47 = vadd.f32 %v2175_v45, %v2019_v41  ;;  %2275 = vmatpush.bf16.msrb.mxu3 %v2266_v42  ;;  %v2383_v42 = vunpack.c.l.b16 %v5080_v55 }
 0xa80   : > { %v2194_v48 = vpack.c.bf16 %v2162_v46, %v2162_v46  ;;  %v2196_v49 = vpack.c.bf16 %v2176_v47, %v2176_v47  ;;  %v2191_v50 = vpop.f32.mrf.mxu0 }
 0xa81   : > { %v2192_v30 = vadd.f32 %v2191_v50, %v2020_v38 }
 0xa82   : > { %v2301_v52 = vunpack.c.l.b16 %v2194_v48  ;;  %v2202_v53 = vsel %vm1216_vm7, %v2196_v49, 0  ;;  %v2306_v31 = vunpack.c.l.b16 %v2196_v49 }
 0xa83   : > { %v5085_v15 = vpack.c.bf16 %v2192_v30, %v2192_v30  ;;  %2211 = vmatpush.bf16.xpose.msrb.mxu1 %v2202_v53 }
 0xa84   : > { %v2302_v56 = vpack.c.b16 %v2301_v52, %v2301_v52  ;;  %v2307_v57 = vpack.c.b16 %v2306_v31, %v2306_v31 }
 0xa85   : > { %v2285_v58 = vsel %vm1285_vm8, %v5085_v15, 0  ;;  %v2163_v59 = vpop.f32.mrf.mxu2  ;;  %v2177_v60 = vpop.f32.mrf.mxu3 }
 0xa86   : > { %v2164_v61 = vadd.f32 %v2163_v59, %v2018_v24  ;;  %v2178_v62 = vadd.f32 %v2177_v60, %v2019_v41  ;;  %2294 = vmatpush.bf16.msrb.mxu0 %v2285_v58  ;;  %2308 = vrot.lane.b32.xlu1 %v2307_v57, %s4473_s26  ;;  %v2407_v59 = vunpack.c.l.b16 %v5085_v15 }
 0xa87   : > { %2303 = vrot.lane.b32.xlu0 %v2302_v56, %s4473_s26 }
 0xa88   : > { %v2195_v63 = vpack.c.bf16 %v2164_v61, %v2164_v61  ;;  %v2197_v0 = vpack.c.bf16 %v2178_v62, %v2178_v62  ;;  %v2408_v61 = vpack.c.b16 %v2407_v59, %v2407_v59  ;;  %v4150_v59 = vld [vmem:[%s4704_s16 + $0xe4] sm:$0xf] }
 0xa8a   : > { %v2330_v1 = vunpack.c.l.b16 %v2195_v63  ;;  %v2221_v2 = vsel %vm1216_vm7, %v2197_v0, 0  ;;  %v2335_v3 = vunpack.c.l.b16 %v2197_v0  ;;  %3764 = vmatmul.msk.bf16.vlgmr.msrb.gmra.mxu1 %vm1216_vm7, %v2194_v48 }
 0xa8b   : > { %2230 = vmatpush.bf16.xpose.msra.mxu2 %v2221_v2 }
 0xa8c   : > { %v2331_v4 = vpack.c.b16 %v2330_v1, %v2330_v1  ;;  %v2336_v5 = vpack.c.b16 %v2335_v3, %v2335_v3 }
 0xa8e   : > { %2337 = vrot.lane.b32.xlu2 %v2336_v5, %s4473_s26  ;;  %2332 = vrot.lane.b32.xlu1 %v2331_v4, %s4473_s26 }
 0xa92   : > { %3765 = vmatmul.msk.bf16.vlgmr.msra.gmra.mxu2 %vm1216_vm7, %v2195_v63 }
 0xae8   : > { %v2338_v6 = vpop.permute.xlu2 %2337 }
 0xae9   : > { %v2343_v11 = vsel %vm1216_vm7, %v2338_v6, 0 }
 0xaea   : > { %2352 = vmatpush.bf16.xpose.msrb.mxu2 %v2343_v11 }
 0xaf8   : > { %v2309_v9 = vpop.permute.xlu1 %2308 }
 0xaf9   : > { %v2314_v12 = vsel %vm1216_vm7, %v2309_v9, 0  ;;  %v2304_v54 = vpop.permute.xlu0 %2303 }
 0xafa   : > { %2323 = vmatpush.bf16.xpose.msra.mxu1 %v2314_v12 }
 0xb00   : > { %v2333_v14 = vpop.permute.xlu1 %2332 }
 0xb01   : > { %3768 = vmatmul.msk.bf16.vlgmr.msra.gmra.mxu1 %vm1216_vm7, %v2304_v54  ;;  %3769 = vmatmul.msk.bf16.vlgmr.msrb.gmra.mxu2 %vm1216_vm7, %v2333_v14 }
 0xb07   : > { %v2213_v16 = vpop.f32.mrf.mxu1 }
 0xb08   : > { %v2214_v17 = vadd.f32 %v2213_v16, %v4838_v32 }
 0xb0a   : > { %v2236_v18 = vsel %vm1255_vm9, %v2214_v17, -inf }
 0xb0b   : > { %2237 = vmax.xlane.f32.xlu0 %v2236_v18 }
 0xb0f   : > { %v2215_v19 = vpop.f32.mrf.mxu1 }
 0xb10   : > { %v4137_v19 = vld [vmem:[%s4872_s30 + $0x78] sm:$0xff] }
 0xb11   : > { %2511 = vmatpush.bf16.msrb.mxu1 %v4137_v19 }
 0xb15   : > { %v2232_v20 = vpop.f32.mrf.mxu2 }
 0xb16   : > { %v2233_v10 = vadd.f32 %v2232_v20, %v4842_v43  ;;  %v4136_v20 = vld [vmem:[%s4872_s30 + $0x70] sm:$0xff] }
 0xb17   : > { %2512 = vmatpush.bf16.msrb.mxu1 %v4136_v20  ;;  %v3858_v20 = vld [vmem:[%s4704_s16 + $0xa0] sm:$0xf] }
 0xb18   : > { %v2239_v21 = vsel %vm1255_vm9, %v2233_v10, -inf }
 0xb19   : > { %2240 = vmax.xlane.f32.xlu2 %v2239_v21  ;;  %v4134_v21 = vld [vmem:[%s4872_s30 + $0x60] sm:$0xff] }
 0xb1d   : > { %v2234_v22 = vpop.f32.mrf.mxu2 }
 0xb1e   : > { %v4133_v22 = vld [vmem:[%s4872_s30 + $0x58] sm:$0xff] }
 0xb7e   : > { %v2325_v23 = vpop.f32.mrf.mxu1  ;;  %v2238_v25 = vpop.xlane.xlu0 %2237 }
 0xb7f   : > { %v2326_v26 = vadd.f32 %v2325_v23, %v4838_v32  ;;  %v2242_v27 = vsub.f32 %v2214_v17, %v2238_v25  ;;  %v4132_v25 = vld [vmem:[%s4872_s30 + $0x50] sm:$0xff] }
 0xb81   : > { %v2244_v28 = vmul.f32 1.442695, %v2242_v27  ;;  %v2358_v29 = vsel %vm1255_vm9, %v2326_v26, -inf }
 0xb82   : > { %2359 = vmax.xlane.f32.xlu1 %v2358_v29 }
 0xb83   : > { %4302 = vpow2.f32 %v2244_v28 }
 0xb84   : > { %v2354_v33 = vpop.f32.mrf.mxu2 }
 0xb85   : > { %v2355_v7 = vadd.f32 %v2354_v33, %v4842_v43  ;;  %v2384_v43 = vpack.c.b16 %v2383_v42, %v2383_v42 }
 0xb86   : > { %v2327_v13 = vpop.f32.mrf.mxu1 }
 0xb87   : > { %v2361_v34 = vsel %vm1255_vm9, %v2355_v7, -inf }
 0xb88   : > { %2362 = vmax.xlane.f32.xlu0 %v2361_v34 }
 0xb89   : > { %v4303_v37 = vpop.eup %4302 }
 0xb8a   : > { %v2248_v51 = vsel %vm1255_vm9, %v4303_v37, 0.0 }
 0xb8b   : > { %2249 = vadd.xlane.f32.xlu2 %v2248_v51 }
 0xb8c   : > { %v2356_v38 = vpop.f32.mrf.mxu2  ;;  %v2241_v39 = vpop.xlane.xlu2 %2240 }
 0xb8d   : > { %v2243_v32 = vsub.f32 %v2233_v10, %v2241_v39  ;;  %v4135_v10 = vld [vmem:[%s4872_s30 + $0x68] sm:$0xff] }
 0xb8e   : > { %2513 = vmatpush.bf16.msrb.mxu1 %v4135_v10  ;;  %v4143_v10 = vld [vmem:[%s4704_s16 + $0xa4] sm:$0xf0] }
 0xb8f   : > { %v2246_v40 = vmul.f32 1.442695, %v2243_v32  ;;  %v4258_v32 = vld [vmem:[%s4884_s23 + $0x1] ss:$0 sm:$0xff] }
 0xb91   : > { %4304 = vpow2.f32 %v2246_v40 }
 0xb92   : > { %2514 = vmatpush.bf16.msrb.mxu1 %v4134_v21  ;;  %v4142_v21 = vld [vmem:[%s4704_s16 + $0xa4] sm:$0xf] }
 0xb96   : > { %2515 = vmatpush.bf16.msrb.mxu1 %v4133_v22  ;;  %v3859_v22 = vor.u32 %v4143_v10, %v3858_v20  ;;  %v4162_v20 = vld [vmem:[%s4969_s14 + $0xc0] sm:$0xff] }
 0xb97   : > { %v4305_v24 = vpop.eup %4304 }
 0xb98   : > { %v2251_v41 = vsel %vm1255_vm9, %v4305_v24, 0.0 }
 0xb99   : > { %2252 = vadd.xlane.f32.xlu1 %v2251_v41 }
 0xb9a   : > { %2516 = vmatpush.bf16.msrb.mxu1 %v4132_v25 }
 0xbb2   : > { %2385 = vrot.lane.b32.xlu1 %v2384_v43, %s4473_s26 }
 0xbf5   : > { %v2360_v44 = vpop.xlane.xlu1 %2359 }
 0xbf6   : > { %v2364_v45 = vsub.f32 %v2326_v26, %v2360_v44  ;;  %v4131_v26 = vld [vmem:[%s4872_s30 + $0x48] sm:$0xff] }
 0xbf7   : > { %2517 = vmatpush.bf16.msrb.mxu1 %v4131_v26  ;;  %v3850_v26 = vld [vmem:[%s4704_s16 + $0x90] sm:$0xf] }
 0xbf8   : > { %v2366_v46 = vmul.f32 1.442695, %v2364_v45 }
 0xbfa   : > { %4306 = vpow2.f32 %v2366_v46 }
 0xbfb   : > { %v2363_v47 = vpop.xlane.xlu0 %2362 }
 0xbfc   : > { %v2365_v48 = vsub.f32 %v2355_v7, %v2363_v47  ;;  %v4130_v7 = vld [vmem:[%s4872_s30 + $0x40] sm:$0xff]  ;;  %s4041_s30 = sshll.u32 %s5306_s0, 6 }
 0xbfd   : > { %2518 = vmatpush.bf16.msrb.mxu1 %v4130_v7  ;;  %v3842_v7 = vld [vmem:[%s4704_s16 + $0x80] sm:$0xf] }
 0xbfe   : > { %v2368_v49 = vmul.f32 1.442695, %v2365_v48  ;;  %v2250_v50 = vpop.xlane.xlu2 %2249 }
 0xbff   : > { %4308 = vrcp.f32 %v2250_v50 }
 0xc00   : > { %v4307_v30 = vpop.eup %4306  ;;  %4310 = vpow2.f32 %v2368_v49 }
 0xc01   : > { %v2370_v52 = vsel %vm1255_vm9, %v4307_v30, 0.0 }
 0xc02   : > { %2371 = vadd.xlane.f32.xlu0 %v2370_v52  ;;  %v4153_v52 = vld [vmem:[%s4704_s16 + $0xf4] sm:$0xf0] }
 0xc05   : > { %v4309_v53 = vpop.eup %4308 }
 0xc06   : > { %v4311_v31 = vpop.eup %4310  ;;  %v2256_v55 = vmul.f32 %v4309_v53, %v4303_v37  ;;  %v4152_v53 = vld [vmem:[%s4704_s16 + $0xf4] sm:$0xf] }
 0xc07   : > { %v2373_v56 = vsel %vm1255_vm9, %v4311_v31, 0.0 }
 0xc08   : > { %v2258_v57 = vpack.c.bf16 %v2256_v55, %v2256_v55  ;;  %2374 = vadd.xlane.f32.xlu2 %v2373_v56  ;;  %v3900_v55 = vld [vmem:[%s4704_s16 + $0xf8] sm:$0xf0] }
 0xc09   : > { %v3903_v56 = vor.u32 %v4152_v53, %v3900_v55 }
 0xc0a   : > { %3766 = vmatmul.msk.bf16.vlgmr.msrb.gmra.mxu3 %vm1255_vm9, %v2258_v57  ;;  %v3890_v57 = vld [vmem:[%s4704_s16 + $0xe0] sm:$0xf] }
 0xc0c   : > { %v2253_v58 = vpop.xlane.xlu1 %2252 }
 0xc0d   : > { %4312 = vrcp.f32 %v2253_v58  ;;  %v4151_v58 = vld [vmem:[%s4704_s16 + $0xe4] sm:$0xf0] }
 0xc13   : > { %v4313_v60 = vpop.eup %4312 }
 0xc14   : > { %v2257_v62 = vmul.f32 %v4313_v60, %v4305_v24  ;;  %v3891_v60 = vor.u32 %v4151_v58, %v3890_v57  ;;  %v4259_v57 = vld [vmem:[%s4909_s22 + $0x1] ss:$0 sm:$0xff] }
 0xc16   : > { %v2259_v63 = vpack.c.bf16 %v2257_v62, %v2257_v62  ;;  %2409 = vrot.lane.b32.xlu0 %v2408_v61, %s4473_s26  ;;  %v3892_v61 = vld [vmem:[%s4704_s16 + $0xe8] sm:$0xf0] }
 0xc17   : > { %v3895_v62 = vor.u32 %v4150_v59, %v3892_v61 }
 0xc18   : > { %3767 = vmatmul.msk.bf16.vlgmr.msrb.gmra.mxu0 %vm1255_vm9, %v2259_v63  ;;  %v3882_v63 = vld [vmem:[%s4704_s16 + $0xd0] sm:$0xf] }
 0xc24   : > { %v2386_v0 = vpop.permute.xlu1 %2385 }
 0xc25   : > { %v2391_v1 = vsel %vm1285_vm8, %v2386_v0, 0  ;;  %v4149_v0 = vld [vmem:[%s4704_s16 + $0xd4] sm:$0xf0] }
 0xc26   : > { %2400 = vmatpush.bf16.msra.mxu3 %v2391_v1  ;;  %v4148_v1 = vld [vmem:[%s4704_s16 + $0xd4] sm:$0xf] }
 0xc2a   : > { %2700 = vmatpush.bf16.msrb.mxu3 %v3903_v56 }
 0xc2e   : > { %2701 = vmatpush.bf16.msrb.mxu3 %v3895_v62  ;;  %v4260_v62 = vld [vmem:[%s4915_s17 + $0x1] ss:$0 sm:$0xff]  ;;  %s5298_s17 = sld [smem:[#allocation20_spill]] }
 0xc75   : > { %v2372_v2 = vpop.xlane.xlu0 %2371 }
 0xc76   : > { %4314 = vrcp.f32 %v2372_v2  ;;  %v3883_v2 = vor.u32 %v4149_v0, %v3882_v63 }
 0xc7b   : > { %v2375_v3 = vpop.xlane.xlu2 %2374 }
 0xc7c   : > { %v4315_v4 = vpop.eup %4314  ;;  %4316 = vrcp.f32 %v2375_v3  ;;  %v3884_v3 = vld [vmem:[%s4704_s16 + $0xd8] sm:$0xf0] }
 0xc7d   : > { %v2378_v5 = vmul.f32 %v4315_v4, %v4307_v30  ;;  %v3898_v30 = vld [vmem:[%s4704_s16 + $0xf0] sm:$0xf]  ;;  %v3887_v4 = vor.u32 %v4148_v1, %v3884_v3  ;;  %v4169_v3 = vld [vmem:[%s4969_s14 + $0xf8] sm:$0xff] }
 0xc7e   : > { %2900 = vmatpush.bf16.msra.mxu1 %v4169_v3 }
 0xc7f   : > { %v2380_v15 = vpack.c.bf16 %v2378_v5, %v2378_v5  ;;  %2702 = vmatpush.bf16.msrb.mxu3 %v3887_v4  ;;  %v3874_v5 = vld [vmem:[%s4704_s16 + $0xc0] sm:$0xf]  ;;  %v4168_v4 = vld [vmem:[%s4969_s14 + $0xf0] sm:$0xff] }
 0xc81   : > { %3770 = vmatmul.msk.bf16.vlgmr.msra.gmra.mxu3 %vm1255_vm9, %v2380_v15  ;;  %v4147_v15 = vld [vmem:[%s4704_s16 + $0xc4] sm:$0xf0] }
 0xc82   : > { %v4317_v6 = vpop.eup %4316  ;;  %2901 = vmatpush.bf16.msra.mxu1 %v4168_v4 }
 0xc83   : > { %v2379_v11 = vmul.f32 %v4317_v6, %v4311_v31  ;;  %v3899_v31 = vor.u32 %v4153_v52, %v3898_v30  ;;  %v4146_v6 = vld [vmem:[%s4704_s16 + $0xc4] sm:$0xf] }
 0xc85   : > { %v2381_v54 = vpack.c.bf16 %v2379_v11, %v2379_v11  ;;  %2686 = vmatpush.bf16.msra.mxu2 %v3899_v31  ;;  %v3875_v11 = vor.u32 %v4147_v15, %v3874_v5  ;;  %v4159_v5 = vld [vmem:[%s4969_s14 + $0xa8] sm:$0xff] }
 0xc86   : > { %v4167_v15 = vld [vmem:[%s4969_s14 + $0xe8] sm:$0xff] }
 0xc87   : > { %2902 = vmatpush.bf16.msra.mxu1 %v4167_v15 }
 0xc88   : > { %v2410_v9 = vpop.permute.xlu0 %2409 }
 0xc89   : > { %v2415_v12 = vsel %vm1285_vm8, %v2410_v9, 0  ;;  %2687 = vmatpush.bf16.msra.mxu2 %v3891_v60  ;;  %v3876_v9 = vld [vmem:[%s4704_s16 + $0xc8] sm:$0xf0] }
 0xc8a   : > { %2424 = vmatpush.bf16.msra.mxu0 %v2415_v12  ;;  %v3879_v12 = vor.u32 %v4146_v6, %v3876_v9  ;;  %v4158_v6 = vld [vmem:[%s4969_s14 + $0xa0] sm:$0xff]  ;;  %v4157_v9 = vld [vmem:[%s4969_s14 + $0x98] sm:$0xff] }
 0xc8c   : > { %2703 = vmatpush.bf16.msrb.mxu3 %v3879_v12  ;;  %v4165_v12 = vld [vmem:[%s4969_s14 + $0xd8] sm:$0xff] }
 0xc8d   : > { %v2277_v14 = vpop.f32.mrf.mxu3  ;;  %3771 = vmatmul.msk.bf16.vlgmr.msra.gmra.mxu0 %vm1255_vm9, %v2381_v54  ;;  %2688 = vmatpush.bf16.msra.mxu2 %v3883_v2  ;;  %v3866_v54 = vld [vmem:[%s4704_s16 + $0xb0] sm:$0xf]  ;;  %v4161_v2 = vld [vmem:[%s4969_s14 + $0xb8] sm:$0xff] }
 0xc8e   : > { %2886 = vmatpush.bf16.msrb.mxu0 %v4161_v2 }
 0xc91   : > { %2689 = vmatpush.bf16.msra.mxu2 %v3875_v11  ;;  %v4166_v11 = vld [vmem:[%s4969_s14 + $0xe0] sm:$0xff] }
 0xc92   : > { %2903 = vmatpush.bf16.msra.mxu1 %v4166_v11 }
 0xc95   : > { %v2279_v16 = vpop.f32.mrf.mxu3  ;;  %v2296_v17 = vpop.f32.mrf.mxu0 }
 0xc96   : > { %v4144_v16 = vld [vmem:[%s4704_s16 + $0xb4] sm:$0xf]  ;;  %2904 = vmatpush.bf16.msra.mxu1 %v4165_v12 }
 0xc9d   : > { %v2298_v18 = vpop.f32.mrf.mxu0 }
 0xc9e   : > { %v3868_v18 = vld [vmem:[%s4704_s16 + $0xb8] sm:$0xf0] }
 0xc9f   : > { %v3871_v19 = vor.u32 %v4144_v16, %v3868_v18  ;;  %v4155_v16 = vld [vmem:[%s4969_s14 + $0x88] sm:$0xff]  ;;  %v3839_v18 = vld [vmem:[%s4987_s11 + $0x2] sm:$0x3] }
 0xca0   : > { %v2602_v10 = vperm.slane %v3839_v18, 0 }
 0xca1   : > { %2704 = vmatpush.bf16.msrb.mxu3 %v3871_v19  ;;  %v4154_v19 = vld [vmem:[%s4969_s14 + $0x80] sm:$0xff] }
 0xd04   : > { %v2402_v23 = vpop.f32.mrf.mxu3 }
 0xd0a   : > { %v2426_v27 = vpop.f32.mrf.mxu0 }
 0xd0b   : > { %v4244_v28 = vpack.i.bf16 %v2426_v27, %v2402_v23  ;;  %v3860_v23 = vld [vmem:[%s4704_s16 + $0xa8] sm:$0xf0]  ;;  %v4141_v27 = vld [vmem:[%s4704_s16 + $0x94] sm:$0xf0] }
 0xd0c   : > { %v2404_v29 = vpop.f32.mrf.mxu3  ;;  %v3863_v25 = vor.u32 %v4142_v21, %v3860_v23  ;;  %v2603_v21 = vperm.slane %v3839_v18, 1 }
 0xd0d   : > { %4245 = vrot.lane.b32.xlu2 %v4244_v28, %s4473_s26  ;;  %v4140_v28 = vld [vmem:[%s4704_s16 + $0x94] sm:$0xf]  ;;  %v3851_v29 = vor.u32 %v4141_v27, %v3850_v26  ;;  %s927_s26 = scalar_lea.vmem %s5297_s2, %s5306_s0 }
 0xd0e   : > { %2705 = vmatpush.bf16.msrb.mxu3 %v3863_v25 }
 0xd12   : > { %v2428_v33 = vpop.f32.mrf.mxu0 }
 0xd13   : > { %v3852_v33 = vld [vmem:[%s4704_s16 + $0x98] sm:$0xf0] }
 0xd67   : > { %v4246_v13 = vpop.permute.xlu2 %4245 }
 0xd68   : > { %v4248_v34 = vunpack.i.h.bf16 %v4246_v13  ;;  %v4247_v37 = vunpack.i.l.bf16 %v4246_v13  ;;  %v4139_v13 = vld [vmem:[%s4704_s16 + $0x84] sm:$0xf0] }
 0xd6a   : > { %v2439_v51 = vsel %vm1216_vm7, %v2296_v17, %v4248_v34  ;;  %v2438_v38 = vsel %vm1216_vm7, %v2277_v14, %v4247_v37  ;;  %v4145_v14 = vld [vmem:[%s4704_s16 + $0xb4] sm:$0xf0]  ;;  %v3855_v37 = vor.u32 %v4140_v28, %v3852_v33 }
 0xd6b   : > { %v2440_v39 = vpack.c.bf16 %v2439_v51, %v2438_v38  ;;  %v3867_v17 = vor.u32 %v4145_v14, %v3866_v54  ;;  %v4138_v51 = vld [vmem:[%s4704_s16 + $0x84] sm:$0xf]  ;;  %v3844_v38 = vld [vmem:[%s4704_s16 + $0x88] sm:$0xf0]  ;;  %v4156_v54 = vld [vmem:[%s4969_s14 + $0x90] sm:$0xff] }
 0xd6c   : > { %2706 = vmatpush.bf16.msrb.mxu3 %v3855_v37  ;;  %v4164_v14 = vld [vmem:[%s4969_s14 + $0xd0] sm:$0xff] }
 0xd6d   : > { %2519 = vmatmul.bf16.vlgmr.msrb.gmra.mxu1 %v2440_v39  ;;  %2690 = vmatpush.bf16.msra.mxu2 %v3867_v17  ;;  %v4163_v17 = vld [vmem:[%s4969_s14 + $0xc8] sm:$0xff] }
 0xd6e   : > { %2905 = vmatpush.bf16.msra.mxu1 %v4164_v14 }
 0xd71   : > { %2691 = vmatpush.bf16.msra.mxu2 %v3859_v22 }
 0xd72   : > { %2906 = vmatpush.bf16.msra.mxu1 %v4163_v17 }
 0xd75   : > { %2692 = vmatpush.bf16.msra.mxu2 %v3851_v29 }
 0xd76   : > { %2907 = vmatpush.bf16.msra.mxu1 %v4162_v20 }
 0xdea   : > { %v2520_v40 = vpop.f32.mrf.mxu1 }
 0xdeb   : > { %v2521_v24 = vadd.f32 %v4258_v32, %v2520_v40  ;;  %v3847_v40 = vor.u32 %v4138_v51, %v3844_v38 }
 0xded   : > { %v2525_v41 = vadd.f32 %v2521_v24, %v5073_v35  ;;  %2707 = vmatpush.bf16.msrb.mxu3 %v3847_v40 }
 0xdef   : > { %2531 = vadd.xlane.f32.xlu0 %v2525_v41 }
 0xdf2   : > { %v2522_v42 = vpop.f32.mrf.mxu1 }
 0xdf3   : > { %v2523_v43 = vadd.f32 %v4258_v32, %v2522_v42  ;;  %v3843_v32 = vor.u32 %v4139_v13, %v3842_v7 }
 0xdf5   : > { %v2526_v44 = vadd.f32 %v2523_v43, %v5075_v36  ;;  %2693 = vmatpush.bf16.msra.mxu2 %v3843_v32 }
 0xdf7   : > { %2533 = vadd.xlane.f32.xlu1 %v2526_v44 }
 0xe62   : > { %v2532_v45 = vpop.xlane.xlu0 %2531 }
 0xe63   : > { %v2535_v46 = vmul.f32 %v2532_v45, %v4718_v8 }
 0xe65   : > { %v5137_v47 = vsub.f32 %v2525_v41, %v2535_v46 }
 0xe67   : > { %v2539_v48 = vmul.f32 %v5137_v47, %v5137_v47 }
 0xe69   : > { %2541 = vadd.xlane.f32.xlu2 %v2539_v48 }
 0xe6a   : > { %v2534_v35 = vpop.xlane.xlu1 %2533 }
 0xe6b   : > { %v2536_v49 = vmul.f32 %v2534_v35, %v4718_v8 }
 0xe6d   : > { %v5142_v50 = vsub.f32 %v2526_v44, %v2536_v49 }
 0xe6f   : > { %v2540_v36 = vmul.f32 %v5142_v50, %v5142_v50 }
 0xe71   : > { %2543 = vadd.xlane.f32.xlu0 %v2540_v36 }
 0xedc   : > { %v2542_v34 = vpop.xlane.xlu2 %2541 }
 0xedd   : > { %v2545_v39 = vmul.f32 %v2542_v34, %v4718_v8 }
 0xedf   : > { %v2547_v24 = vadd.f32 1e-12, %v2545_v39 }
 0xee1   : > { %4318 = vrsqrt.f32 %v2547_v24  ;;  %vm2555_vm7 = vweird.f32 %v2547_v24 }
 0xee4   : > { %v2544_v41 = vpop.xlane.xlu0 %2543 }
 0xee5   : > { %v2546_v42 = vmul.f32 %v2544_v41, %v4718_v8 }
 0xee7   : > { %v4319_v43 = vpop.eup %4318  ;;  %v2548_v44 = vadd.f32 1e-12, %v2546_v42 }
 0xee8   : > { %v2550_v45 = vmul.f32 %v4319_v43, %v2547_v24  ;;  %vm2556_vm6 = vweird.f32 %v4319_v43 }
 0xee9   : > { %4320 = vrsqrt.f32 %v2548_v44  ;;  %vm2557_vm8 = vmor %vm2555_vm7, %vm2556_vm6  ;;  %vm2565_vm10 = vweird.f32 %v2548_v44 }
 0xeea   : > { %v2551_v46 = vmul.f32 %v4319_v43, %v2550_v45 }
 0xeec   : > { %v2552_v48 = vmul.f32 0.5, %v2551_v46 }
 0xeee   : > { %v2553_v35 = vsub.f32 1.5, %v2552_v48 }
 0xeef   : > { %v4321_v49 = vpop.eup %4320 }
 0xef0   : > { %v2554_v36 = vmul.f32 %v4319_v43, %v2553_v35  ;;  %v2560_v30 = vmul.f32 %v4321_v49, %v2548_v44  ;;  %vm2566_vm9 = vweird.f32 %v4321_v49 }
 0xef1   : > { %vm2567_vm11 = vmor %vm2565_vm10, %vm2566_vm9 }
 0xef2   : > { %v2561_v52 = vmul.f32 %v4321_v49, %v2560_v30  ;;  %v2558_v53 = vsel %vm2557_vm8, %v4319_v43, %v2554_v36 }
 0xef3   : > { %v2569_v56 = vmul.f32 %v2558_v53, %v5137_v47 }
 0xef4   : > { %v2562_v31 = vmul.f32 0.5, %v2561_v52 }
 0xef5   : > { %v2574_v61 = vmul.f32 %v4259_v57, %v2569_v56 }
 0xef6   : > { %v2563_v55 = vsub.f32 1.5, %v2562_v31 }
 0xef7   : > { %v5184_v0 = vadd.f32 %v4260_v62, %v2574_v61 }
 0xef8   : > { %v2564_v58 = vmul.f32 %v4321_v49, %v2563_v55 }
 0xefa   : > { %v2568_v59 = vsel %vm2567_vm11, %v4321_v49, %v2564_v58 }
 0xefb   : > { %v2570_v60 = vmul.f32 %v2568_v59, %v5142_v50  ;;  %v4160_v50 = vld [vmem:[%s4969_s14 + $0xb0] sm:$0xff] }
 0xefc   : > { %2887 = vmatpush.bf16.msrb.mxu0 %v4160_v50 }
 0xefd   : > { %v2575_v63 = vmul.f32 %v4259_v57, %v2570_v60 }
 0xeff   : > { %v5186_v1 = vadd.f32 %v4260_v62, %v2575_v63 }
 0xf00   : > { %2888 = vmatpush.bf16.msrb.mxu0 %v4159_v5  ;;  %v4261_v5 = vld [vmem:[%s4965_s1 + $0x1] ss:$0 sm:$0xff]  ;;  %s924_s1 = scalar_lea.vmem %s5298_s17, %s4041_s30 }
 0xf01   : > { %v2581_v47 = vpack.c.bf16 %v5186_v1, %v5184_v0 }
 0xf03   : > { %2694 = vmatmul.bf16.vlgmr.msra.gmra.mxu2 %v2581_v47  ;;  %2708 = vmatmul.bf16.vlgmr.msrb.gmra.mxu3 %v2581_v47 }
 0xf04   : > { %2889 = vmatpush.bf16.msrb.mxu0 %v4158_v6 }
 0xf08   : > { %2890 = vmatpush.bf16.msrb.mxu0 %v4157_v9 }
 0xf0c   : > { %2891 = vmatpush.bf16.msrb.mxu0 %v4156_v54 }
 0xf10   : > { %2892 = vmatpush.bf16.msrb.mxu0 %v4155_v16 }
 0xf14   : > { %2893 = vmatpush.bf16.msrb.mxu0 %v4154_v19 }
 0xf86   : > { %v2695_v22 = vpop.f32.mrf.mxu2  ;;  %v2709_v23 = vpop.f32.mrf.mxu3 }
 0xf87   : > { %v2696_v25 = vadd.f32 %v2695_v22, %v2602_v10  ;;  %v2710_v26 = vadd.f32 %v2709_v23, %v2603_v21 }
 0xf89   : > { %v2718_v27 = vmul.f32 0.044715, %v2696_v25  ;;  %v2719_v28 = vmul.f32 0.044715, %v2710_v26  ;;  %v2714_v57 = vmul.f32 0.5, %v2696_v25  ;;  %v2715_v60 = vmul.f32 0.5, %v2710_v26 }
 0xf8b   : > { %v2722_v29 = vmul.f32 %v2718_v27, %v2696_v25  ;;  %v2723_v33 = vmul.f32 %v2719_v28, %v2710_v26  ;;  %v4175_v27 = vld [vmem:[%s924_s1 + $0x28] sm:$0xff]  ;;  %v4174_v28 = vld [vmem:[%s924_s1 + $0x20] sm:$0xff] }
 0xf8d   : > { %v2726_v7 = vmul.f32 %v2722_v29, %v2696_v25  ;;  %v2727_v13 = vmul.f32 %v2723_v33, %v2710_v26  ;;  %v4173_v29 = vld [vmem:[%s924_s1 + $0x18] sm:$0xff] }
 0xf8e   : > { %v2697_v34 = vpop.f32.mrf.mxu2  ;;  %v2711_v37 = vpop.f32.mrf.mxu3 }
 0xf8f   : > { %v2730_v51 = vadd.f32 %v2726_v7, %v2696_v25  ;;  %v2698_v38 = vadd.f32 %v2697_v34, %v2602_v10  ;;  %v2712_v39 = vadd.f32 %v2711_v37, %v2603_v21  ;;  %v2731_v32 = vadd.f32 %v2727_v13, %v2710_v26  ;;  %v4176_v26 = vld [vmem:[%s924_s1 + $0x30] sm:$0xff]  ;;  %v4171_v37 = vld [vmem:[%s924_s1 + $0x8] sm:$0xff] }
 0xf90   : > { %v4172_v13 = vld [vmem:[%s924_s1 + $0x10] sm:$0xff] }
 0xf91   : > { %v2720_v40 = vmul.f32 0.044715, %v2698_v38  ;;  %v2721_v24 = vmul.f32 0.044715, %v2712_v39  ;;  %v2734_v41 = vmul.f32 0.7978846, %v2730_v51 }
 0xf92   : > { %v2735_v43 = vmul.f32 0.7978846, %v2731_v32  ;;  %v2716_v58 = vmul.f32 0.5, %v2698_v38  ;;  %v2717_v61 = vmul.f32 0.5, %v2712_v39 }
 0xf93   : > { %v2724_v42 = vmul.f32 %v2720_v40, %v2698_v38  ;;  %v2725_v44 = vmul.f32 %v2721_v24, %v2712_v39  ;;  %4322 = vtanh.f32 %v2734_v41 }
 0xf94   : > { %4324 = vtanh.f32 %v2735_v43 }
 0xf95   : > { %v2728_v45 = vmul.f32 %v2724_v42, %v2698_v38  ;;  %v2729_v46 = vmul.f32 %v2725_v44, %v2712_v39 }
 0xf97   : > { %v2732_v48 = vadd.f32 %v2728_v45, %v2698_v38  ;;  %v2733_v35 = vadd.f32 %v2729_v46, %v2712_v39  ;;  %v4170_v38 = vld [vmem:[%s924_s1] sm:$0xff] }
 0xf99   : > { %v2736_v49 = vmul.f32 0.7978846, %v2732_v48  ;;  %v2737_v36 = vmul.f32 0.7978846, %v2733_v35  ;;  %v4323_v30 = vpop.eup %4322 }
 0xf9a   : > { %v4325_v52 = vpop.eup %4324  ;;  %v2742_v53 = vadd.f32 1.0, %v4323_v30 }
 0xf9b   : > { %4326 = vtanh.f32 %v2736_v49  ;;  %v2743_v55 = vadd.f32 1.0, %v4325_v52 }
 0xf9c   : > { %4328 = vtanh.f32 %v2737_v36  ;;  %v2746_v63 = vmul.f32 %v2742_v53, %v2714_v57  ;;  %v4257_v53 = vld [vmem:[%s5017_s10 + $0x1] ss:$0 sm:$0xff] }
 0xf9d   : > { %v2747_v2 = vmul.f32 %v2743_v55, %v2715_v60 }
 0xfa1   : > { %v4327_v31 = vpop.eup %4326 }
 0xfa2   : > { %v4329_v56 = vpop.eup %4328  ;;  %v2744_v59 = vadd.f32 1.0, %v4327_v31 }
 0xfa3   : > { %v2745_v62 = vadd.f32 1.0, %v4329_v56 }
 0xfa4   : > { %v2748_v47 = vmul.f32 %v2744_v59, %v2716_v58 }
 0xfa5   : > { %v2749_v3 = vmul.f32 %v2745_v62, %v2717_v61 }
 0xfa6   : > { %v2750_v50 = vpack.c.bf16 %v2748_v47, %v2746_v63 }
 0xfa7   : > { %v2751_v4 = vpack.c.bf16 %v2749_v3, %v2747_v2 }
 0xfa8   : > { %2894 = vmatmul.bf16.vlgmr.msrb.gmra.mxu0 %v2750_v50  ;;  %v4263_v50 = vld [vmem:[%s927_s26] ss:$0 sm:$0xff] }
 0xfa9   : > { %2908 = vmatmul.bf16.vlgmr.msra.gmra.mxu1 %v2751_v4 }
0x1025   : > { %v2895_v15 = vpop.f32.mrf.mxu0 }
0x1026   : > { %v2896_v6 = vadd.f32 %v4261_v5, %v2895_v15  ;;  %v2909_v11 = vpop.f32.mrf.mxu1 }
0x1028   : > { %v2910_v9 = vadd.f32 %v2909_v11, %v2896_v6 }
0x102a   : > { %v2914_v12 = vadd.f32 %v2910_v9, %v5184_v0 }
0x102c   : > { %2920 = vadd.xlane.f32.xlu2 %v2914_v12 }
0x102d   : > { %v2897_v54 = vpop.f32.mrf.mxu0 }
0x102e   : > { %v2898_v14 = vadd.f32 %v4261_v5, %v2897_v54  ;;  %v2911_v16 = vpop.f32.mrf.mxu1 }
0x1030   : > { %v2912_v17 = vadd.f32 %v2911_v16, %v2898_v14 }
0x1032   : > { %v2915_v18 = vadd.f32 %v2912_v17, %v5186_v1  ;;  %v4177_v1 = vld [vmem:[%s924_s1 + $0x38] sm:$0xff] }
0x1033   : > { %3049 = vmatpush.bf16.msrb.mxu2 %v4177_v1 }
0x1034   : > { %2922 = vadd.xlane.f32.xlu1 %v2915_v18 }
0x1037   : > { %3050 = vmatpush.bf16.msrb.mxu2 %v4176_v26 }
0x103b   : > { %3051 = vmatpush.bf16.msrb.mxu2 %v4175_v27 }
0x103f   : > { %3052 = vmatpush.bf16.msrb.mxu2 %v4174_v28 }
0x1043   : > { %3053 = vmatpush.bf16.msrb.mxu2 %v4173_v29 }
0x1047   : > { %3054 = vmatpush.bf16.msrb.mxu2 %v4172_v13 }
0x104b   : > { %3055 = vmatpush.bf16.msrb.mxu2 %v4171_v37 }
0x104f   : > { %3056 = vmatpush.bf16.msrb.mxu2 %v4170_v38 }
0x109f   : > { %v2921_v19 = vpop.xlane.xlu2 %2920 }
0x10a0   : > { %v2924_v20 = vmul.f32 %v2921_v19, %v4718_v8 }
0x10a2   : > { %v2926_v10 = vsub.f32 %v2914_v12, %v2924_v20 }
0x10a4   : > { %v2928_v21 = vmul.f32 %v2926_v10, %v2926_v10 }
0x10a6   : > { %2930 = vadd.xlane.f32.xlu1 %v2928_v21 }
0x10a7   : > { %v2923_v22 = vpop.xlane.xlu1 %2922 }
0x10a8   : > { %v2925_v23 = vmul.f32 %v2923_v22, %v4718_v8 }
0x10aa   : > { %v2927_v0 = vsub.f32 %v2915_v18, %v2925_v23 }
0x10ac   : > { %v2929_v25 = vmul.f32 %v2927_v0, %v2927_v0 }
0x10ae   : > { %2932 = vadd.xlane.f32.xlu0 %v2929_v25 }
0x1119   : > { %v2931_v33 = vpop.xlane.xlu1 %2930 }
0x111a   : > { %v2934_v7 = vmul.f32 %v2931_v33, %v4718_v8 }
0x111c   : > { %v2936_v34 = vadd.f32 1e-12, %v2934_v7 }
0x111e   : > { %4330 = vrsqrt.f32 %v2936_v34  ;;  %vm2944_vm13 = vweird.f32 %v2936_v34 }
0x1121   : > { %v2933_v51 = vpop.xlane.xlu0 %2932 }
0x1122   : > { %v2935_v39 = vmul.f32 %v2933_v51, %v4718_v8  ;;  %v4262_v8 = vld [vmem:[%s5011_s27 + $0x1] ss:$0 sm:$0xff]  ;;  %s931_s27 = scalar_lea.vmem %s5299_s25, %s4831_s19 }
0x1124   : > { %v4331_v32 = vpop.eup %4330  ;;  %v2937_v40 = vadd.f32 1e-12, %v2935_v39 }
0x1125   : > { %v2939_v24 = vmul.f32 %v4331_v32, %v2936_v34  ;;  %vm2945_vm12 = vweird.f32 %v4331_v32 }
0x1126   : > { %4332 = vrsqrt.f32 %v2937_v40  ;;  %vm2946_vm14 = vmor %vm2944_vm13, %vm2945_vm12  ;;  %vm2954_vm0 = vweird.f32 %v2937_v40 }
0x1127   : > { %v2940_v41 = vmul.f32 %v4331_v32, %v2939_v24 }
0x1129   : > { %v2941_v42 = vmul.f32 0.5, %v2940_v41 }
0x112b   : > { %v2942_v43 = vsub.f32 1.5, %v2941_v42 }
0x112c   : > { %v4333_v44 = vpop.eup %4332 }
0x112d   : > { %v2943_v45 = vmul.f32 %v4331_v32, %v2942_v43  ;;  %v2949_v46 = vmul.f32 %v4333_v44, %v2937_v40  ;;  %vm2955_vm15 = vweird.f32 %v4333_v44 }
0x112e   : > { %vm2956_vm1 = vmor %vm2954_vm0, %vm2955_vm15 }
0x112f   : > { %v2947_v48 = vsel %vm2946_vm14, %v4331_v32, %v2943_v45  ;;  %v2950_v35 = vmul.f32 %v4333_v44, %v2949_v46 }
0x1130   : > { %v2958_v36 = vmul.f32 %v2947_v48, %v2926_v10 }
0x1131   : > { %v2951_v49 = vmul.f32 0.5, %v2950_v35 }
0x1132   : > { %v2963_v31 = vmul.f32 %v4262_v8, %v2958_v36 }
0x1133   : > { %v2952_v30 = vsub.f32 1.5, %v2951_v49 }
0x1134   : > { %v2968_v58 = vadd.f32 %v4257_v53, %v2963_v31 }
0x1135   : > { %v2953_v52 = vmul.f32 %v4333_v44, %v2952_v30 }
0x1136   : > { %v2970_v60 = vpack.c.bf16 %v2968_v58, %v2968_v58 }
0x1137   : > { %v2957_v55 = vsel %vm2956_vm1, %v4333_v44, %v2953_v52 }
0x1138   : > { %v2959_v56 = vmul.f32 %v2957_v55, %v2927_v0  ;;  %v2994_v63 = vunpack.c.l.b16 %v2970_v60 }
0x113a   : > { %v2964_v57 = vmul.f32 %v4262_v8, %v2959_v56 }
0x113c   : > { %v2969_v59 = vadd.f32 %v4257_v53, %v2964_v57 }
0x113e   : > { %v2971_v61 = vpack.c.bf16 %v2969_v59, %v2969_v59 }
0x1140   : > { %v2995_v62 = vunpack.c.l.b16 %v2971_v61 }
0x1142   : > { %v2996_v47 = vrot.slane %v2995_v62, 7 }
0x1144   : > { %v2998_v2 = vsel %vm2997_vm2, %v2996_v47, %v2994_v63 }
0x1145   : > { %v2999_v3 = vpack.c.b16 %v2998_v2, %v2998_v2 }
0x1147   : > { %3057 = vmatmul.bf16.vlgmr.msrb.gmra.mxu2 %v2999_v3 }
0x11ca   : > { %v3058_v4 = vpop.f32.mrf.mxu2 }
0x11cb   : > { %v3059_v5 = vadd.f32 %v4263_v50, %v3058_v4 }
0x11cd   : > { %4334 = vtanh.f32 %v3059_v5 }
0x11d2   : > { %v3060_v15 = vpop.f32.mrf.mxu2 }
0x11d3   : > { %v4335_v6 = vpop.eup %4334 }
0x11d4   : > { %3063 = vst [vmem:[%s931_s27] sm:$0x3] %v4335_v6 }
0x11d5 PF: > { %s5300_s30 = sld [smem:[#allocation10_spill]]  ;;  %s5303_s27 = smov %s4456_s28 }
0x11d6   : > { %s5301_s15 = sld [smem:[#allocation9_spill]] }
0x11d7   : > { %s5302_s29 = sld [smem:[#allocation11_spill]] }
0x11db   : > { %p31_p7 = scmp.ge.s32.totalorder %s5300_s30, 4  }
0x11dc   : > { %s5304_s28 = smov %s5301_s15 }
0x11dd   :  { %33 = sbr.rel (!%p31_p7) target bundleno = 17 (0x11), region = 213 }
0x11e2   :  { %3083 = vsyncpa [#allocation3], 1 }
0x11e3   :  { %3085 = vsyncpa [#allocation3 + $0x1], 1 }
0x11e4   :  { %3086 = vsyncpa [#allocation5], 1 }
0x11e5   :  { %3088 = vsyncpa [#allocation5 + $0x1], 1 }

</bundles_post_ra>
